<compile_context>
chip_gen: v6e
topology: v6e:2x2x1
jax: 0.10.0
libtpu: 0.0.40
codegen_flags: <defaults>
</compile_context>

<pallas_src>
import numpy as np

import jax
import jax.numpy as jnp
from jax import lax
from jax.experimental import pallas as pl
from jax.experimental.pallas import tpu as pltpu


# ---------------------------------------------------------------------------
# Host-side constant builders (run once at init)
# ---------------------------------------------------------------------------
def _eye_off(n, k):
    return np.eye(n, n, k=k, dtype=np.float32)


def _row_select(b, h, p):
    # (b*h/2, b*h): out row (bi, io) <- in row (bi, 2*io+p)
    ho = h // 2
    s = np.zeros((ho, h), np.float32)
    s[np.arange(ho), 2 * np.arange(ho) + p] = 1.0
    return np.kron(np.eye(b, dtype=np.float32), s)


def _col_select(c, w, q):
    # (c*w, c*w/2): out lane (c, jo) <- in lane (c, 2*jo+q)
    wo = w // 2
    s = np.zeros((w, wo), np.float32)
    s[2 * np.arange(wo) + q, np.arange(wo)] = 1.0
    return np.kron(np.eye(c, dtype=np.float32), s)


def _row_expand(b, h_in, p):
    # (b*2h, b*h): out row (bi, 2i+p) <- in row (bi, i)
    e = np.zeros((2 * h_in, h_in), np.float32)
    e[2 * np.arange(h_in) + p, np.arange(h_in)] = 1.0
    return np.kron(np.eye(b, dtype=np.float32), e)


def _conv_mix(w, width):
    # Fold 3x3 conv weights into 3 matrices (one per kernel row u) that apply
    # the column shift AND the channel mixing.
    cout, cin, _, _ = w.shape
    mats = []
    for u in (-1, 0, 1):
        g = np.zeros((cin * width, cout * width), np.float32)
        for ci in range(cin):
            for co in range(cout):
                blk = np.zeros((width, width), np.float32)
                for v in (-1, 0, 1):
                    blk += float(w[co, ci, u + 1, v + 1]) * _eye_off(width, -v)
                g[ci * width:(ci + 1) * width, co * width:(co + 1) * width] = blk
        mats.append(g)
    return mats


def _deconv_mix(w, w_in):
    # ConvTranspose2d(k=2, s=2) weights folded into 2 matrices (one per output
    # row phase p) that apply channel mixing AND column upsampling.
    cin, cout, _, _ = w.shape
    mats = []
    for p in (0, 1):
        d = np.zeros((cin * w_in, cout * 2 * w_in), np.float32)
        for ci in range(cin):
            for co in range(cout):
                for j in range(w_in):
                    for q in (0, 1):
                        d[ci * w_in + j, co * 2 * w_in + 2 * j + q] = float(w[ci, co, p, q])
        mats.append(d)
    return mats


def _pack_slab(entries):
    """Pack named 2-D f32 constants into one lane-padded VMEM slab.

    Every entry starts at a sublane-aligned row offset (multiple of 8); the
    slab width is the widest entry rounded up to a multiple of 128 lanes.
    Returns (slab, {name: (row_offset, rows, cols)}).
    """
    lanes = max(a.shape[1] for _, a in entries)
    lanes = ((lanes + 127) // 128) * 128
    offsets, chunks, row = {}, [], 0
    for name, arr in entries:
        arr = np.asarray(arr, np.float32)
        assert arr.ndim == 2 and arr.shape[1] <= lanes, (name, arr.shape)
        h8 = ((arr.shape[0] + 7) // 8) * 8
        pad = np.zeros((h8, lanes), np.float32)
        pad[:arr.shape[0], :arr.shape[1]] = arr
        offsets[name] = (row, arr.shape[0], arr.shape[1])
        chunks.append(pad)
        row += h8
    return np.concatenate(chunks, axis=0), offsets


def prepare(params, batch=2):
    """One-time (init) folding of all weights into a single matmul-ready slab."""
    B = batch
    w1 = np.asarray(params["conv1_w"], np.float32); cb1 = np.asarray(params["conv1_b"], np.float32)
    w2 = np.asarray(params["conv2_w"], np.float32); cb2 = np.asarray(params["conv2_b"], np.float32)
    fw1 = np.asarray(params["fc1_w"], np.float32); fb1 = np.asarray(params["fc1_b"], np.float32)
    fw2 = np.asarray(params["fc2_w"], np.float32); fb2 = np.asarray(params["fc2_b"], np.float32)
    dw1 = np.asarray(params["deconv1_w"], np.float32); dcb1 = np.asarray(params["deconv1_b"], np.float32)
    dw2 = np.asarray(params["deconv2_w"], np.float32); dcb2 = np.asarray(params["deconv2_b"], np.float32)

    ent = []
    add = lambda n, a: ent.append((n, np.asarray(a, np.float32)))

    # ---- conv1 (1->4, 3x3, pad=1): fused mix matrix, bias, row-shift boundary masks
    add("g1cat", np.concatenate(_conv_mix(w1, 28), axis=0))            # (84, 112)
    add("cb1", np.repeat(cb1, 28)[None, :])                            # (1, 112)
    r1 = np.arange(B * 28)
    add("m1t", (r1 % 28 != 0).astype(np.float32)[:, None])             # zero first row of each image
    add("m1b", (r1 % 28 != 27).astype(np.float32)[:, None])            # zero last row of each image
    # ---- maxpool1
    add("rh1_0", _row_select(B, 28, 0)); add("rh1_1", _row_select(B, 28, 1))
    add("cw1_0", _col_select(4, 28, 0)); add("cw1_1", _col_select(4, 28, 1))
    # ---- conv2 (4->4, 3x3, pad=1)
    add("g2cat", np.concatenate(_conv_mix(w2, 14), axis=0))            # (168, 56)
    add("cb2", np.repeat(cb2, 14)[None, :])
    r2 = np.arange(B * 14)
    add("m2t", (r2 % 14 != 0).astype(np.float32)[:, None])
    add("m2b", (r2 % 14 != 13).astype(np.float32)[:, None])
    # ---- maxpool2
    add("rh2_0", _row_select(B, 14, 0)); add("rh2_1", _row_select(B, 14, 1))
    add("cw2_0", _col_select(4, 14, 0)); add("cw2_1", _col_select(4, 14, 1))
    # ---- fc1: per-image-row pack selectors + permuted weights
    w1p = fw1.reshape(50, 4, 7, 7).transpose(2, 1, 3, 0).reshape(7, 28, 50)
    for i in range(7):
        s = np.zeros((B, B * 7), np.float32)
        s[np.arange(B), np.arange(B) * 7 + i] = 1.0
        add(f"sel_{i}", s)
        add(f"w1p_{i}", w1p[i])
    add("fc1b", fb1[None, :])
    # ---- fc2: lane-concatenated weights (one dot) + per-row unpack selectors + bias
    w2p = fw2.reshape(4, 7, 7, 50).transpose(1, 3, 0, 2).reshape(7, 50, 28)
    add("w2cat", np.concatenate(list(w2p), axis=1))                    # (50, 196)
    for i in range(7):
        st = np.zeros((B * 7, B), np.float32)
        st[np.arange(B) * 7 + i, np.arange(B)] = 1.0
        add(f"selt_{i}", st)
    add("b2w", np.tile(fb2.reshape(4, 7, 7).transpose(1, 0, 2).reshape(7, 28), (B, 1)))
    # ---- deconv1 (4->4, k=2, s=2): lane-concatenated mix/col-upsample + row expanders
    add("d1cat", np.concatenate(_deconv_mix(dw1, 7), axis=1))          # (28, 112)
    add("eh1_0", _row_expand(B, 7, 0)); add("eh1_1", _row_expand(B, 7, 1))
    add("db1", np.repeat(dcb1, 14)[None, :])
    # ---- deconv2 (4->1, k=2, s=2)
    add("d2cat", np.concatenate(_deconv_mix(dw2, 14), axis=1))         # (56, 56)
    add("eh2_0", _row_expand(B, 14, 0)); add("eh2_1", _row_expand(B, 14, 1))
    add("db2", np.repeat(dcb2, 28)[None, :])

    slab, offsets = _pack_slab(ent)
    return {"slab": jnp.asarray(slab), "offsets": offsets, "batch": B}


# ---------------------------------------------------------------------------
# The single fused Pallas kernel
# ---------------------------------------------------------------------------
def _tree_sum(xs):
    xs = list(xs)
    while len(xs) > 1:
        nxt = [xs[i] + xs[i + 1] for i in range(0, len(xs) - 1, 2)]
        if len(xs) % 2:
            nxt.append(xs[-1])
        xs = nxt
    return xs[0]


def _make_kernel(offsets):
    f32 = jnp.float32
    HI = lax.Precision.HIGHEST

    def kernel(x_ref, slab_ref, out_ref):
        def cst(name):
            r, h, w = offsets[name]
            return slab_ref[r:r + h, :w]       # static, sublane-aligned slab slice

        def mm(a, b):                          # MXU, default precision
            return jnp.dot(a, b, preferred_element_type=f32)

        def mmh(a, b):                         # MXU, full-f32 (fc path only)
            return jnp.dot(a, b, precision=HI, preferred_element_type=f32)

        def lrelu(y):
            return jnp.maximum(y, 0.01 * y)

        def shifted(z, mt, mb):
            # z[i-1] / z[i+1] per row, zeroed at image boundaries: XLU roll + VPU mask
            # (replaces the old (B*H)^2 row-shift matmuls).
            n = z.shape[0]
            up = pltpu.roll(z, shift=1, axis=0) * mt        # out[i] = z[i-1]
            dn = pltpu.roll(z, shift=n - 1, axis=0) * mb    # out[i] = z[i+1]
            return up, dn

        # ---- conv1 (1->4, 3x3, pad=1) + LeakyReLU : (B*28, 28) -> (B*28, 112)
        x = x_ref[...]
        xm, xp = shifted(x, cst("m1t"), cst("m1b"))
        y = lrelu(mm(jnp.concatenate([xm, x, xp], axis=1), cst("g1cat")) + cst("cb1"))

        # ---- maxpool 2x2 : (B*28, 112) -> (B*14, 56)
        m = jnp.maximum(mm(cst("rh1_0"), y), mm(cst("rh1_1"), y))
        p1 = jnp.maximum(mm(m, cst("cw1_0")), mm(m, cst("cw1_1")))

        # ---- conv2 (4->4, 3x3, pad=1) + LeakyReLU : (B*14, 56) -> (B*14, 56)
        pm, pp = shifted(p1, cst("m2t"), cst("m2b"))
        y2 = lrelu(mm(jnp.concatenate([pm, p1, pp], axis=1), cst("g2cat")) + cst("cb2"))

        # ---- maxpool 2x2 : (B*14, 56) -> (B*7, 28)
        m2 = jnp.maximum(mm(cst("rh2_0"), y2), mm(cst("rh2_1"), y2))
        p2 = jnp.maximum(mm(m2, cst("cw2_0")), mm(m2, cst("cw2_1")))

        # ---- fc1 : 7 independent pack+project partials, tree-summed -> (B, 50)
        enc_parts = [mmh(mmh(cst(f"sel_{i}"), p2), cst(f"w1p_{i}")) for i in range(7)]
        enc = _tree_sum(enc_parts) + cst("fc1b")

        # ---- fc2 : one (B,50)x(50,196) dot, 7 row placements on static lane slices
        big = mmh(enc, cst("w2cat"))
        dec_parts = [mmh(cst(f"selt_{i}"), big[:, i * 28:(i + 1) * 28]) for i in range(7)]
        dec = _tree_sum(dec_parts) + cst("b2w")

        # ---- deconv1 (4->4, k=2, s=2) + LeakyReLU : (B*7, 28) -> (B*14, 56)
        b1 = mm(dec, cst("d1cat"))
        d1 = lrelu(mm(cst("eh1_0"), b1[:, :56]) + mm(cst("eh1_1"), b1[:, 56:112]) + cst("db1"))

        # ---- deconv2 (4->1, k=2, s=2) + exact sigmoid : (B*14, 56) -> (B*28, 28)
        b2 = mm(d1, cst("d2cat"))
        d2 = mm(cst("eh2_0"), b2[:, :28]) + mm(cst("eh2_1"), b2[:, 28:56]) + cst("db2")
        out_ref[...] = pl.reciprocal(1.0 + jnp.exp(-d2), approx=False)

    return kernel


_VMEM = pl.BlockSpec(memory_space=pltpu.MemorySpace.VMEM)


def make_forward(prep):
    """Build the jitted forward: (slab, x(B,1,28,28)) -> (B,1,28,28)."""
    B = prep["batch"]
    kernel = _make_kernel(prep["offsets"])
    call = pl.pallas_call(
        kernel,
        out_shape=jax.ShapeDtypeStruct((B * 28, 28), jnp.float32),
        in_specs=[_VMEM, _VMEM],      # 2 operand DMAs total (input + packed slab)
        out_specs=_VMEM,
        # TODO(synk): for large batches add a grid over batch tiles with
        # dimension_semantics=("parallel",) so v7x's second TensorCore is used.
    )

    @jax.jit
    def forward(slab, x):
        x2d = x.astype(jnp.float32).reshape(B * 28, 28)
        return call(x2d, slab).reshape(B, 1, 28, 28)

    return forward


# ---------------------------------------------------------------------------
# Parameters (deterministic, PyTorch-default-style uniform init)
# ---------------------------------------------------------------------------
def init_params(key):
    def uni(k, shape, fan_in):
        bound = 1.0 / (float(fan_in) ** 0.5)
        return jax.random.uniform(k, shape, jnp.float32, -bound, bound)

    ks = jax.random.split(key, 12)
    return {
        "conv1_w": uni(ks[0], (4, 1, 3, 3), 1 * 9),
        "conv1_b": uni(ks[1], (4,), 1 * 9),
        "conv2_w": uni(ks[2], (4, 4, 3, 3), 4 * 9),
        "conv2_b": uni(ks[3], (4,), 4 * 9),
        "fc1_w": uni(ks[4], (50, 4 * 7 * 7), 4 * 7 * 7),
        "fc1_b": uni(ks[5], (50,), 4 * 7 * 7),
        "fc2_w": uni(ks[6], (4 * 7 * 7, 50), 50),
        "fc2_b": uni(ks[7], (4 * 7 * 7,), 50),
        "deconv1_w": uni(ks[8], (4, 4, 2, 2), 4 * 4),
        "deconv1_b": uni(ks[9], (4,), 4 * 4),
        "deconv2_w": uni(ks[10], (4, 1, 2, 2), 4 * 4),
        "deconv2_b": uni(ks[11], (1,), 4 * 4),
    }


# ---------------------------------------------------------------------------
# Pure-JAX reference (validation only)
# ---------------------------------------------------------------------------
def _reference_forward(params, x):
    hi = lax.Precision.HIGHEST

    def conv3x3(z, w, b):
        B, Cin, H, W = z.shape
        zp = jnp.pad(z, ((0, 0), (0, 0), (1, 1), (1, 1)))
        cols = [zp[:, :, di:di + H, dj:dj + W] for di in range(3) for dj in range(3)]
        patches = jnp.stack(cols, axis=2).reshape(B, Cin * 9, H * W)
        wm = w.reshape(w.shape[0], Cin * 9)
        y = jnp.einsum("of,bfn->bon", wm, patches, precision=hi)
        return y.reshape(B, w.shape[0], H, W) + b[None, :, None, None]

    def lrelu(z):
        return jnp.where(z > 0, z, 0.01 * z)

    def pool(z):
        return jnp.maximum(jnp.maximum(z[:, :, 0::2, 0::2], z[:, :, 0::2, 1::2]),
                           jnp.maximum(z[:, :, 1::2, 0::2], z[:, :, 1::2, 1::2]))

    def deconv2x2(z, w, b):
        B, Cin, H, W = z.shape
        Cout = w.shape[1]
        y = jnp.einsum("bchw,copq->bohpwq", z, w, precision=hi)
        return y.reshape(B, Cout, 2 * H, 2 * W) + b[None, :, None, None]

    h = lrelu(conv3x3(x, params["conv1_w"], params["conv1_b"]))
    h = pool(h)
    h = lrelu(conv3x3(h, params["conv2_w"], params["conv2_b"]))
    h = pool(h)
    B = x.shape[0]
    flat = h.reshape(B, 4 * 7 * 7)
    enc = jnp.dot(flat, params["fc1_w"].T, precision=hi) + params["fc1_b"]
    dec = jnp.dot(enc, params["fc2_w"].T, precision=hi) + params["fc2_b"]
    dec = dec.reshape(B, 4, 7, 7)
    d = lrelu(deconv2x2(dec, params["deconv1_w"], params["deconv1_b"]))
    d = deconv2x2(d, params["deconv2_w"], params["deconv2_b"])
    return jax.nn.sigmoid(d)


if __name__ == "__main__":
    key = jax.random.PRNGKey(0)
    pkey, xkey = jax.random.split(key)
    params = init_params(pkey)
    prep = prepare(params, batch=2)          # one-time weight folding + slab packing
    x = jax.random.uniform(xkey, (2, 1, 28, 28), jnp.float32)

    forward = make_forward(prep)
    out = jax.block_until_ready(forward(prep["slab"], x))

    assert out.shape == (2, 1, 28, 28), out.shape
    assert out.dtype == jnp.float32

    ref = jax.block_until_ready(jax.jit(_reference_forward)(params, x))
    err = float(jnp.max(jnp.abs(out - ref)))
    # Tolerance covers default-precision MXU passes on the conv/pool/deconv
    # path; any layout/indexing bug would produce O(0.1+) errors.
    assert err < 2e-2, f"max abs error vs reference: {err}"
    print("KERNEL_OK")
</pallas_src>

<mosaic_0001>
module attributes {stable_mosaic.version = 11 : i64} {
  func.func @kernel(%arg0: memref<56x28xf32, #tpu.memory_space<vmem>>, %arg1: memref<1632x256xf32, #tpu.memory_space<vmem>>, %arg2: memref<56x28xf32, #tpu.memory_space<vmem>>) attributes {dimension_semantics = [], scalar_prefetch = 0 : i64, scratch_operands = 0 : i64, tpu.core_type = #tpu.core_type<tc>} {
    %c0 = arith.constant 0 : index
    %c0_0 = arith.constant 0 : index
    %0 = vector.load %arg0[%c0, %c0_0] : memref<56x28xf32, #tpu.memory_space<vmem>>, vector<56x28xf32>
    %c96 = arith.constant 96 : index
    %c0_1 = arith.constant 0 : index
    %1 = vector.load %arg1[%c96, %c0_1] : memref<1632x256xf32, #tpu.memory_space<vmem>>, vector<56x1xf32>
    %c152 = arith.constant 152 : index
    %c0_2 = arith.constant 0 : index
    %2 = vector.load %arg1[%c152, %c0_2] : memref<1632x256xf32, #tpu.memory_space<vmem>>, vector<56x1xf32>
    %c1_i32 = arith.constant 1 : i32
    %3 = tpu.dynamic_rotate %0 by %c1_i32 dim 0 : vector<56x28xf32>, i32 -> vector<56x28xf32>
    %4 = vector.broadcast %1 : vector<56x1xf32> to vector<56x28xf32>
    %5 = arith.mulf %3, %4 : vector<56x28xf32>
    %c55_i32 = arith.constant 55 : i32
    %6 = tpu.dynamic_rotate %0 by %c55_i32 dim 0 : vector<56x28xf32>, i32 -> vector<56x28xf32>
    %7 = vector.broadcast %2 : vector<56x1xf32> to vector<56x28xf32>
    %8 = arith.mulf %6, %7 : vector<56x28xf32>
    %9 = tpu.concatenate %5, %0, %8 in 1 : vector<56x28xf32>, vector<56x28xf32>, vector<56x28xf32> -> vector<56x84xf32>
    %c0_3 = arith.constant 0 : index
    %c0_4 = arith.constant 0 : index
    %10 = vector.load %arg1[%c0_3, %c0_4] : memref<1632x256xf32, #tpu.memory_space<vmem>>, vector<84x112xf32>
    %cst = arith.constant dense<0.000000e+00> : vector<56x112xf32>
    %11 = tpu.matmul %9, %10, %cst {dimension_numbers = #tpu.dot_dimension_numbers<[1], [0], [0], [1], [0, 0, 1, 1], [], []>} : vector<56x84xf32>, vector<84x112xf32>, vector<56x112xf32> -> vector<56x112xf32>
    %c88 = arith.constant 88 : index
    %c0_5 = arith.constant 0 : index
    %12 = vector.load %arg1[%c88, %c0_5] : memref<1632x256xf32, #tpu.memory_space<vmem>>, vector<1x112xf32>
    %13 = vector.broadcast %12 : vector<1x112xf32> to vector<56x112xf32>
    %14 = arith.addf %11, %13 : vector<56x112xf32>
    %cst_6 = arith.constant 0.00999999977 : f32
    %15 = vector.broadcast %cst_6 : f32 to vector<56x112xf32>
    %16 = arith.mulf %15, %14 : vector<56x112xf32>
    %17 = arith.maximumf %14, %16 : vector<56x112xf32>
    %c208 = arith.constant 208 : index
    %c0_7 = arith.constant 0 : index
    %18 = vector.load %arg1[%c208, %c0_7] : memref<1632x256xf32, #tpu.memory_space<vmem>>, vector<28x56xf32>
    %cst_8 = arith.constant dense<0.000000e+00> : vector<28x112xf32>
    %19 = tpu.matmul %18, %17, %cst_8 {dimension_numbers = #tpu.dot_dimension_numbers<[1], [0], [0], [1], [0, 0, 1, 1], [], []>} : vector<28x56xf32>, vector<56x112xf32>, vector<28x112xf32> -> vector<28x112xf32>
    %c240 = arith.constant 240 : index
    %c0_9 = arith.constant 0 : index
    %20 = vector.load %arg1[%c240, %c0_9] : memref<1632x256xf32, #tpu.memory_space<vmem>>, vector<28x56xf32>
    %cst_10 = arith.constant dense<0.000000e+00> : vector<28x112xf32>
    %21 = tpu.matmul %20, %17, %cst_10 {dimension_numbers = #tpu.dot_dimension_numbers<[1], [0], [0], [1], [0, 0, 1, 1], [], []>} : vector<28x56xf32>, vector<56x112xf32>, vector<28x112xf32> -> vector<28x112xf32>
    %22 = arith.maximumf %19, %21 : vector<28x112xf32>
    %c272 = arith.constant 272 : index
    %c0_11 = arith.constant 0 : index
    %23 = vector.load %arg1[%c272, %c0_11] : memref<1632x256xf32, #tpu.memory_space<vmem>>, vector<112x56xf32>
    %cst_12 = arith.constant dense<0.000000e+00> : vector<28x56xf32>
    %24 = tpu.matmul %22, %23, %cst_12 {dimension_numbers = #tpu.dot_dimension_numbers<[1], [0], [0], [1], [0, 0, 1, 1], [], []>} : vector<28x112xf32>, vector<112x56xf32>, vector<28x56xf32> -> vector<28x56xf32>
    %c384 = arith.constant 384 : index
    %c0_13 = arith.constant 0 : index
    %25 = vector.load %arg1[%c384, %c0_13] : memref<1632x256xf32, #tpu.memory_space<vmem>>, vector<112x56xf32>
    %cst_14 = arith.constant dense<0.000000e+00> : vector<28x56xf32>
    %26 = tpu.matmul %22, %25, %cst_14 {dimension_numbers = #tpu.dot_dimension_numbers<[1], [0], [0], [1], [0, 0, 1, 1], [], []>} : vector<28x112xf32>, vector<112x56xf32>, vector<28x56xf32> -> vector<28x56xf32>
    %27 = arith.maximumf %24, %26 : vector<28x56xf32>
    %c672 = arith.constant 672 : index
    %c0_15 = arith.constant 0 : index
    %28 = vector.load %arg1[%c672, %c0_15] : memref<1632x256xf32, #tpu.memory_space<vmem>>, vector<28x1xf32>
    %c704 = arith.constant 704 : index
    %c0_16 = arith.constant 0 : index
    %29 = vector.load %arg1[%c704, %c0_16] : memref<1632x256xf32, #tpu.memory_space<vmem>>, vector<28x1xf32>
    %c1_i32_17 = arith.constant 1 : i32
    %30 = tpu.dynamic_rotate %27 by %c1_i32_17 dim 0 : vector<28x56xf32>, i32 -> vector<28x56xf32>
    %31 = vector.broadcast %28 : vector<28x1xf32> to vector<28x56xf32>
    %32 = arith.mulf %30, %31 : vector<28x56xf32>
    %c27_i32 = arith.constant 27 : i32
    %33 = tpu.dynamic_rotate %27 by %c27_i32 dim 0 : vector<28x56xf32>, i32 -> vector<28x56xf32>
    %34 = vector.broadcast %29 : vector<28x1xf32> to vector<28x56xf32>
    %35 = arith.mulf %33, %34 : vector<28x56xf32>
    %36 = tpu.concatenate %32, %27, %35 in 1 : vector<28x56xf32>, vector<28x56xf32>, vector<28x56xf32> -> vector<28x168xf32>
    %c496 = arith.constant 496 : index
    %c0_18 = arith.constant 0 : index
    %37 = vector.load %arg1[%c496, %c0_18] : memref<1632x256xf32, #tpu.memory_space<vmem>>, vector<168x56xf32>
    %cst_19 = arith.constant dense<0.000000e+00> : vector<28x56xf32>
    %38 = tpu.matmul %36, %37, %cst_19 {dimension_numbers = #tpu.dot_dimension_numbers<[1], [0], [0], [1], [0, 0, 1, 1], [], []>} : vector<28x168xf32>, vector<168x56xf32>, vector<28x56xf32> -> vector<28x56xf32>
    %c664 = arith.constant 664 : index
    %c0_20 = arith.constant 0 : index
    %39 = vector.load %arg1[%c664, %c0_20] : memref<1632x256xf32, #tpu.memory_space<vmem>>, vector<1x56xf32>
    %40 = vector.broadcast %39 : vector<1x56xf32> to vector<28x56xf32>
    %41 = arith.addf %38, %40 : vector<28x56xf32>
    %cst_21 = arith.constant 0.00999999977 : f32
    %42 = vector.broadcast %cst_21 : f32 to vector<28x56xf32>
    %43 = arith.mulf %42, %41 : vector<28x56xf32>
    %44 = arith.maximumf %41, %43 : vector<28x56xf32>
    %c736 = arith.constant 736 : index
    %c0_22 = arith.constant 0 : index
    %45 = vector.load %arg1[%c736, %c0_22] : memref<1632x256xf32, #tpu.memory_space<vmem>>, vector<14x28xf32>
    %cst_23 = arith.constant dense<0.000000e+00> : vector<14x56xf32>
    %46 = tpu.matmul %45, %44, %cst_23 {dimension_numbers = #tpu.dot_dimension_numbers<[1], [0], [0], [1], [0, 0, 1, 1], [], []>} : vector<14x28xf32>, vector<28x56xf32>, vector<14x56xf32> -> vector<14x56xf32>
    %c752 = arith.constant 752 : index
    %c0_24 = arith.constant 0 : index
    %47 = vector.load %arg1[%c752, %c0_24] : memref<1632x256xf32, #tpu.memory_space<vmem>>, vector<14x28xf32>
    %cst_25 = arith.constant dense<0.000000e+00> : vector<14x56xf32>
    %48 = tpu.matmul %47, %44, %cst_25 {dimension_numbers = #tpu.dot_dimension_numbers<[1], [0], [0], [1], [0, 0, 1, 1], [], []>} : vector<14x28xf32>, vector<28x56xf32>, vector<14x56xf32> -> vector<14x56xf32>
    %49 = arith.maximumf %46, %48 : vector<14x56xf32>
    %c768 = arith.constant 768 : index
    %c0_26 = arith.constant 0 : index
    %50 = vector.load %arg1[%c768, %c0_26] : memref<1632x256xf32, #tpu.memory_space<vmem>>, vector<56x28xf32>
    %cst_27 = arith.constant dense<0.000000e+00> : vector<14x28xf32>
    %51 = tpu.matmul %49, %50, %cst_27 {dimension_numbers = #tpu.dot_dimension_numbers<[1], [0], [0], [1], [0, 0, 1, 1], [], []>} : vector<14x56xf32>, vector<56x28xf32>, vector<14x28xf32> -> vector<14x28xf32>
    %c824 = arith.constant 824 : index
    %c0_28 = arith.constant 0 : index
    %52 = vector.load %arg1[%c824, %c0_28] : memref<1632x256xf32, #tpu.memory_space<vmem>>, vector<56x28xf32>
    %cst_29 = arith.constant dense<0.000000e+00> : vector<14x28xf32>
    %53 = tpu.matmul %49, %52, %cst_29 {dimension_numbers = #tpu.dot_dimension_numbers<[1], [0], [0], [1], [0, 0, 1, 1], [], []>} : vector<14x56xf32>, vector<56x28xf32>, vector<14x28xf32> -> vector<14x28xf32>
    %54 = arith.maximumf %51, %53 : vector<14x28xf32>
    %c880 = arith.constant 880 : index
    %c0_30 = arith.constant 0 : index
    %55 = vector.load %arg1[%c880, %c0_30] : memref<1632x256xf32, #tpu.memory_space<vmem>>, vector<2x14xf32>
    %cst_31 = arith.constant dense<0.000000e+00> : vector<2x28xf32>
    %56 = tpu.matmul %55, %54, %cst_31 {dimension_numbers = #tpu.dot_dimension_numbers<[1], [0], [0], [1], [0, 0, 1, 1], [], []>, precision = #tpu.contract_precision<fp32>} : vector<2x14xf32>, vector<14x28xf32>, vector<2x28xf32> -> vector<2x28xf32>
    %c888 = arith.constant 888 : index
    %c0_32 = arith.constant 0 : index
    %57 = vector.load %arg1[%c888, %c0_32] : memref<1632x256xf32, #tpu.memory_space<vmem>>, vector<28x50xf32>
    %cst_33 = arith.constant dense<0.000000e+00> : vector<2x50xf32>
    %58 = tpu.matmul %56, %57, %cst_33 {dimension_numbers = #tpu.dot_dimension_numbers<[1], [0], [0], [1], [0, 0, 1, 1], [], []>, precision = #tpu.contract_precision<fp32>} : vector<2x28xf32>, vector<28x50xf32>, vector<2x50xf32> -> vector<2x50xf32>
    %c920 = arith.constant 920 : index
    %c0_34 = arith.constant 0 : index
    %59 = vector.load %arg1[%c920, %c0_34] : memref<1632x256xf32, #tpu.memory_space<vmem>>, vector<2x14xf32>
    %cst_35 = arith.constant dense<0.000000e+00> : vector<2x28xf32>
    %60 = tpu.matmul %59, %54, %cst_35 {dimension_numbers = #tpu.dot_dimension_numbers<[1], [0], [0], [1], [0, 0, 1, 1], [], []>, precision = #tpu.contract_precision<fp32>} : vector<2x14xf32>, vector<14x28xf32>, vector<2x28xf32> -> vector<2x28xf32>
    %c928 = arith.constant 928 : index
    %c0_36 = arith.constant 0 : index
    %61 = vector.load %arg1[%c928, %c0_36] : memref<1632x256xf32, #tpu.memory_space<vmem>>, vector<28x50xf32>
    %cst_37 = arith.constant dense<0.000000e+00> : vector<2x50xf32>
    %62 = tpu.matmul %60, %61, %cst_37 {dimension_numbers = #tpu.dot_dimension_numbers<[1], [0], [0], [1], [0, 0, 1, 1], [], []>, precision = #tpu.contract_precision<fp32>} : vector<2x28xf32>, vector<28x50xf32>, vector<2x50xf32> -> vector<2x50xf32>
    %c960 = arith.constant 960 : index
    %c0_38 = arith.constant 0 : index
    %63 = vector.load %arg1[%c960, %c0_38] : memref<1632x256xf32, #tpu.memory_space<vmem>>, vector<2x14xf32>
    %cst_39 = arith.constant dense<0.000000e+00> : vector<2x28xf32>
    %64 = tpu.matmul %63, %54, %cst_39 {dimension_numbers = #tpu.dot_dimension_numbers<[1], [0], [0], [1], [0, 0, 1, 1], [], []>, precision = #tpu.contract_precision<fp32>} : vector<2x14xf32>, vector<14x28xf32>, vector<2x28xf32> -> vector<2x28xf32>
    %c968 = arith.constant 968 : index
    %c0_40 = arith.constant 0 : index
    %65 = vector.load %arg1[%c968, %c0_40] : memref<1632x256xf32, #tpu.memory_space<vmem>>, vector<28x50xf32>
    %cst_41 = arith.constant dense<0.000000e+00> : vector<2x50xf32>
    %66 = tpu.matmul %64, %65, %cst_41 {dimension_numbers = #tpu.dot_dimension_numbers<[1], [0], [0], [1], [0, 0, 1, 1], [], []>, precision = #tpu.contract_precision<fp32>} : vector<2x28xf32>, vector<28x50xf32>, vector<2x50xf32> -> vector<2x50xf32>
    %c1000 = arith.constant 1000 : index
    %c0_42 = arith.constant 0 : index
    %67 = vector.load %arg1[%c1000, %c0_42] : memref<1632x256xf32, #tpu.memory_space<vmem>>, vector<2x14xf32>
    %cst_43 = arith.constant dense<0.000000e+00> : vector<2x28xf32>
    %68 = tpu.matmul %67, %54, %cst_43 {dimension_numbers = #tpu.dot_dimension_numbers<[1], [0], [0], [1], [0, 0, 1, 1], [], []>, precision = #tpu.contract_precision<fp32>} : vector<2x14xf32>, vector<14x28xf32>, vector<2x28xf32> -> vector<2x28xf32>
    %c1008 = arith.constant 1008 : index
    %c0_44 = arith.constant 0 : index
    %69 = vector.load %arg1[%c1008, %c0_44] : memref<1632x256xf32, #tpu.memory_space<vmem>>, vector<28x50xf32>
    %cst_45 = arith.constant dense<0.000000e+00> : vector<2x50xf32>
    %70 = tpu.matmul %68, %69, %cst_45 {dimension_numbers = #tpu.dot_dimension_numbers<[1], [0], [0], [1], [0, 0, 1, 1], [], []>, precision = #tpu.contract_precision<fp32>} : vector<2x28xf32>, vector<28x50xf32>, vector<2x50xf32> -> vector<2x50xf32>
    %c1040 = arith.constant 1040 : index
    %c0_46 = arith.constant 0 : index
    %71 = vector.load %arg1[%c1040, %c0_46] : memref<1632x256xf32, #tpu.memory_space<vmem>>, vector<2x14xf32>
    %cst_47 = arith.constant dense<0.000000e+00> : vector<2x28xf32>
    %72 = tpu.matmul %71, %54, %cst_47 {dimension_numbers = #tpu.dot_dimension_numbers<[1], [0], [0], [1], [0, 0, 1, 1], [], []>, precision = #tpu.contract_precision<fp32>} : vector<2x14xf32>, vector<14x28xf32>, vector<2x28xf32> -> vector<2x28xf32>
    %c1048 = arith.constant 1048 : index
    %c0_48 = arith.constant 0 : index
    %73 = vector.load %arg1[%c1048, %c0_48] : memref<1632x256xf32, #tpu.memory_space<vmem>>, vector<28x50xf32>
    %cst_49 = arith.constant dense<0.000000e+00> : vector<2x50xf32>
    %74 = tpu.matmul %72, %73, %cst_49 {dimension_numbers = #tpu.dot_dimension_numbers<[1], [0], [0], [1], [0, 0, 1, 1], [], []>, precision = #tpu.contract_precision<fp32>} : vector<2x28xf32>, vector<28x50xf32>, vector<2x50xf32> -> vector<2x50xf32>
    %c1080 = arith.constant 1080 : index
    %c0_50 = arith.constant 0 : index
    %75 = vector.load %arg1[%c1080, %c0_50] : memref<1632x256xf32, #tpu.memory_space<vmem>>, vector<2x14xf32>
    %cst_51 = arith.constant dense<0.000000e+00> : vector<2x28xf32>
    %76 = tpu.matmul %75, %54, %cst_51 {dimension_numbers = #tpu.dot_dimension_numbers<[1], [0], [0], [1], [0, 0, 1, 1], [], []>, precision = #tpu.contract_precision<fp32>} : vector<2x14xf32>, vector<14x28xf32>, vector<2x28xf32> -> vector<2x28xf32>
    %c1088 = arith.constant 1088 : index
    %c0_52 = arith.constant 0 : index
    %77 = vector.load %arg1[%c1088, %c0_52] : memref<1632x256xf32, #tpu.memory_space<vmem>>, vector<28x50xf32>
    %cst_53 = arith.constant dense<0.000000e+00> : vector<2x50xf32>
    %78 = tpu.matmul %76, %77, %cst_53 {dimension_numbers = #tpu.dot_dimension_numbers<[1], [0], [0], [1], [0, 0, 1, 1], [], []>, precision = #tpu.contract_precision<fp32>} : vector<2x28xf32>, vector<28x50xf32>, vector<2x50xf32> -> vector<2x50xf32>
    %c1120 = arith.constant 1120 : index
    %c0_54 = arith.constant 0 : index
    %79 = vector.load %arg1[%c1120, %c0_54] : memref<1632x256xf32, #tpu.memory_space<vmem>>, vector<2x14xf32>
    %cst_55 = arith.constant dense<0.000000e+00> : vector<2x28xf32>
    %80 = tpu.matmul %79, %54, %cst_55 {dimension_numbers = #tpu.dot_dimension_numbers<[1], [0], [0], [1], [0, 0, 1, 1], [], []>, precision = #tpu.contract_precision<fp32>} : vector<2x14xf32>, vector<14x28xf32>, vector<2x28xf32> -> vector<2x28xf32>
    %c1128 = arith.constant 1128 : index
    %c0_56 = arith.constant 0 : index
    %81 = vector.load %arg1[%c1128, %c0_56] : memref<1632x256xf32, #tpu.memory_space<vmem>>, vector<28x50xf32>
    %cst_57 = arith.constant dense<0.000000e+00> : vector<2x50xf32>
    %82 = tpu.matmul %80, %81, %cst_57 {dimension_numbers = #tpu.dot_dimension_numbers<[1], [0], [0], [1], [0, 0, 1, 1], [], []>, precision = #tpu.contract_precision<fp32>} : vector<2x28xf32>, vector<28x50xf32>, vector<2x50xf32> -> vector<2x50xf32>
    %83 = arith.addf %58, %62 : vector<2x50xf32>
    %84 = arith.addf %66, %70 : vector<2x50xf32>
    %85 = arith.addf %74, %78 : vector<2x50xf32>
    %86 = arith.addf %83, %84 : vector<2x50xf32>
    %87 = arith.addf %85, %82 : vector<2x50xf32>
    %88 = arith.addf %86, %87 : vector<2x50xf32>
    %c1160 = arith.constant 1160 : index
    %c0_58 = arith.constant 0 : index
    %89 = vector.load %arg1[%c1160, %c0_58] : memref<1632x256xf32, #tpu.memory_space<vmem>>, vector<1x50xf32>
    %90 = vector.broadcast %89 : vector<1x50xf32> to vector<2x50xf32>
    %91 = arith.addf %88, %90 : vector<2x50xf32>
    %c1168 = arith.constant 1168 : index
    %c0_59 = arith.constant 0 : index
    %92 = vector.load %arg1[%c1168, %c0_59] : memref<1632x256xf32, #tpu.memory_space<vmem>>, vector<50x196xf32>
    %cst_60 = arith.constant dense<0.000000e+00> : vector<2x196xf32>
    %93 = tpu.matmul %91, %92, %cst_60 {dimension_numbers = #tpu.dot_dimension_numbers<[1], [0], [0], [1], [0, 0, 1, 1], [], []>, precision = #tpu.contract_precision<fp32>} : vector<2x50xf32>, vector<50x196xf32>, vector<2x196xf32> -> vector<2x196xf32>
    %c1224 = arith.constant 1224 : index
    %c0_61 = arith.constant 0 : index
    %94 = vector.load %arg1[%c1224, %c0_61] : memref<1632x256xf32, #tpu.memory_space<vmem>>, vector<14x2xf32>
    %95 = vector.extract_strided_slice %93 {offsets = [0, 0], sizes = [2, 28], strides = [1, 1]} : vector<2x196xf32> to vector<2x28xf32>
    %cst_62 = arith.constant dense<0.000000e+00> : vector<14x28xf32>
    %96 = tpu.matmul %94, %95, %cst_62 {dimension_numbers = #tpu.dot_dimension_numbers<[1], [0], [0], [1], [0, 0, 1, 1], [], []>, precision = #tpu.contract_precision<fp32>} : vector<14x2xf32>, vector<2x28xf32>, vector<14x28xf32> -> vector<14x28xf32>
    %c1240 = arith.constant 1240 : index
    %c0_63 = arith.constant 0 : index
    %97 = vector.load %arg1[%c1240, %c0_63] : memref<1632x256xf32, #tpu.memory_space<vmem>>, vector<14x2xf32>
    %98 = vector.extract_strided_slice %93 {offsets = [0, 28], sizes = [2, 28], strides = [1, 1]} : vector<2x196xf32> to vector<2x28xf32>
    %cst_64 = arith.constant dense<0.000000e+00> : vector<14x28xf32>
    %99 = tpu.matmul %97, %98, %cst_64 {dimension_numbers = #tpu.dot_dimension_numbers<[1], [0], [0], [1], [0, 0, 1, 1], [], []>, precision = #tpu.contract_precision<fp32>} : vector<14x2xf32>, vector<2x28xf32>, vector<14x28xf32> -> vector<14x28xf32>
    %c1256 = arith.constant 1256 : index
    %c0_65 = arith.constant 0 : index
    %100 = vector.load %arg1[%c1256, %c0_65] : memref<1632x256xf32, #tpu.memory_space<vmem>>, vector<14x2xf32>
    %101 = vector.extract_strided_slice %93 {offsets = [0, 56], sizes = [2, 28], strides = [1, 1]} : vector<2x196xf32> to vector<2x28xf32>
    %cst_66 = arith.constant dense<0.000000e+00> : vector<14x28xf32>
    %102 = tpu.matmul %100, %101, %cst_66 {dimension_numbers = #tpu.dot_dimension_numbers<[1], [0], [0], [1], [0, 0, 1, 1], [], []>, precision = #tpu.contract_precision<fp32>} : vector<14x2xf32>, vector<2x28xf32>, vector<14x28xf32> -> vector<14x28xf32>
    %c1272 = arith.constant 1272 : index
    %c0_67 = arith.constant 0 : index
    %103 = vector.load %arg1[%c1272, %c0_67] : memref<1632x256xf32, #tpu.memory_space<vmem>>, vector<14x2xf32>
    %104 = vector.extract_strided_slice %93 {offsets = [0, 84], sizes = [2, 28], strides = [1, 1]} : vector<2x196xf32> to vector<2x28xf32>
    %cst_68 = arith.constant dense<0.000000e+00> : vector<14x28xf32>
    %105 = tpu.matmul %103, %104, %cst_68 {dimension_numbers = #tpu.dot_dimension_numbers<[1], [0], [0], [1], [0, 0, 1, 1], [], []>, precision = #tpu.contract_precision<fp32>} : vector<14x2xf32>, vector<2x28xf32>, vector<14x28xf32> -> vector<14x28xf32>
    %c1288 = arith.constant 1288 : index
    %c0_69 = arith.constant 0 : index
    %106 = vector.load %arg1[%c1288, %c0_69] : memref<1632x256xf32, #tpu.memory_space<vmem>>, vector<14x2xf32>
    %107 = vector.extract_strided_slice %93 {offsets = [0, 112], sizes = [2, 28], strides = [1, 1]} : vector<2x196xf32> to vector<2x28xf32>
    %cst_70 = arith.constant dense<0.000000e+00> : vector<14x28xf32>
    %108 = tpu.matmul %106, %107, %cst_70 {dimension_numbers = #tpu.dot_dimension_numbers<[1], [0], [0], [1], [0, 0, 1, 1], [], []>, precision = #tpu.contract_precision<fp32>} : vector<14x2xf32>, vector<2x28xf32>, vector<14x28xf32> -> vector<14x28xf32>
    %c1304 = arith.constant 1304 : index
    %c0_71 = arith.constant 0 : index
    %109 = vector.load %arg1[%c1304, %c0_71] : memref<1632x256xf32, #tpu.memory_space<vmem>>, vector<14x2xf32>
    %110 = vector.extract_strided_slice %93 {offsets = [0, 140], sizes = [2, 28], strides = [1, 1]} : vector<2x196xf32> to vector<2x28xf32>
    %cst_72 = arith.constant dense<0.000000e+00> : vector<14x28xf32>
    %111 = tpu.matmul %109, %110, %cst_72 {dimension_numbers = #tpu.dot_dimension_numbers<[1], [0], [0], [1], [0, 0, 1, 1], [], []>, precision = #tpu.contract_precision<fp32>} : vector<14x2xf32>, vector<2x28xf32>, vector<14x28xf32> -> vector<14x28xf32>
    %c1320 = arith.constant 1320 : index
    %c0_73 = arith.constant 0 : index
    %112 = vector.load %arg1[%c1320, %c0_73] : memref<1632x256xf32, #tpu.memory_space<vmem>>, vector<14x2xf32>
    %113 = vector.extract_strided_slice %93 {offsets = [0, 168], sizes = [2, 28], strides = [1, 1]} : vector<2x196xf32> to vector<2x28xf32>
    %cst_74 = arith.constant dense<0.000000e+00> : vector<14x28xf32>
    %114 = tpu.matmul %112, %113, %cst_74 {dimension_numbers = #tpu.dot_dimension_numbers<[1], [0], [0], [1], [0, 0, 1, 1], [], []>, precision = #tpu.contract_precision<fp32>} : vector<14x2xf32>, vector<2x28xf32>, vector<14x28xf32> -> vector<14x28xf32>
    %115 = arith.addf %96, %99 : vector<14x28xf32>
    %116 = arith.addf %102, %105 : vector<14x28xf32>
    %117 = arith.addf %108, %111 : vector<14x28xf32>
    %118 = arith.addf %115, %116 : vector<14x28xf32>
    %119 = arith.addf %117, %114 : vector<14x28xf32>
    %120 = arith.addf %118, %119 : vector<14x28xf32>
    %c1336 = arith.constant 1336 : index
    %c0_75 = arith.constant 0 : index
    %121 = vector.load %arg1[%c1336, %c0_75] : memref<1632x256xf32, #tpu.memory_space<vmem>>, vector<14x28xf32>
    %122 = arith.addf %120, %121 : vector<14x28xf32>
    %c1352 = arith.constant 1352 : index
    %c0_76 = arith.constant 0 : index
    %123 = vector.load %arg1[%c1352, %c0_76] : memref<1632x256xf32, #tpu.memory_space<vmem>>, vector<28x112xf32>
    %cst_77 = arith.constant dense<0.000000e+00> : vector<14x112xf32>
    %124 = tpu.matmul %122, %123, %cst_77 {dimension_numbers = #tpu.dot_dimension_numbers<[1], [0], [0], [1], [0, 0, 1, 1], [], []>} : vector<14x28xf32>, vector<28x112xf32>, vector<14x112xf32> -> vector<14x112xf32>
    %c1384 = arith.constant 1384 : index
    %c0_78 = arith.constant 0 : index
    %125 = vector.load %arg1[%c1384, %c0_78] : memref<1632x256xf32, #tpu.memory_space<vmem>>, vector<28x14xf32>
    %126 = vector.extract_strided_slice %124 {offsets = [0, 0], sizes = [14, 56], strides = [1, 1]} : vector<14x112xf32> to vector<14x56xf32>
    %cst_79 = arith.constant dense<0.000000e+00> : vector<28x56xf32>
    %127 = tpu.matmul %125, %126, %cst_79 {dimension_numbers = #tpu.dot_dimension_numbers<[1], [0], [0], [1], [0, 0, 1, 1], [], []>} : vector<28x14xf32>, vector<14x56xf32>, vector<28x56xf32> -> vector<28x56xf32>
    %c1416 = arith.constant 1416 : index
    %c0_80 = arith.constant 0 : index
    %128 = vector.load %arg1[%c1416, %c0_80] : memref<1632x256xf32, #tpu.memory_space<vmem>>, vector<28x14xf32>
    %129 = vector.extract_strided_slice %124 {offsets = [0, 56], sizes = [14, 56], strides = [1, 1]} : vector<14x112xf32> to vector<14x56xf32>
    %cst_81 = arith.constant dense<0.000000e+00> : vector<28x56xf32>
    %130 = tpu.matmul %128, %129, %cst_81 {dimension_numbers = #tpu.dot_dimension_numbers<[1], [0], [0], [1], [0, 0, 1, 1], [], []>} : vector<28x14xf32>, vector<14x56xf32>, vector<28x56xf32> -> vector<28x56xf32>
    %131 = arith.addf %127, %130 : vector<28x56xf32>
    %c1448 = arith.constant 1448 : index
    %c0_82 = arith.constant 0 : index
    %132 = vector.load %arg1[%c1448, %c0_82] : memref<1632x256xf32, #tpu.memory_space<vmem>>, vector<1x56xf32>
    %133 = vector.broadcast %132 : vector<1x56xf32> to vector<28x56xf32>
    %134 = arith.addf %131, %133 : vector<28x56xf32>
    %cst_83 = arith.constant 0.00999999977 : f32
    %135 = vector.broadcast %cst_83 : f32 to vector<28x56xf32>
    %136 = arith.mulf %135, %134 : vector<28x56xf32>
    %137 = arith.maximumf %134, %136 : vector<28x56xf32>
    %c1456 = arith.constant 1456 : index
    %c0_84 = arith.constant 0 : index
    %138 = vector.load %arg1[%c1456, %c0_84] : memref<1632x256xf32, #tpu.memory_space<vmem>>, vector<56x56xf32>
    %cst_85 = arith.constant dense<0.000000e+00> : vector<28x56xf32>
    %139 = tpu.matmul %137, %138, %cst_85 {dimension_numbers = #tpu.dot_dimension_numbers<[1], [0], [0], [1], [0, 0, 1, 1], [], []>} : vector<28x56xf32>, vector<56x56xf32>, vector<28x56xf32> -> vector<28x56xf32>
    %c1512 = arith.constant 1512 : index
    %c0_86 = arith.constant 0 : index
    %140 = vector.load %arg1[%c1512, %c0_86] : memref<1632x256xf32, #tpu.memory_space<vmem>>, vector<56x28xf32>
    %141 = vector.extract_strided_slice %139 {offsets = [0, 0], sizes = [28, 28], strides = [1, 1]} : vector<28x56xf32> to vector<28x28xf32>
    %cst_87 = arith.constant dense<0.000000e+00> : vector<56x28xf32>
    %142 = tpu.matmul %140, %141, %cst_87 {dimension_numbers = #tpu.dot_dimension_numbers<[1], [0], [0], [1], [0, 0, 1, 1], [], []>} : vector<56x28xf32>, vector<28x28xf32>, vector<56x28xf32> -> vector<56x28xf32>
    %c1568 = arith.constant 1568 : index
    %c0_88 = arith.constant 0 : index
    %143 = vector.load %arg1[%c1568, %c0_88] : memref<1632x256xf32, #tpu.memory_space<vmem>>, vector<56x28xf32>
    %144 = vector.extract_strided_slice %139 {offsets = [0, 28], sizes = [28, 28], strides = [1, 1]} : vector<28x56xf32> to vector<28x28xf32>
    %cst_89 = arith.constant dense<0.000000e+00> : vector<56x28xf32>
    %145 = tpu.matmul %143, %144, %cst_89 {dimension_numbers = #tpu.dot_dimension_numbers<[1], [0], [0], [1], [0, 0, 1, 1], [], []>} : vector<56x28xf32>, vector<28x28xf32>, vector<56x28xf32> -> vector<56x28xf32>
    %146 = arith.addf %142, %145 : vector<56x28xf32>
    %c1624 = arith.constant 1624 : index
    %c0_90 = arith.constant 0 : index
    %147 = vector.load %arg1[%c1624, %c0_90] : memref<1632x256xf32, #tpu.memory_space<vmem>>, vector<1x28xf32>
    %148 = vector.broadcast %147 : vector<1x28xf32> to vector<56x28xf32>
    %149 = arith.addf %146, %148 : vector<56x28xf32>
    %cst_91 = arith.constant 0.000000e+00 : f32
    %150 = vector.broadcast %cst_91 : f32 to vector<56x28xf32>
    %151 = arith.subf %150, %149 : vector<56x28xf32>
    %152 = math.exp %151 : vector<56x28xf32>
    %cst_92 = arith.constant 1.000000e+00 : f32
    %153 = vector.broadcast %cst_92 : f32 to vector<56x28xf32>
    %154 = arith.addf %153, %152 : vector<56x28xf32>
    %155 = tpu.reciprocal %154 : vector<56x28xf32> -> vector<56x28xf32>
    %c0_93 = arith.constant 0 : index
    %c0_94 = arith.constant 0 : index
    %156 = vector.load %arg2[%c0_93, %c0_94] : memref<56x28xf32, #tpu.memory_space<vmem>>, vector<56x28xf32>
    tpu.vector_store %arg2[%c0_93, %c0_94], %155 {strides = array<i32>} : memref<56x28xf32, #tpu.memory_space<vmem>>, vector<56x28xf32>,
    return
  }
}

</mosaic_0001>

<bundles_post_ra>
// kernel: forward.1
= control target key start
LH: loop header
LB: loop body
LE: loop exit
PB: predicated region body
PF: predicated region fallthrough
CT: control target
= control target key end

     0   :  { %7 = vsyncpa [#allocation3], 0  ;;  %s17180_s0 = inlined_call_operand.hbm [shape: f32[56,28], index: 0, kind: input, shape index: {}]   ;;  %s17181_s1 = inlined_call_operand.hbm [shape: f32[1632,256], index: 1, kind: input, shape index: {}]   ;;  %s17182_s2 = inlined_call_operand.hbm [shape: f32[56,28], index: 2, kind: output, shape index: {}]  }
   0x1   :  { %8 = vsyncpa [#allocation6], 0 }
   0x2   :  { %9 = vsyncpa [#allocation4], 0  ;;  %s15183_s9 = smov [#allocation2]  }
   0x3   :  { %s15_s10 = sshll.u32 %s15183_s9, 4  ;;  %s16_s10 = int_to_ptr.vmem [resolvable:$true] %s15_s10 }
   0x4   :  { %s15125_s11 = scalar_lea.vmem %s16_s10, 896  ;;  %p15130_p1 = scmp.lt.s32.totalorder %s16_s10, %s16_s10 }
   0x5   :  { %p15126_p0 = scmp.ne.s32.totalorder %s16_s10, %s15125_s11  ;;  %p15131_p2 = scmp.lt.s32.totalorder %s15125_s11, %s15125_s11 }
   0x7   :  { %p15132_p3 = por %p15131_p2, %p15130_p1 }
   0x9   :  { %p15133_p4 = pnand %p15132_p3, %p15126_p0 }
   0xb   :  { %15136 = shalt.err (!%p15133_p4)
}
   0xc   :  { %s15184_s12 = smov 128   ;;  %s15185_s13 = smov 8  }
   0xd   :  { %21 = dma.hbm_to_vmem [thread:$0]  %s17180_s0, 896, %s16_s10, [#allocation3], %s15184_s12, %s15184_s12, %s15185_s13  }
   0xe   :  { %s15186_s16 = smov [#allocation5]  }
   0xf   :  { %s27_s17 = sshll.u32 %s15186_s16, 4  ;;  %s28_s17 = int_to_ptr.vmem [resolvable:$true] %s27_s17 }
  0x10   :  { %s15145_s18 = scalar_lea.vmem %s28_s17, 52224  ;;  %p15150_p6 = scmp.lt.s32.totalorder %s28_s17, %s28_s17 }
  0x11   :  { %p15146_p5 = scmp.ne.s32.totalorder %s28_s17, %s15145_s18  ;;  %p15151_p7 = scmp.lt.s32.totalorder %s15145_s18, %s15145_s18 }
  0x13   :  { %p15152_p8 = por %p15151_p7, %p15150_p6 }
  0x15   :  { %p15153_p9 = pnand %p15152_p8, %p15146_p5 }
  0x17   :  { %15156 = shalt.err (!%p15153_p9)
}
  0x18   :  { %s15187_s19 = smov 256   ;;  %s15188_s20 = smov 16  }
  0x19   :  { %33 = dma.hbm_to_vmem [thread:$0]  %s17181_s1, 52224, %s28_s17, [#allocation6], %s15187_s19, %s15187_s19, %s15188_s20  }
  0x1a   :  { %15177 = dma.done.wait [#allocation3], 896  }
  0x1b   :  { %15178 = vsyncadd [#allocation3], 4294966400 }
  0x1c   :  { %15179 = dma.done.wait [#allocation6], 52224  }
  0x1d   :  { %15180 = vsyncadd [#allocation6], 4294915072  ;;  %v15189_v0 = vmov 0   ;;  %v68_v1 = vlaneseq  ;;  %v56_v2 = vld [vmem:[#allocation5 + $0x150] sm:$0xff]  ;;  %v57_v5 = vld [vmem:[#allocation5 + $0x160] sm:$0xff]  ;;  %s15190_s0 = smov 28  }
  0x1e   :  { %15083 = vset.pattern.permute.xlu1 %v15189_v0  ;;  %15082 = vset.pattern.permute.xlu0 %v15189_v0  ;;  %v54_v3 = vld [vmem:[#allocation5 + $0x130] sm:$0xff]  ;;  %v55_v6 = vld [vmem:[#allocation5 + $0x140] sm:$0xff]  ;;  %v15228_v7 = vld [vmem:[#allocation2] sm:$0xff]  ;;  %vm283_vm2 = vcmask 1043456   ;;  %v17189_v35 = vmov 0.0   ;;  %vm15192_vm3 = vmmov 0  }
  0x1f   :  { %v15226_v4 = vshrl.u32 %v68_v1, 7  ;;  %147 = vperm.xlu1 %15083, %v56_v2   ;;  %137 = vperm.xlu0 %15082, %v54_v3   ;;  %v120_v8 = vrot.slane %v15228_v7, 1  ;;  %v41_v9 = vld [vmem:[#allocation2 + $0x8] sm:$0xff]  ;;  %v15231_v10 = vld [vmem:[#allocation2 + $0x10] sm:$0xff]  ;;  %v59_v13 = vld [vmem:[#allocation5 + $0x180] sm:$0xff]  ;;  %v61_v15 = vrot.slane %v15228_v7, 7 }
  0x20   :  { %v121_v11 = vrot.slane %v41_v9, 1  ;;  %v122_v12 = vrot.slane %v15231_v10, 1  ;;  %v58_v14 = vld [vmem:[#allocation5 + $0x170] sm:$0xff]  ;;  %v15248_v18 = vld [vmem:[#allocation2 + $0x30] sm:$0xff]  ;;  %v62_v19 = vrot.slane %v41_v9, 7  ;;  %v47_v22 = vld [vmem:[#allocation5 + $0xc0] sm:$0xff]  ;;  %13782 = vmatprep.subr.mxu0 %v17189_v35  ;;  %13804 = vmatprep.mubr.msk.f32.mxu0 %vm15192_vm3, %v17189_v35 }
  0x21   :  { %vm127_vm0 = vcmp.lt.s32.totalorder %v15226_v4, 7  ;;  %vm70_vm1 = vcmp.lt.s32.totalorder %v15226_v4, 1  ;;  %v67_v20 = vrot.slane %v15248_v18, 7  ;;  %v60_v21 = vld [vmem:[#allocation5 + $0x190] sm:$0xff]  ;;  %v63_v24 = vrot.slane %v15231_v10, 7  ;;  %v15263_v26 = vld [vmem:[#allocation2 + $0x18] sm:$0xff] }
  0x22   :  { %v15240_v16 = vsel %vm127_vm0, %v120_v8, %v121_v11  ;;  %v15246_v17 = vsel %vm127_vm0, %v121_v11, %v122_v12  ;;  %v15261_v25 = vsel %vm70_vm1, %v61_v15, %v62_v19  ;;  %v48_v27 = vld [vmem:[#allocation5 + $0xd0] sm:$0xff]  ;;  %v64_v28 = vrot.slane %v15263_v26, 7  ;;  %v49_v31 = vld [vmem:[#allocation5 + $0xe0] sm:$0xff]  ;;  %s15193_s1 = smov 56   ;;  %v15298_v49 = vld [vmem:[#allocation2 + $0x20] sm:$0xff]  ;;  %s15194_s23 = smov 112  }
  0x23   :  { %152 = vperm.xlu1 %15083, %v57_v5   ;;  %142 = vperm.xlu0 %15082, %v55_v6   ;;  %v15256_v23 = vsel %vm70_vm1, %v67_v20, %v61_v15  ;;  %v15268_v29 = vsel %vm70_vm1, %v62_v19, %v63_v24  ;;  %v50_v32 = vld [vmem:[#allocation5 + $0xf0] sm:$0xff]  ;;  %v51_v33 = vld [vmem:[#allocation5 + $0x100] sm:$0xff]  ;;  %v123_v46 = vrot.slane %v15263_v26, 1  ;;  %v124_v55 = vrot.slane %v15298_v49, 1  ;;  %s15195_s24 = smov 44   ;;  %s15196_s25 = smov 100  }
  0x24   :  { %v15274_v30 = vsel %vm70_vm1, %v63_v24, %v64_v28  ;;  %v259_v34 = vld [vmem:[#allocation5 + $0xa0] sm:$0xf]  ;;  %v258_v36 = vld [vmem:[#allocation5 + $0x90] sm:$0xff]  ;;  %v126_v62 = vrot.slane %v15248_v18, 1  ;;  %vm233_vm4 = vcmask 228352   ;;  %vm241_vm5 = vcmask 457728  }
  0x25   :  { %13783 = vmatpush3.msk.msra.mxu0 %vm283_vm2, %v259_v34  ;;  %v257_v37 = vld [vmem:[#allocation5 + $0x80] sm:$0xff]  ;;  %v256_v38 = vld [vmem:[#allocation5 + $0x70] sm:$0xff]  ;;  %v131_v50 = vsel %vm127_vm0, %v122_v12, %v123_v46  ;;  %v130_v58 = vsel %vm127_vm0, %v123_v46, %v124_v55  ;;  %vm261_vm6 = vcmask 687104   ;;  %vm621_vm7 = vcmask 916480   ;;  %s15197_s26 = smov 88   ;;  %s15198_s27 = smov 116  }
  0x26   :  { %13784 = vmatprep.subr.mxu0 %v17189_v35  ;;  %v255_v39 = vld [vmem:[#allocation5 + $0x60] sm:$0xff]  ;;  %v254_v40 = vld [vmem:[#allocation5 + $0x50] sm:$0xff]  ;;  %vm887_vm8 = vcmask 1040384   ;;  %vm830_vm9 = vcmask 1047556   ;;  %vm855_vm10 = vcmask 1042432   ;;  %vm930_vm11 = vcmask 1041408  }
  0x27   :  { %162 = vperm.xlu1 %15083, %v59_v13   ;;  %157 = vperm.xlu0 %15082, %v58_v14   ;;  %v253_v41 = vld [vmem:[#allocation5 + $0x40] sm:$0xff]  ;;  %v252_v42 = vld [vmem:[#allocation5 + $0x30] sm:$0xff]  ;;  %vm984_vm12 = vcmask 1044480   ;;  %vm1003_vm13 = vcmask 326656   ;;  %vm1449_vm14 = vcmask 113664   ;;  %vm1453_vm15 = vcmask 1045504  }
  0x28   :  { %13785 = vmatpush3.msra.mxu0 %v258_v36  ;;  %v251_v43 = vld [vmem:[#allocation5 + $0x20] sm:$0xff]  ;;  %v250_v44 = vld [vmem:[#allocation5 + $0x10] sm:$0xff]  ;;  %s15199_s28 = smov 72   ;;  %s15200_s29 = smov [#allocation7]  }
  0x29   :  { %13786 = vmatprep.subr.mxu0 %v17189_v35  ;;  %v249_v45 = vld [vmem:[#allocation5] sm:$0xff]  ;;  %v52_v52 = vld [vmem:[#allocation5 + $0x110] sm:$0xff]  ;;  %s13079_s30 = sshll.u32 %s15200_s29, 4  ;;  %s13080_s30 = int_to_ptr.vmem [resolvable:$true] %s13079_s30 }
  0x2a   :  { %13787 = vmatpush3.msra.mxu0 %v257_v37  ;;  %v15307_v57 = vld [vmem:[#allocation2 + $0x28] sm:$0xff]  ;;  %v53_v1 = vld [vmem:[#allocation5 + $0x120] sm:$0xff]  ;;  %s15157_s3 = scalar_lea.vmem %s13080_s30, 896  ;;  %p15162_p11 = scmp.lt.s32.totalorder %s13080_s30, %s13080_s30 }
  0x2b   :  { %167 = vperm.xlu0 %15082, %v60_v21   ;;  %80 = vperm.xlu1 %15083, %v47_v22   ;;  %v125_v59 = vrot.slane %v15307_v57, 1  ;;  %v826_v12 = vld [vmem:[#allocation5 + $0x580] sm:$0xff]  ;;  %v827_v13 = vld [vmem:[#allocation5 + $0x590] sm:$0xff]  ;;  %p15158_p10 = scmp.ne.s32.totalorder %s13080_s30, %s15157_s3  ;;  %p15163_p12 = scmp.lt.s32.totalorder %s15157_s3, %s15157_s3 }
  0x2c   :  { %13788 = vmatprep.subr.mxu0 %v17189_v35  ;;  %v828_v14 = vld [vmem:[#allocation5 + $0x5a0] sm:$0xff]  ;;  %v823_v15 = vld [vmem:[#allocation5 + $0x550] sm:$0xff] }
  0x2d   :  { %13789 = vmatpush3.msra.mxu0 %v256_v38  ;;  %v129_v0 = vsel %vm127_vm0, %v124_v55, %v125_v59  ;;  %v128_v5 = vsel %vm127_vm0, %v125_v59, %v126_v62  ;;  %v401_v4 = vld [vmem:[#allocation5 + $0x1a0] sm:$0xff]  ;;  %p15164_p13 = por %p15163_p12, %p15162_p11 }
  0x2e   :  { %13790 = vmatprep.subr.mxu0 %v17189_v35  ;;  %13839 = vmatprep.mubr.msk.f32.mxu1 %vm241_vm5, %v401_v4  ;;  %v723_v4 = vld [vmem:[#allocation5 + $0x340] sm:$0xff] }
  0x2f   :  { %85 = vperm.xlu0 %15082, %v48_v27   ;;  %184 = vrot.lane.b32.xlu1 %v15228_v7, %s15190_s0  ;;  %v829_v7 = vld [vmem:[#allocation5 + $0x5b0] sm:$0xf]  ;;  %p15165_p0 = pnand %p15164_p13, %p15158_p10 }
  0x30   :  { %13791 = vmatpush3.msra.mxu0 %v255_v39 }
  0x31   :  { %13792 = vmatprep.subr.mxu0 %v17189_v35 }
  0x32   :  { %13793 = vmatpush3.msra.mxu0 %v254_v40 }
  0x33   :  { %90 = vperm.xlu0 %15082, %v49_v31   ;;  %95 = vperm.xlu1 %15083, %v50_v32  }
  0x34   :  { %13794 = vmatprep.subr.mxu0 %v17189_v35 }
  0x35   :  { %13795 = vmatpush3.msra.mxu0 %v253_v41 }
  0x36   :  { %13796 = vmatprep.subr.mxu0 %v17189_v35 }
  0x37   :  { %186 = vrot.lane.b32.xlu0 %v41_v9, %s15190_s0  ;;  %188 = vrot.lane.b32.xlu1 %v15231_v10, %s15190_s0  ;;  %v134_v10 = vsel %vm127_vm0, %v126_v62, %v120_v8  ;;  %v822_v8 = vld [vmem:[#allocation5 + $0x540] sm:$0xff]  ;;  %vm8178_vm0 = vcmask 408576  }
  0x38   :  { %13797 = vmatpush3.msra.mxu0 %v252_v42 }
  0x39   :  { %13798 = vmatprep.subr.mxu0 %v17189_v35 }
  0x3a   :  { %13799 = vmatpush3.msra.mxu0 %v251_v43 }
  0x3b   :  { %100 = vperm.xlu0 %15082, %v51_v33   ;;  %13800 = vmatprep.subr.mxu0 %v17189_v35 }
  0x3c   :  { %13801 = vmatpush3.msra.mxu0 %v250_v44 }
  0x3d   :  { %13802 = vmatprep.subr.mxu0 %v17189_v35 }
  0x3e   :  { %13803 = vmatpush3.msra.mxu0 %v249_v45 }
  0x9a   :  { %v138_v47 = vpop.permute.xlu0 %137  ;;  %v148_v54 = vpop.permute.xlu1 %147 }
  0x9b   :  { %v170_v48 = vmul.f32 %v138_v47, %v15240_v16  ;;  %v172_v56 = vmul.f32 %v148_v54, %v131_v50  ;;  %v824_v16 = vld [vmem:[#allocation5 + $0x560] sm:$0xff] }
  0x9d   :  { %212 = vrot.lane.b32.xlu1 %v170_v48, %s15193_s1 }
  0x9e   :  { %v143_v51 = vpop.permute.xlu0 %142  ;;  %v153_v60 = vpop.permute.xlu1 %152 }
  0x9f   :  { %v171_v53 = vmul.f32 %v143_v51, %v15246_v17  ;;  %v173_v61 = vmul.f32 %v153_v60, %v130_v58  ;;  %v825_v17 = vld [vmem:[#allocation5 + $0x570] sm:$0xf] }
  0xa1   :  { %214 = vrot.lane.b32.xlu0 %v171_v53, %s15193_s1  ;;  %105 = vperm.xlu1 %15083, %v52_v52  }
  0xa2   :  { %v158_v63 = vpop.permute.xlu0 %157  ;;  %v163_v3 = vpop.permute.xlu1 %162 }
  0xa3   :  { %v174_v2 = vmul.f32 %v158_v63, %v129_v0  ;;  %v175_v6 = vmul.f32 %v163_v3, %v128_v5  ;;  %v619_v3 = vld [vmem:[#allocation5 + $0x2e0] sm:$0xff]  ;;  %v618_v5 = vld [vmem:[#allocation5 + $0x2d0] sm:$0xff] }
  0xa5   :  { %190 = vrot.lane.b32.xlu0 %v15263_v26, %s15190_s0  ;;  %216 = vrot.lane.b32.xlu1 %v172_v56, %s15193_s1 }
  0xa6   :  { %v168_v9 = vpop.permute.xlu0 %167  ;;  %v81_v19 = vpop.permute.xlu1 %80 }
  0xa7   :  { %v176_v11 = vmul.f32 %v168_v9, %v134_v10  ;;  %v113_v33 = vmul.f32 %v81_v19, %v15256_v23  ;;  %v260_v19 = vld [vmem:[#allocation5 + $0xb0] ss:$0 sm:$0xff] }
  0xa9   :  { %218 = vrot.lane.b32.xlu0 %v173_v61, %s15193_s1  ;;  %192 = vrot.lane.b32.xlu1 %v15298_v49, %s15190_s0 }
  0xaa   :  { %v86_v21 = vpop.permute.xlu0 %85  ;;  %v185_v22 = vpop.permute.xlu1 %184 }
  0xab   :  { %v234_v34 = vsel %vm233_vm4, %v113_v33, %v185_v22  ;;  %v114_v39 = vmul.f32 %v86_v21, %v15261_v25  ;;  %v65_v25 = vrot.slane %v15298_v49, 7  ;;  %v66_v49 = vrot.slane %v15307_v57, 7 }
  0xad   :  { %110 = vperm.xlu0 %15082, %v53_v1   ;;  %220 = vrot.lane.b32.xlu1 %v174_v2, %s15193_s1  ;;  %v73_v51 = vsel %vm70_vm1, %v64_v28, %v65_v25  ;;  %v72_v26 = vsel %vm70_vm1, %v65_v25, %v66_v49  ;;  %v71_v58 = vsel %vm70_vm1, %v66_v49, %v67_v20  ;;  %v620_v20 = vld [vmem:[#allocation5 + $0x2f0] sm:$0xff]  ;;  %vm8816_vm1 = vcmask 15360  }
  0xae   :  { %v91_v24 = vpop.permute.xlu0 %90  ;;  %v96_v27 = vpop.permute.xlu1 %95  ;;  %13865 = vmatprep.subr.mxu0 %v620_v20  ;;  %v404_v49 = vld [vmem:[#allocation5 + $0x1d0] sm:$0xf] }
  0xaf   :  { %v115_v44 = vmul.f32 %v91_v24, %v15268_v29  ;;  %v116_v48 = vmul.f32 %v96_v27, %v15274_v30 }
  0xb1   :  { %194 = vrot.lane.b32.xlu0 %v15307_v57, %s15190_s0  ;;  %222 = vrot.lane.b32.xlu1 %v175_v6, %s15193_s1  ;;  %v617_v6 = vld [vmem:[#allocation5 + $0x2c0] sm:$0xff] }
  0xb2   :  { %v187_v31 = vpop.permute.xlu0 %186  ;;  %v189_v32 = vpop.permute.xlu1 %188 }
  0xb3   :  { %v235_v40 = vsel %vm233_vm4, %v114_v39, %v187_v31  ;;  %v236_v45 = vsel %vm233_vm4, %v115_v44, %v189_v32 }
  0xb5   :  { %196 = vrot.lane.b32.xlu0 %v15248_v18, %s15190_s0  ;;  %224 = vrot.lane.b32.xlu1 %v176_v11, %s15193_s1 }
  0xb6   :  { %v101_v36 = vpop.permute.xlu0 %100 }
  0xb7   :  { %v117_v54 = vmul.f32 %v101_v36, %v73_v51  ;;  %v402_v51 = vld [vmem:[#allocation5 + $0x1b0] sm:$0xff] }
  0xb9   :  { %873 = vperm.xlu0 %15082, %v826_v12   ;;  %877 = vperm.xlu1 %15083, %v827_v13  }
  0xbd   :  { %881 = vperm.xlu0 %15082, %v828_v14   ;;  %885 = vperm.xlu1 %15083, %v829_v7  }
  0xc1   :  { %841 = vperm.xlu0 %15082, %v822_v8   ;;  %845 = vperm.xlu1 %15083, %v823_v15  }
  0xc5   :  { %849 = vperm.xlu0 %15082, %v824_v16   ;;  %853 = vperm.xlu1 %15083, %v825_v17  }
 0x10f   :  { %v213_v37 = vpop.permute.xlu1 %212 }
 0x110   :  { %v242_v38 = vsel %vm241_vm5, %v234_v34, %v213_v37 }
 0x111   :  { %13805 = vmatmul.mubr.msk.f32.vlgmr.msra.gmra.mxu0 %vm261_vm6, %v242_v38 }
 0x112   :  { %13807 = vmatprep.mubr.msk.f32.mxu0 %vm15192_vm3, %v17189_v35  ;;  %13866 = vmatpush3.msra.mxu0 %v620_v20  ;;  %v610_v20 = vld [vmem:[#allocation5 + $0x250] sm:$0xff] }
 0x113   :  { %v215_v41 = vpop.permute.xlu0 %214  ;;  %13867 = vmatprep.subr.mxu0 %v619_v3 }
 0x114   :  { %v243_v23 = vsel %vm241_vm5, %v235_v40, %v215_v41  ;;  %13868 = vmatpush3.msra.mxu0 %v619_v3  ;;  %v722_v3 = vld [vmem:[#allocation5 + $0x330] sm:$0xff] }
 0x115   :  { %13808 = vmatmul.mubr.msk.f32.gmra.mxu0 %vm261_vm6, %v243_v23  ;;  %13869 = vmatprep.subr.mxu0 %v618_v5 }
 0x116   :  { %13810 = vmatprep.mubr.msk.f32.mxu0 %vm15192_vm3, %v17189_v35  ;;  %13870 = vmatpush3.msra.mxu0 %v618_v5  ;;  %v609_v5 = vld [vmem:[#allocation5 + $0x240] sm:$0xff] }
 0x117   :  { %v191_v42 = vpop.permute.xlu0 %190  ;;  %13871 = vmatprep.subr.mxu0 %v617_v6 }
 0x118   :  { %v237_v29 = vsel %vm233_vm4, %v116_v48, %v191_v42  ;;  %13872 = vmatpush3.msra.mxu0 %v617_v6  ;;  %v721_v6 = vld [vmem:[#allocation5 + $0x320] sm:$0xff] }
 0x11b   :  { %v219_v50 = vpop.permute.xlu0 %218 }
 0x11c   :  { %v106_v43 = vpop.permute.xlu1 %105  ;;  %v245_v53 = vsel %vm241_vm5, %v237_v29, %v219_v50  ;;  %v403_v29 = vld [vmem:[#allocation5 + $0x1c0] sm:$0xff] }
 0x11d   :  { %v118_v57 = vmul.f32 %v106_v43, %v72_v26  ;;  %v504_v26 = vld [vmem:[#allocation5 + $0x200] sm:$0xff] }
 0x120   :  { %v217_v46 = vpop.permute.xlu1 %216 }
 0x121   :  { %v244_v47 = vsel %vm241_vm5, %v236_v45, %v217_v46 }
 0x122   :  { %13811 = vmatmul.mubr.msk.f32.gmra.mxu0 %vm261_vm6, %v244_v47 }
 0x123   :  { %13813 = vmatprep.mubr.msk.f32.mxu0 %vm15192_vm3, %v17189_v35 }
 0x124   :  { %v193_v52 = vpop.permute.xlu1 %192 }
 0x125   :  { %v238_v28 = vsel %vm233_vm4, %v117_v54, %v193_v52  ;;  %v502_v52 = vld [vmem:[#allocation5 + $0x1e0] sm:$0xff]  ;;  %v732_v54 = vld [vmem:[#allocation5 + $0x3d0] sm:$0xff] }
 0x126   :  { %13814 = vmatmul.mubr.msk.f32.gmra.mxu0 %vm261_vm6, %v245_v53  ;;  %v503_v53 = vld [vmem:[#allocation5 + $0x1f0] sm:$0xff] }
 0x127   :  { %13816 = vmatprep.mubr.msk.f32.mxu0 %vm15192_vm3, %v17189_v35 }
 0x128   :  { %v111_v30 = vpop.permute.xlu0 %110  ;;  %v221_v55 = vpop.permute.xlu1 %220 }
 0x129   :  { %v246_v56 = vsel %vm241_vm5, %v238_v28, %v221_v55  ;;  %v119_v63 = vmul.f32 %v111_v30, %v71_v58  ;;  %v731_v28 = vld [vmem:[#allocation5 + $0x3c0] sm:$0xff]  ;;  %v505_v30 = vld [vmem:[#allocation5 + $0x210] sm:$0xf] }
 0x12a   :  { %13817 = vmatmul.mubr.msk.f32.gmra.mxu0 %vm261_vm6, %v246_v56  ;;  %v730_v55 = vld [vmem:[#allocation5 + $0x3b0] sm:$0xff]  ;;  %v729_v56 = vld [vmem:[#allocation5 + $0x3a0] sm:$0xff] }
 0x12b   :  { %13819 = vmatprep.mubr.msk.f32.mxu0 %vm15192_vm3, %v17189_v35  ;;  %v728_v58 = vld [vmem:[#allocation5 + $0x390] sm:$0xff] }
 0x12c   :  { %v195_v59 = vpop.permute.xlu0 %194  ;;  %v223_v60 = vpop.permute.xlu1 %222 }
 0x12d   :  { %v239_v61 = vsel %vm233_vm4, %v118_v57, %v195_v59  ;;  %v616_v57 = vld [vmem:[#allocation5 + $0x2b0] sm:$0xff]  ;;  %v615_v59 = vld [vmem:[#allocation5 + $0x2a0] sm:$0xff] }
 0x12e   :  { %v247_v62 = vsel %vm241_vm5, %v239_v61, %v223_v60  ;;  %13873 = vmatprep.subr.mxu0 %v616_v57  ;;  %v727_v60 = vld [vmem:[#allocation5 + $0x380] sm:$0xff]  ;;  %v614_v61 = vld [vmem:[#allocation5 + $0x290] sm:$0xff] }
 0x12f   :  { %13820 = vmatmul.mubr.msk.f32.gmra.mxu0 %vm261_vm6, %v247_v62  ;;  %v726_v62 = vld [vmem:[#allocation5 + $0x370] sm:$0xff] }
 0x130   :  { %v197_v0 = vpop.permute.xlu0 %196  ;;  %v225_v1 = vpop.permute.xlu1 %224  ;;  %13822 = vmatprep.mubr.msk.f32.mxu0 %vm15192_vm3, %v17189_v35  ;;  %13874 = vmatpush3.msra.mxu0 %v616_v57  ;;  %v975_v57 = vld [vmem:[#allocation5 + $0x4f0] sm:$0xff] }
 0x131   :  { %v240_v2 = vsel %vm233_vm4, %v119_v63, %v197_v0  ;;  %13875 = vmatprep.subr.mxu0 %v615_v59  ;;  %v613_v63 = vld [vmem:[#allocation5 + $0x280] sm:$0xff] }
 0x132   :  { %v248_v18 = vsel %vm241_vm5, %v240_v2, %v225_v1  ;;  %13876 = vmatpush3.msra.mxu0 %v615_v59  ;;  %v725_v0 = vld [vmem:[#allocation5 + $0x360] sm:$0xff]  ;;  %v612_v1 = vld [vmem:[#allocation5 + $0x270] sm:$0xff] }
 0x133   :  { %13823 = vmatmul.mubr.msk.f32.gmra.mxu0 %vm261_vm6, %v248_v18  ;;  %13877 = vmatprep.subr.mxu0 %v614_v61  ;;  %v724_v2 = vld [vmem:[#allocation5 + $0x350] sm:$0xff]  ;;  %v611_v18 = vld [vmem:[#allocation5 + $0x260] sm:$0xff]  ;;  %vm11822_vm6 = vcmask 130048  }
 0x134   :  { %13878 = vmatpush3.msra.mxu0 %v614_v61 }
 0x135   :  { %13879 = vmatprep.subr.mxu0 %v613_v63 }
 0x136   :  { %13880 = vmatpush3.msra.mxu0 %v613_v63 }
 0x137   :  { %13881 = vmatprep.subr.mxu0 %v612_v1 }
 0x138   :  { %13882 = vmatpush3.msra.mxu0 %v612_v1 }
 0x139   :  { %13883 = vmatprep.subr.mxu0 %v611_v18 }
 0x13a   :  { %13884 = vmatpush3.msra.mxu0 %v611_v18 }
 0x13b   :  { %13885 = vmatprep.subr.mxu0 %v610_v20 }
 0x13c   :  { %13886 = vmatpush3.msra.mxu0 %v610_v20 }
 0x13d   :  { %13887 = vmatprep.subr.mxu0 %v609_v5 }
 0x13e   :  { %13888 = vmatpush3.msra.mxu0 %v609_v5 }
 0x1d1   :  { %v353_v9 = vpop.f32.mrf.mxu0 }
 0x1d2   :  { %v354_v42 = vadd.f32 %v353_v9, %v260_v19  ;;  %v608_v9 = vld [vmem:[#allocation5 + $0x230] sm:$0xff] }
 0x1d3   :  { %v13806_v10 = vpop.f32.mrf.mxu0  ;;  %13889 = vmatprep.subr.mxu0 %v608_v9 }
 0x1d4   :  { %v387_v46 = vmul.f32 0.01, %v354_v42  ;;  %v720_v10 = vld [vmem:[#allocation5 + $0x310] sm:$0xff]  ;;  %13890 = vmatpush3.msra.mxu0 %v608_v9 }
 0x1d5   :  { %v358_v11 = vpop.f32.mrf.mxu0 }
 0x1d6   :  { %v359_v40 = vadd.f32 %v358_v11, %v260_v19  ;;  %v394_v50 = vmax.f32 %v354_v42, %v387_v46  ;;  %v607_v11 = vld [vmem:[#allocation5 + $0x220] sm:$0xff]  ;;  %v874_v46 = vpop.permute.xlu0 %873 }
 0x1d7   :  { %v13809_v12 = vpop.f32.mrf.mxu0  ;;  %13891 = vmatprep.subr.mxu0 %v607_v11  ;;  %v962_v42 = vld [vmem:[#allocation5 + $0x420] sm:$0xff] }
 0x1d8   :  { %v388_v25 = vmul.f32 0.01, %v359_v40  ;;  %v719_v12 = vld [vmem:[#allocation5 + $0x300] sm:$0xff]  ;;  %13892 = vmatpush3.msra.mxu0 %v607_v11 }
 0x1d9   :  { %1012 = vmatprep.subr.mxu0 %v17189_v35 }
 0x1da   :  { %v395_v48 = vmax.f32 %v359_v40, %v388_v25  ;;  %v965_v40 = vld [vmem:[#allocation5 + $0x450] sm:$0xff] }
 0x1db   :  { %v959_v25 = vld [vmem:[#allocation5 + $0x3f0] sm:$0xff] }
 0x1e2   :  { %v363_v13 = vpop.f32.mrf.mxu0 }
 0x1e3   :  { %v364_v37 = vadd.f32 %v363_v13, %v260_v19 }
 0x1e4   :  { %v13812_v14 = vpop.f32.mrf.mxu0 }
 0x1e5   :  { %v389_v43 = vmul.f32 0.01, %v364_v37 }
 0x1e6   :  { %v368_v7 = vpop.f32.mrf.mxu0 }
 0x1e7   :  { %v369_v33 = vadd.f32 %v368_v7, %v260_v19  ;;  %v396_v47 = vmax.f32 %v364_v37, %v389_v43  ;;  %v968_v37 = vld [vmem:[#allocation5 + $0x480] sm:$0xff]  ;;  %v961_v43 = vld [vmem:[#allocation5 + $0x410] sm:$0xff] }
 0x1e8   :  { %v13815_v8 = vpop.f32.mrf.mxu0 }
 0x1e9   :  { %v390_v41 = vmul.f32 0.01, %v369_v33 }
 0x1ea   :  { %v373_v15 = vpop.f32.mrf.mxu0 }
 0x1eb   :  { %v374_v27 = vadd.f32 %v373_v15, %v260_v19  ;;  %v397_v45 = vmax.f32 %v369_v33, %v390_v41  ;;  %v971_v33 = vld [vmem:[#allocation5 + $0x4b0] sm:$0xff]  ;;  %v964_v41 = vld [vmem:[#allocation5 + $0x440] sm:$0xff] }
 0x1ec   :  { %v13818_v16 = vpop.f32.mrf.mxu0 }
 0x1ed   :  { %v391_v38 = vmul.f32 0.01, %v374_v27 }
 0x1ef   :  { %v378_v17 = vpop.f32.mrf.mxu0  ;;  %v398_v44 = vmax.f32 %v374_v27, %v391_v38  ;;  %v967_v38 = vld [vmem:[#allocation5 + $0x470] sm:$0xff] }
 0x1f0   :  { %v379_v22 = vadd.f32 %v378_v17, %v260_v19 }
 0x1f1   :  { %v13821_v21 = vpop.f32.mrf.mxu0 }
 0x1f2   :  { %v392_v34 = vmul.f32 0.01, %v379_v22 }
 0x1f3   :  { %v383_v24 = vpop.f32.mrf.mxu0 }
 0x1f4   :  { %v384_v31 = vadd.f32 %v383_v24, %v260_v19  ;;  %v399_v23 = vmax.f32 %v379_v22, %v392_v34  ;;  %v970_v34 = vld [vmem:[#allocation5 + $0x4a0] sm:$0xff] }
 0x1f5   :  { %v13824_v32 = vpop.f32.mrf.mxu0 }
 0x1f6   :  { %v393_v36 = vmul.f32 0.01, %v384_v31  ;;  %v972_v32 = vld [vmem:[#allocation5 + $0x4c0] sm:$0xff] }
 0x1f8   :  { %v400_v39 = vmax.f32 %v384_v31, %v393_v36  ;;  %v973_v31 = vld [vmem:[#allocation5 + $0x4d0] sm:$0xff] }
 0x1f9   :  { %v969_v36 = vld [vmem:[#allocation5 + $0x490] sm:$0xff] }
 0x1fa   :  { %13825 = vmatprep.subr.mxu1 %v400_v39 }
 0x1fb   :  { %13826 = vmatpush3.msra.mxu1 %v400_v39 }
 0x1fc   :  { %13827 = vmatprep.subr.mxu1 %v399_v23 }
 0x1fd   :  { %13828 = vmatpush3.msra.mxu1 %v399_v23 }
 0x1fe   :  { %13829 = vmatprep.subr.mxu1 %v398_v44 }
 0x1ff   :  { %13830 = vmatpush3.msra.mxu1 %v398_v44 }
 0x200   :  { %13831 = vmatprep.subr.mxu1 %v397_v45 }
 0x201   :  { %13832 = vmatpush3.msra.mxu1 %v397_v45 }
 0x202   :  { %13833 = vmatprep.subr.mxu1 %v396_v47 }
 0x203   :  { %13834 = vmatpush3.msra.mxu1 %v396_v47 }
 0x204   :  { %13835 = vmatprep.subr.mxu1 %v395_v48 }
 0x205   :  { %13836 = vmatpush3.msra.mxu1 %v395_v48 }
 0x206   :  { %13837 = vmatprep.subr.mxu1 %v394_v50 }
 0x207   :  { %13838 = vmatpush3.msra.mxu1 %v394_v50 }
 0x208   :  { %13840 = vmatmul.mubr.msk.f32.vlgmr.msra.gmra.mxu1 %vm241_vm5, %v402_v51  ;;  %13845 = vmatprep.subr.mxu1 %v400_v39 }
 0x209   :  { %13846 = vmatpush3.msra.mxu1 %v400_v39  ;;  %13842 = vmatprep.mubr.msk.f32.mxu1 %vm241_vm5, %v403_v29  ;;  %v966_v39 = vld [vmem:[#allocation5 + $0x460] sm:$0xff] }
 0x20a   :  { %13847 = vmatprep.subr.mxu1 %v399_v23 }
 0x20b   :  { %13848 = vmatpush3.msra.mxu1 %v399_v23  ;;  %v963_v23 = vld [vmem:[#allocation5 + $0x430] sm:$0xff] }
 0x20c   :  { %13849 = vmatprep.subr.mxu1 %v398_v44  ;;  %13843 = vmatmul.mubr.msk.f32.gmra.mxu1 %vm241_vm5, %v404_v49  ;;  %v976_v49 = vld [vmem:[#allocation5 + $0x500] sm:$0xff] }
 0x20d   :  { %13850 = vmatpush3.msra.mxu1 %v398_v44  ;;  %13859 = vmatprep.mubr.msk.f32.mxu1 %vm241_vm5, %v502_v52  ;;  %v960_v44 = vld [vmem:[#allocation5 + $0x400] sm:$0xff]  ;;  %v882_v52 = vpop.permute.xlu0 %881 }
 0x20e   :  { %13851 = vmatprep.subr.mxu1 %v397_v45  ;;  %v891_v61 = vrot.slane %v882_v52, 7 }
 0x20f   :  { %13852 = vmatpush3.msra.mxu1 %v397_v45  ;;  %v958_v45 = vld [vmem:[#allocation5 + $0x3e0] sm:$0xff] }
 0x210   :  { %13853 = vmatprep.subr.mxu1 %v396_v47 }
 0x211   :  { %13854 = vmatpush3.msra.mxu1 %v396_v47  ;;  %v978_v47 = vld [vmem:[#allocation5 + $0x520] sm:$0xff] }
 0x212   :  { %13855 = vmatprep.subr.mxu1 %v395_v48 }
 0x213   :  { %13856 = vmatpush3.msra.mxu1 %v395_v48  ;;  %v878_v48 = vpop.permute.xlu1 %877 }
 0x214   :  { %13857 = vmatprep.subr.mxu1 %v394_v50 }
 0x215   :  { %13858 = vmatpush3.msra.mxu1 %v394_v50  ;;  %v977_v50 = vld [vmem:[#allocation5 + $0x510] sm:$0xff] }
 0x216   :  { %13860 = vmatmul.mubr.msk.f32.vlgmr.msra.gmra.mxu1 %vm241_vm5, %v503_v53  ;;  %13899 = vmatprep.subr.mxu1 %v732_v54  ;;  %v888_v53 = vrot.slane %v874_v46, 7 }
 0x217   :  { %13862 = vmatprep.mubr.msk.f32.mxu1 %vm241_vm5, %v504_v26  ;;  %13900 = vmatpush3.msra.mxu1 %v732_v54  ;;  %v889_v54 = vrot.slane %v878_v48, 7 }
 0x218   :  { %13901 = vmatprep.subr.mxu1 %v731_v28 }
 0x219   :  { %13902 = vmatpush3.msra.mxu1 %v731_v28  ;;  %v890_v1 = vsel %vm887_vm8, %v888_v53, %v889_v54 }
 0x21a   :  { %13863 = vmatmul.mubr.msk.f32.gmra.mxu1 %vm241_vm5, %v505_v30  ;;  %13903 = vmatprep.subr.mxu1 %v730_v55 }
 0x21b   :  { %13904 = vmatpush3.msra.mxu1 %v730_v55  ;;  %v886_v55 = vpop.permute.xlu1 %885 }
 0x21c   :  { %13905 = vmatprep.subr.mxu1 %v729_v56 }
 0x21d   :  { %13906 = vmatpush3.msra.mxu1 %v729_v56 }
 0x21e   :  { %13907 = vmatprep.subr.mxu1 %v728_v58 }
 0x21f   :  { %13908 = vmatpush3.msra.mxu1 %v728_v58 }
 0x220   :  { %13909 = vmatprep.subr.mxu1 %v727_v60 }
 0x221   :  { %13910 = vmatpush3.msra.mxu1 %v727_v60  ;;  %v974_v60 = vld [vmem:[#allocation5 + $0x4e0] sm:$0xff] }
 0x222   :  { %13911 = vmatprep.subr.mxu1 %v726_v62 }
 0x223   :  { %13912 = vmatpush3.msra.mxu1 %v726_v62 }
 0x224   :  { %13913 = vmatprep.subr.mxu1 %v725_v0 }
 0x225   :  { %13914 = vmatpush3.msra.mxu1 %v725_v0 }
 0x226   :  { %13915 = vmatprep.subr.mxu1 %v724_v2 }
 0x227   :  { %13916 = vmatpush3.msra.mxu1 %v724_v2 }
 0x228   :  { %13917 = vmatprep.subr.mxu1 %v723_v4 }
 0x229   :  { %13918 = vmatpush3.msra.mxu1 %v723_v4 }
 0x22a   :  { %13919 = vmatprep.subr.mxu1 %v722_v3 }
 0x22b   :  { %13920 = vmatpush3.msra.mxu1 %v722_v3  ;;  %v893_v3 = vrot.slane %v886_v55, 7 }
 0x22c   :  { %13921 = vmatprep.subr.mxu1 %v721_v6 }
 0x22d   :  { %13922 = vmatpush3.msra.mxu1 %v721_v6 }
 0x22e   :  { %13923 = vmatprep.subr.mxu1 %v720_v10 }
 0x22f   :  { %13924 = vmatpush3.msra.mxu1 %v720_v10 }
 0x230   :  { %13925 = vmatprep.subr.mxu1 %v719_v12 }
 0x231   :  { %13926 = vmatpush3.msra.mxu1 %v719_v12 }
 0x2c8   :  { %v13841_v13 = vpop.f32.mrf.mxu1 }
 0x2ca   :  { %v483_v14 = vpop.f32.mrf.mxu1 }
 0x2cc   :  { %v13844_v7 = vpop.f32.mrf.mxu1 }
 0x2ce   :  { %v493_v8 = vpop.f32.mrf.mxu1 }
 0x2d6   :  { %v13861_v15 = vpop.f32.mrf.mxu1 }
 0x2d7   :  { %v604_v19 = vmax.f32 %v13841_v13, %v13861_v15 }
 0x2d8   :  { %v584_v16 = vpop.f32.mrf.mxu1 }
 0x2d9   :  { %v603_v17 = vmax.f32 %v483_v14, %v584_v16  ;;  %v892_v14 = vsel %vm887_vm8, %v889_v54, %v891_v61 }
 0x2da   :  { %v13864_v21 = vpop.f32.mrf.mxu1 }
 0x2db   :  { %13893 = vmatprep.mubr.msk.f32.mxu0 %vm621_vm7, %v603_v17  ;;  %13927 = vmatprep.mubr.msk.f32.mxu1 %vm621_vm7, %v603_v17  ;;  %v606_v27 = vmax.f32 %v13844_v7, %v13864_v21 }
 0x2dc   :  { %v594_v22 = vpop.f32.mrf.mxu1  ;;  %13894 = vmatmul.mubr.msk.f32.vlgmr.msra.gmra.mxu0 %vm621_vm7, %v604_v19  ;;  %13928 = vmatmul.mubr.msk.f32.vlgmr.msra.gmra.mxu1 %vm621_vm7, %v604_v19 }
 0x2dd   :  { %v605_v24 = vmax.f32 %v493_v8, %v594_v22  ;;  %1013 = vmatpush1.msra.mxu0 %v973_v31 }
 0x2de   :  { %1014 = vmatprep.subr.mxu0 %v17189_v35 }
 0x2df   :  { %13896 = vmatprep.mubr.msk.f32.mxu0 %vm621_vm7, %v605_v24  ;;  %13930 = vmatprep.mubr.msk.f32.mxu1 %vm621_vm7, %v605_v24 }
 0x2e0   :  { %13897 = vmatmul.mubr.msk.f32.gmra.mxu0 %vm621_vm7, %v606_v27  ;;  %13931 = vmatmul.mubr.msk.f32.gmra.mxu1 %vm621_vm7, %v606_v27  ;;  %v894_v27 = vsel %vm887_vm8, %v891_v61, %v893_v3 }
 0x2e1   :  { %1015 = vmatpush1.msra.mxu0 %v972_v32 }
 0x2e2   :  { %1016 = vmatprep.subr.mxu0 %v17189_v35 }
 0x2e3   :  { %1017 = vmatpush1.msra.mxu0 %v971_v33 }
 0x2e4   :  { %1018 = vmatprep.subr.mxu0 %v17189_v35 }
 0x2e5   :  { %1019 = vmatpush1.msra.mxu0 %v970_v34 }
 0x2e6   :  { %1020 = vmatprep.subr.mxu0 %v17189_v35 }
 0x2e7   :  { %1021 = vmatpush1.msra.mxu0 %v969_v36 }
 0x2e8   :  { %1022 = vmatprep.subr.mxu0 %v17189_v35 }
 0x2e9   :  { %1023 = vmatpush1.msra.mxu0 %v968_v37 }
 0x2ea   :  { %1024 = vmatprep.subr.mxu0 %v17189_v35 }
 0x2eb   :  { %1025 = vmatpush1.msra.mxu0 %v967_v38 }
 0x2ec   :  { %1026 = vmatprep.subr.mxu0 %v17189_v35 }
 0x2ed   :  { %1027 = vmatpush1.msra.mxu0 %v966_v39 }
 0x2ee   :  { %1028 = vmatprep.subr.mxu0 %v17189_v35 }
 0x2ef   :  { %1029 = vmatpush1.msra.mxu0 %v965_v40  ;;  %v846_v40 = vpop.permute.xlu1 %845 }
 0x2f0   :  { %1030 = vmatprep.subr.mxu0 %v17189_v35 }
 0x2f1   :  { %1031 = vmatpush1.msra.mxu0 %v964_v41  ;;  %v842_v41 = vpop.permute.xlu0 %841 }
 0x2f2   :  { %1032 = vmatprep.subr.mxu0 %v17189_v35 }
 0x2f3   :  { %1033 = vmatpush1.msra.mxu0 %v963_v23  ;;  %v854_v23 = vpop.permute.xlu1 %853 }
 0x2f4   :  { %1034 = vmatprep.subr.mxu0 %v17189_v35 }
 0x2f5   :  { %1035 = vmatpush1.msra.mxu0 %v962_v42  ;;  %v856_v42 = vrot.slane %v842_v41, 5 }
 0x2f6   :  { %1036 = vmatprep.subr.mxu0 %v17189_v35 }
 0x2f7   :  { %1037 = vmatpush1.msra.mxu0 %v961_v43  ;;  %v857_v43 = vrot.slane %v846_v40, 5 }
 0x2f8   :  { %1038 = vmatprep.subr.mxu0 %v17189_v35 }
 0x2f9   :  { %1039 = vmatpush1.msra.mxu0 %v960_v44  ;;  %v850_v44 = vpop.permute.xlu0 %849 }
 0x2fa   :  { %1040 = vmatprep.subr.mxu0 %v17189_v35  ;;  %v859_v46 = vrot.slane %v850_v44, 5  ;;  %v1106_v44 = vld [vmem:[#allocation5 + $0x5d0] sm:$0x3f] }
 0x2fb   :  { %1041 = vmatpush1.msra.mxu0 %v959_v25 }
 0x2fc   :  { %1042 = vmatprep.subr.mxu0 %v17189_v35 }
 0x2fd   :  { %1043 = vmatpush1.msra.mxu0 %v958_v45  ;;  %v858_v45 = vsel %vm855_vm10, %v856_v42, %v857_v43 }
 0x2fe   :  { %1066 = vmatprep.subr.mxu0 %v17189_v35 }
 0x2ff   :  { %1067 = vmatpush2.msra.mxu0 %v978_v47 }
 0x300   :  { %1068 = vmatprep.subr.mxu0 %v17189_v35 }
 0x301   :  { %1069 = vmatpush2.msra.mxu0 %v977_v50 }
 0x302   :  { %1070 = vmatprep.subr.mxu0 %v17189_v35 }
 0x303   :  { %1071 = vmatpush2.msra.mxu0 %v976_v49  ;;  %v861_v49 = vrot.slane %v854_v23, 5 }
 0x304   :  { %1072 = vmatprep.subr.mxu0 %v17189_v35 }
 0x305   :  { %1073 = vmatpush2.msra.mxu0 %v975_v57 }
 0x306   :  { %1074 = vmatprep.subr.mxu0 %v17189_v35 }
 0x307   :  { %1075 = vmatpush2.msra.mxu0 %v974_v60 }
 0x308   :  { %14010 = vmatprep.subr.mxu0 %v17189_v35 }
 0x39c   :  { %v13895_v51 = vpop.f32.mrf.mxu0  ;;  %v13929_v29 = vpop.f32.mrf.mxu1 }
 0x39d   :  { %v819_v26 = vmax.f32 %v13895_v51, %v13929_v29 }
 0x39e   :  { %v700_v28 = vpop.f32.mrf.mxu0  ;;  %v799_v30 = vpop.f32.mrf.mxu1 }
 0x39f   :  { %v818_v56 = vmax.f32 %v700_v28, %v799_v30  ;;  %v908_v2 = vrot.slane %v819_v26, 5  ;;  %v833_v10 = vrot.slane %v819_v26, 4  ;;  %v900_v11 = vmul.f32 %v890_v1, %v819_v26 }
 0x3a0   :  { %v13898_v58 = vpop.f32.mrf.mxu0  ;;  %v13932_v59 = vpop.f32.mrf.mxu1  ;;  %v860_v26 = vsel %vm855_vm10, %v857_v43, %v859_v46  ;;  %v862_v1 = vsel %vm855_vm10, %v859_v46, %v861_v49  ;;  %v1282_v46 = vld [vmem:[#allocation5 + $0x660] sm:$0xff] }
 0x3a1   :  { %v831_v62 = vrot.slane %v818_v56, 4  ;;  %v821_v63 = vmax.f32 %v13898_v58, %v13932_v59  ;;  %v899_v0 = vmul.f32 %v888_v53, %v818_v56  ;;  %v907_v20 = vrot.slane %v818_v56, 5  ;;  %v1276_v49 = vld [vmem:[#allocation5 + $0x600] sm:$0xff] }
 0x3a2   :  { %v710_v18 = vpop.f32.mrf.mxu0  ;;  %v809_v4 = vpop.f32.mrf.mxu1  ;;  %v932_v22 = vrot.slane %v900_v11, 6 }
 0x3a3   :  { %v832_v5 = vsel %vm830_vm9, %v831_v62, %v821_v63  ;;  %v820_v6 = vmax.f32 %v710_v18, %v809_v4  ;;  %v931_v9 = vrot.slane %v899_v0, 6  ;;  %v909_v13 = vsel %vm855_vm10, %v907_v20, %v908_v2 }
 0x3a4   :  { %v835_v12 = vrot.slane %v832_v5, 4  ;;  %v15084_v8 = vpack.i.bf16 %v909_v13, %v907_v20  ;;  %v836_v17 = vsel %vm830_vm9, %v833_v10, %v831_v62  ;;  %v912_v31 = vrot.slane %v821_v63, 5 }
 0x3a5   :  { %v834_v7 = vrot.slane %v820_v6, 4  ;;  %938 = vrot.lane.b32.xlu1 %v931_v9, %s15194_s23  ;;  %v910_v15 = vrot.slane %v820_v6, 5  ;;  %v901_v16 = vmul.f32 %v892_v14, %v820_v6  ;;  %v933_v32 = vsel %vm930_vm11, %v931_v9, %v932_v22 }
 0x3a6   :  { %15085 = vrot.lane.b32.xlu0 %v15084_v8, %s15193_s1  ;;  %v902_v34 = vmul.f32 %v894_v27, %v832_v5  ;;  %v867_v48 = vmul.f32 %v856_v42, %v832_v5  ;;  %v868_v29 = vmul.f32 %v858_v45, %v836_v17  ;;  %v1105_v8 = vld [vmem:[#allocation5 + $0x5c0] sm:$0xff]  ;;  %v1192_v45 = vld [vmem:[#allocation5 + $0x5f0] sm:$0x3f] }
 0x3a7   :  { %v911_v19 = vsel %vm855_vm10, %v908_v2, %v910_v15  ;;  %v837_v21 = vsel %vm830_vm9, %v834_v7, %v833_v10  ;;  %v838_v24 = vsel %vm830_vm9, %v835_v12, %v834_v7  ;;  %v934_v33 = vrot.slane %v901_v16, 6  ;;  %13941 = vmatprep.mubr.msk.f32.mxu1 %vm233_vm4, %v1105_v8 }
 0x3a8   :  { %v913_v36 = vsel %vm855_vm10, %v910_v15, %v912_v31  ;;  %v936_v38 = vrot.slane %v902_v34, 6  ;;  %v869_v59 = vmul.f32 %v860_v26, %v837_v21  ;;  %v870_v20 = vmul.f32 %v862_v1, %v838_v24 }
 0x3a9   :  { %918 = vrot.lane.b32.xlu1 %v911_v19, %s15193_s1  ;;  %v935_v37 = vsel %vm930_vm11, %v932_v22, %v934_v33  ;;  %v979_v22 = vld [vmem:[#allocation5 + $0x530] ss:$0 sm:$0xff] }
 0x3aa   :  { %940 = vrot.lane.b32.xlu0 %v933_v32, %s15194_s23  ;;  %v937_v39 = vsel %vm930_vm11, %v934_v33, %v936_v38 }
 0x3ad   :  { %920 = vrot.lane.b32.xlu1 %v913_v36, %s15193_s1 }
 0x3ae   :  { %942 = vrot.lane.b32.xlu0 %v935_v37, %s15194_s23 }
 0x3b2   :  { %944 = vrot.lane.b32.xlu0 %v937_v39, %s15194_s23 }
 0x417   :  { %v939_v25 = vpop.permute.xlu1 %938 }
 0x418   :  { %v15086_v47 = vpop.permute.xlu0 %15085  ;;  %v988_v55 = vrot.slane %v939_v25, 3 }
 0x419   :  { %v15088_v50 = vunpack.i.h.bf16 %v15086_v47  ;;  %v15087_v51 = vunpack.i.l.bf16 %v15086_v47  ;;  %v1281_v47 = vld [vmem:[#allocation5 + $0x650] sm:$0xff] }
 0x41b   :  { %v950_v52 = vsel %vm241_vm5, %v867_v48, %v15087_v51  ;;  %v919_v53 = vpop.permute.xlu1 %918  ;;  %v951_v54 = vsel %vm241_vm5, %v868_v29, %v15088_v50  ;;  %v1280_v48 = vld [vmem:[#allocation5 + $0x640] sm:$0xff]  ;;  %v1279_v50 = vld [vmem:[#allocation5 + $0x630] sm:$0xff] }
 0x41c   :  { %v954_v28 = vsel %vm621_vm7, %v950_v52, %v939_v25  ;;  %v941_v30 = vpop.permute.xlu0 %940  ;;  %v952_v62 = vsel %vm241_vm5, %v869_v59, %v919_v53  ;;  %v1191_v25 = vld [vmem:[#allocation5 + $0x5e0] sm:$0xff]  ;;  %v1277_v29 = vld [vmem:[#allocation5 + $0x610] sm:$0xff] }
 0x41d   :  { %v985_v56 = vrot.slane %v954_v28, 3  ;;  %v955_v57 = vsel %vm621_vm7, %v951_v54, %v941_v30  ;;  %v989_v58 = vrot.slane %v941_v30, 3  ;;  %v1278_v51 = vld [vmem:[#allocation5 + $0x620] sm:$0xff]  ;;  %v1370_v52 = vld [vmem:[#allocation5 + $0x6d0] sm:$0xff] }
 0x41e   :  { %v986_v60 = vrot.slane %v955_v57, 3  ;;  %v1368_v57 = vld [vmem:[#allocation5 + $0x6b0] sm:$0xff] }
 0x41f   :  { %v990_v61 = vsel %vm984_vm12, %v988_v55, %v989_v58  ;;  %v921_v2 = vpop.permute.xlu1 %920  ;;  %v1366_v59 = vld [vmem:[#allocation5 + $0x690] sm:$0xff] }
 0x420   :  { %13116 = vmatprep.mubr.msk.f32.mxu0 %vm1003_vm13, %v990_v61  ;;  %v943_v63 = vpop.permute.xlu0 %942  ;;  %v987_v0 = vsel %vm984_vm12, %v985_v56, %v986_v60  ;;  %v953_v6 = vsel %vm241_vm5, %v870_v20, %v921_v2  ;;  %v1369_v56 = vld [vmem:[#allocation5 + $0x6c0] sm:$0xff]  ;;  %v1364_v61 = vld [vmem:[#allocation5 + $0x670] sm:$0xff] }
 0x421   :  { %v956_v18 = vsel %vm621_vm7, %v952_v62, %v943_v63  ;;  %v993_v4 = vrot.slane %v943_v63, 3  ;;  %1077 = vmatmul.mubr.f32.vlgmr.msra.gmra.mxu0 %v987_v0  ;;  %v1448_v62 = vld [vmem:[#allocation5 + $0x6e0] sm:$0x3] }
 0x422   :  { %v991_v3 = vrot.slane %v956_v18, 3  ;;  %v1451_v63 = vsel %vm1449_vm14, %v1448_v62, 0 }
 0x423   :  { %v994_v5 = vsel %vm984_vm12, %v989_v58, %v993_v4  ;;  %v1367_v58 = vld [vmem:[#allocation5 + $0x6a0] sm:$0xff]  ;;  %v15476_v0 = vand.u32 4294901760, %v1451_v63 }
 0x424   :  { %13117 = vmatprep.mubr.msk.f32.mxu0 %vm1003_vm13, %v994_v5  ;;  %v945_v9 = vpop.permute.xlu0 %944  ;;  %v992_v10 = vsel %vm984_vm12, %v986_v60, %v991_v3  ;;  %v1365_v60 = vld [vmem:[#allocation5 + $0x680] sm:$0xff] }
 0x425   :  { %v957_v11 = vsel %vm621_vm7, %v953_v6, %v945_v9  ;;  %v997_v12 = vrot.slane %v945_v9, 3  ;;  %1082 = vmatmul.mubr.f32.gmra.mxu0 %v992_v10  ;;  %v1525_v2 = vsub.f32 %v1451_v63, %v15476_v0 }
 0x426   :  { %v995_v13 = vrot.slane %v957_v11, 3 }
 0x427   :  { %v998_v14 = vsel %vm984_vm12, %v993_v4, %v997_v12  ;;  %v1526_v4 = vand.u32 4294901760, %v1525_v2 }
 0x428   :  { %13118 = vmatprep.mubr.msk.f32.mxu0 %vm1003_vm13, %v998_v14  ;;  %v996_v7 = vsel %vm984_vm12, %v991_v3, %v995_v13 }
 0x429   :  { %1087 = vmatmul.mubr.f32.gmra.mxu0 %v996_v7  ;;  %v1527_v6 = vsub.f32 %v1525_v2, %v1526_v4 }
 0x42a   :  { %13119 = vmatprep.mubr.msk.f32.mxu0 %vm1003_vm13, %v997_v12 }
 0x42b   :  { %v1528_v14 = vand.u32 4294901760, %v1527_v6 }
 0x42d   :  { %1092 = vmatmul.mubr.f32.gmra.mxu0 %v995_v13 }
 0x42e   :  { %14014 = vmatprep.mubr.msk.f32.mxu0 %vm15192_vm3, %v17189_v35 }
 0x4e1   :  { %v1078_v15 = vpop.f32.mrf.mxu0 }
 0x4e2   :  { %v1079_v36 = vadd.f32 %v1078_v15, %v979_v22  ;;  %v1920_v15 = vld [vmem:[#allocation5 + $0x730] sm:$0x3] }
 0x4e3   :  { %v1080_v16 = vpop.f32.mrf.mxu0 }
 0x4e4   :  { %v1097_v41 = vmul.f32 0.01, %v1079_v36 }
 0x4e5   :  { %v1083_v17 = vpop.f32.mrf.mxu0 }
 0x4e6   :  { %v1084_v32 = vadd.f32 %v1083_v17, %v979_v22  ;;  %v1101_v43 = vmax.f32 %v1079_v36, %v1097_v41  ;;  %v2386_v36 = vld [vmem:[#allocation5 + $0x770] sm:$0xf] }
 0x4e7   :  { %v1085_v19 = vpop.f32.mrf.mxu0 }
 0x4e8   :  { %v1098_v39 = vmul.f32 0.01, %v1084_v32 }
 0x4e9   :  { %v1088_v21 = vpop.f32.mrf.mxu0 }
 0x4ea   :  { %v1089_v27 = vadd.f32 %v1088_v21, %v979_v22  ;;  %v1102_v42 = vmax.f32 %v1084_v32, %v1098_v39  ;;  %v1922_v21 = vsel %vm1449_vm14, %v1920_v15, 0  ;;  %v2385_v39 = vld [vmem:[#allocation5 + $0x760] sm:$0xff] }
 0x4eb   :  { %v1090_v24 = vpop.f32.mrf.mxu0  ;;  %v15586_v41 = vand.u32 4294901760, %v2385_v39 }
 0x4ec   :  { %v1099_v37 = vmul.f32 0.01, %v1089_v27 }
 0x4ed   :  { %v1093_v31 = vpop.f32.mrf.mxu0 }
 0x4ee   :  { %v1094_v33 = vadd.f32 %v1093_v31, %v979_v22  ;;  %v1103_v23 = vmax.f32 %v1089_v27, %v1099_v37  ;;  %v1991_v27 = vand.u32 4294901760, %v1922_v21  ;;  %v2391_v37 = vsel %vm283_vm2, %v2386_v36, 0 }
 0x4ef   :  { %v1095_v34 = vpop.f32.mrf.mxu0 }
 0x4f0   :  { %v1100_v38 = vmul.f32 0.01, %v1094_v33  ;;  %v1992_v31 = vsub.f32 %v1922_v21, %v1991_v27 }
 0x4f2   :  { %v1104_v40 = vmax.f32 %v1094_v33, %v1100_v38  ;;  %v1993_v32 = vand.u32 4294901760, %v1992_v31  ;;  %v15581_v38 = vand.u32 4294901760, %v2391_v37 }
 0x4f4   :  { %13933 = vmatprep.subr.msk.mxu1 %vm283_vm2, %v1104_v40  ;;  %v1994_v33 = vsub.f32 %v1992_v31, %v1993_v32 }
 0x4f5   :  { %13934 = vmatpush3.msk.msra.mxu1 %vm283_vm2, %v1104_v40 }
 0x4f6   :  { %13935 = vmatprep.subr.mxu1 %v1103_v23  ;;  %v1995_v34 = vand.u32 4294901760, %v1994_v33 }
 0x4f7   :  { %13936 = vmatpush3.msra.mxu1 %v1103_v23 }
 0x4f8   :  { %13937 = vmatprep.subr.mxu1 %v1102_v42 }
 0x4f9   :  { %13938 = vmatpush3.msra.mxu1 %v1102_v42 }
 0x4fa   :  { %13939 = vmatprep.subr.mxu1 %v1101_v43 }
 0x4fb   :  { %13940 = vmatpush3.msra.mxu1 %v1101_v43 }
 0x4fc   :  { %13942 = vmatmul.mubr.msk.f32.vlgmr.msra.gmra.mxu1 %vm233_vm4, %v1106_v44  ;;  %13944 = vmatprep.subr.msk.mxu1 %vm283_vm2, %v1104_v40 }
 0x4fd   :  { %13945 = vmatpush3.msk.msra.mxu1 %vm283_vm2, %v1104_v40  ;;  %13952 = vmatprep.mubr.msk.f32.mxu1 %vm233_vm4, %v1191_v25  ;;  %v15584_v40 = vsub.f32 %v2391_v37, %v15581_v38  ;;  %v2383_v25 = vld [vmem:[#allocation5 + $0x740] sm:$0xff] }
 0x4fe   :  { %13946 = vmatprep.subr.mxu1 %v1103_v23 }
 0x4ff   :  { %13947 = vmatpush3.msra.mxu1 %v1103_v23  ;;  %v2384_v23 = vld [vmem:[#allocation5 + $0x750] sm:$0xff] }
 0x500   :  { %13948 = vmatprep.subr.mxu1 %v1102_v42  ;;  %v15594_v44 = vand.u32 4294901760, %v2384_v23 }
 0x501   :  { %13949 = vmatpush3.msra.mxu1 %v1102_v42  ;;  %v2499_v42 = vand.u32 4294901760, %v15584_v40 }
 0x502   :  { %13950 = vmatprep.subr.mxu1 %v1101_v43 }
 0x503   :  { %13951 = vmatpush3.msra.mxu1 %v1101_v43  ;;  %v15592_v43 = vsub.f32 %v2385_v39, %v15586_v41 }
 0x504   :  { %13953 = vmatmul.mubr.msk.f32.vlgmr.msra.gmra.mxu1 %vm233_vm4, %v1192_v45  ;;  %13955 = vmatprep.subr.mxu1 %v1282_v46  ;;  %v2500_v45 = vsub.f32 %v15584_v40, %v2499_v42 }
 0x505   :  { %13956 = vmatpush3.msra.mxu1 %v1282_v46  ;;  %v2506_v46 = vand.u32 4294901760, %v15592_v43 }
 0x506   :  { %13957 = vmatprep.subr.mxu1 %v1281_v47 }
 0x507   :  { %13958 = vmatpush3.msra.mxu1 %v1281_v47  ;;  %v15603_v47 = vsub.f32 %v2384_v23, %v15594_v44 }
 0x508   :  { %13959 = vmatprep.subr.mxu1 %v1280_v48 }
 0x509   :  { %13960 = vmatpush3.msra.mxu1 %v1280_v48  ;;  %v15605_v48 = vand.u32 4294901760, %v2383_v25 }
 0x50a   :  { %13961 = vmatprep.subr.mxu1 %v1279_v50 }
 0x50b   :  { %13962 = vmatpush3.msra.mxu1 %v1279_v50  ;;  %v2501_v50 = vand.u32 4294901760, %v2500_v45 }
 0x50c   :  { %13963 = vmatprep.subr.mxu1 %v1278_v51 }
 0x50d   :  { %13964 = vmatpush3.msra.mxu1 %v1278_v51  ;;  %v2507_v51 = vsub.f32 %v15592_v43, %v2506_v46 }
 0x50e   :  { %13965 = vmatprep.subr.mxu1 %v1277_v29 }
 0x50f   :  { %13966 = vmatpush3.msra.mxu1 %v1277_v29  ;;  %v2513_v29 = vand.u32 4294901760, %v15603_v47 }
 0x510   :  { %13967 = vmatprep.subr.mxu1 %v1276_v49 }
 0x511   :  { %13968 = vmatpush3.msra.mxu1 %v1276_v49  ;;  %v15614_v49 = vsub.f32 %v2383_v25, %v15605_v48 }
 0x512   :  { %13972 = vmatprep.subr.mxu1 %v1370_v52 }
 0x5bc   :  { %v13943_v53 = vpop.f32.mrf.mxu1 }
 0x5be   :  { %v1182_v54 = vpop.f32.mrf.mxu1 }
 0x5c4   :  { %v13954_v26 = vpop.f32.mrf.mxu1 }
 0x5c5   :  { %v1275_v55 = vmax.f32 %v13943_v53, %v13954_v26  ;;  %v2514_v53 = vsub.f32 %v15603_v47, %v2513_v29 }
 0x5c6   :  { %v1265_v28 = vpop.f32.mrf.mxu1 }
 0x5c7   :  { %v1274_v30 = vmax.f32 %v1182_v54, %v1265_v28  ;;  %v2520_v54 = vand.u32 4294901760, %v15614_v49  ;;  %v2515_v26 = vand.u32 4294901760, %v2514_v53 }
 0x5c9   :  { %13969 = vmatprep.mubr.msk.f32.mxu1 %vm241_vm5, %v1274_v30  ;;  %v2521_v28 = vsub.f32 %v15614_v49, %v2520_v54 }
 0x5ca   :  { %13970 = vmatmul.mubr.msk.f32.vlgmr.msra.gmra.mxu1 %vm241_vm5, %v1275_v55 }
 0x5cb   :  { %13973 = vmatpush3.msra.mxu1 %v1370_v52  ;;  %13986 = vmatprep.mubr.msk.f32.mxu1 %vm241_vm5, %v1274_v30  ;;  %v2508_v52 = vand.u32 4294901760, %v2507_v51  ;;  %v2522_v30 = vand.u32 4294901760, %v2521_v28 }
 0x5cc   :  { %13974 = vmatprep.subr.mxu1 %v1369_v56 }
 0x5cd   :  { %13975 = vmatpush3.msra.mxu1 %v1369_v56 }
 0x5ce   :  { %13976 = vmatprep.subr.mxu1 %v1368_v57 }
 0x5cf   :  { %13977 = vmatpush3.msra.mxu1 %v1368_v57 }
 0x5d0   :  { %13978 = vmatprep.subr.mxu1 %v1367_v58 }
 0x5d1   :  { %13979 = vmatpush3.msra.mxu1 %v1367_v58 }
 0x5d2   :  { %13980 = vmatprep.subr.mxu1 %v1366_v59 }
 0x5d3   :  { %13981 = vmatpush3.msra.mxu1 %v1366_v59 }
 0x5d4   :  { %13982 = vmatprep.subr.mxu1 %v1365_v60 }
 0x5d5   :  { %13983 = vmatpush3.msra.mxu1 %v1365_v60 }
 0x5d6   :  { %13984 = vmatprep.subr.mxu1 %v1364_v61 }
 0x5d7   :  { %13985 = vmatpush3.msra.mxu1 %v1364_v61 }
 0x5d8   :  { %13987 = vmatmul.mubr.msk.f32.vlgmr.msra.gmra.mxu1 %vm241_vm5, %v1275_v55  ;;  %13989 = vmatprep.subr.mxu1 %v17189_v35 }
 0x5d9   :  { %13993 = vmatprep.mubr.msk.f32.mxu1 %vm15192_vm3, %v17189_v35 }
 0x68a   :  { %v13971_v1 = vpop.f32.mrf.mxu1 }
 0x68c   :  { %v1355_v18 = vpop.f32.mrf.mxu1 }
 0x698   :  { %v13988_v20 = vpop.f32.mrf.mxu1 }
 0x699   :  { %v1447_v3 = vmax.f32 %v13971_v1, %v13988_v20 }
 0x69a   :  { %v1437_v5 = vpop.f32.mrf.mxu1 }
 0x69b   :  { %v1455_v9 = vsel %vm1453_vm15, %v1447_v3, 0  ;;  %v1446_v10 = vmax.f32 %v1355_v18, %v1437_v5 }
 0x69c   :  { %v15480_v11 = vand.u32 4294901760, %v1455_v9 }
 0x69d   :  { %v15482_v12 = vand.u32 4294901760, %v1446_v10 }
 0x69e   :  { %v15485_v13 = vsub.f32 %v1455_v9, %v15480_v11  ;;  %13990 = vmatpush3.msra.mxu1 %v15480_v11  ;;  %14011 = vmatpush3.msra.mxu0 %v15480_v11 }
 0x69f   :  { %v15490_v7 = vsub.f32 %v1446_v10, %v15482_v12  ;;  %13991 = vmatprep.subr.mxu1 %v17189_v35  ;;  %14012 = vmatprep.subr.mxu0 %v17189_v35 }
 0x6a0   :  { %v15495_v8 = vand.u32 4294901760, %v15485_v13  ;;  %13992 = vmatpush3.msra.mxu1 %v15482_v12  ;;  %14013 = vmatpush3.msra.mxu0 %v15482_v12 }
 0x6a1   :  { %v15500_v16 = vand.u32 4294901760, %v15490_v7  ;;  %14024 = vmatprep.subr.mxu0 %v17189_v35  ;;  %14015 = vmatmul.mubr.f32.vlgmr.msra.gmra.mxu0 %v1526_v4 }
 0x6a2   :  { %14025 = vmatpush3.msra.mxu0 %v15480_v11  ;;  %13994 = vmatmul.mubr.f32.vlgmr.msra.gmra.mxu1 %v1528_v14  ;;  %v1566_v17 = vsub.f32 %v15485_v13, %v15495_v8 }
 0x6a3   :  { %14026 = vmatprep.subr.mxu0 %v17189_v35  ;;  %13996 = vmatprep.subr.mxu1 %v17189_v35  ;;  %v1573_v19 = vsub.f32 %v15490_v7, %v15500_v16 }
 0x6a4   :  { %14027 = vmatpush3.msra.mxu0 %v15482_v12  ;;  %14028 = vmatprep.mubr.msk.f32.mxu0 %vm15192_vm3, %v17189_v35  ;;  %v15514_v22 = vand.u32 4294901760, %v1566_v17 }
 0x6a5   :  { %14038 = vmatprep.subr.mxu0 %v17189_v35  ;;  %14029 = vmatmul.mubr.f32.vlgmr.msra.gmra.mxu0 %v15476_v0  ;;  %v15518_v24 = vand.u32 4294901760, %v1573_v19 }
 0x6a6   :  { %13997 = vmatpush3.msra.mxu1 %v15514_v22  ;;  %14039 = vmatpush3.msra.mxu0 %v15514_v22 }
 0x6a7   :  { %13998 = vmatprep.subr.mxu1 %v17189_v35  ;;  %14040 = vmatprep.subr.mxu0 %v17189_v35 }
 0x6a8   :  { %13999 = vmatpush3.msra.mxu1 %v15518_v24  ;;  %14000 = vmatprep.mubr.msk.f32.mxu1 %vm15192_vm3, %v17189_v35 }
 0x6a9   :  { %14041 = vmatpush3.msra.mxu0 %v15518_v24  ;;  %14001 = vmatmul.mubr.f32.vlgmr.msra.gmra.mxu1 %v15476_v0 }
 0x6aa   :  { %14003 = vmatprep.subr.mxu1 %v17189_v35  ;;  %14042 = vmatprep.mubr.msk.f32.mxu0 %vm15192_vm3, %v17189_v35 }
 0x6ab   :  { %14052 = vmatprep.subr.mxu0 %v17189_v35  ;;  %14004 = vmatpush3.msra.mxu1 %v15485_v13 }
 0x6ac   :  { %14043 = vmatmul.mubr.f32.vlgmr.msra.gmra.mxu0 %v1991_v27  ;;  %14005 = vmatprep.subr.mxu1 %v17189_v35 }
 0x6ad   :  { %14053 = vmatpush3.msra.mxu0 %v15480_v11  ;;  %14006 = vmatpush3.msra.mxu1 %v15490_v7 }
 0x6ae   :  { %14054 = vmatprep.subr.mxu0 %v17189_v35  ;;  %14007 = vmatprep.mubr.msk.f32.mxu1 %vm15192_vm3, %v17189_v35 }
 0x6af   :  { %14055 = vmatpush3.msra.mxu0 %v15482_v12  ;;  %14008 = vmatmul.mubr.f32.vlgmr.msra.gmra.mxu1 %v1525_v2 }
 0x6b0   :  { %14017 = vmatprep.subr.mxu1 %v17189_v35  ;;  %14056 = vmatprep.mubr.msk.f32.mxu0 %vm15192_vm3, %v17189_v35 }
 0x6b1   :  { %14066 = vmatprep.subr.mxu0 %v17189_v35  ;;  %14018 = vmatpush3.msra.mxu1 %v15495_v8 }
 0x6b2   :  { %14057 = vmatmul.mubr.f32.vlgmr.msra.gmra.mxu0 %v1993_v32  ;;  %14019 = vmatprep.subr.mxu1 %v17189_v35 }
 0x6b3   :  { %14067 = vmatpush3.msra.mxu0 %v15480_v11  ;;  %14020 = vmatpush3.msra.mxu1 %v15500_v16 }
 0x6b4   :  { %14068 = vmatprep.subr.mxu0 %v17189_v35  ;;  %14021 = vmatprep.mubr.msk.f32.mxu1 %vm15192_vm3, %v17189_v35 }
 0x6b5   :  { %14069 = vmatpush3.msra.mxu0 %v15482_v12  ;;  %14022 = vmatmul.mubr.f32.vlgmr.msra.gmra.mxu1 %v15476_v0 }
 0x6b6   :  { %14031 = vmatprep.subr.mxu1 %v17189_v35  ;;  %14035 = vmatprep.mubr.msk.f32.mxu1 %vm15192_vm3, %v17189_v35 }
 0x6b7   :  { %14032 = vmatpush3.msra.mxu1 %v15480_v11  ;;  %14070 = vmatprep.mubr.msk.f32.mxu0 %vm15192_vm3, %v17189_v35 }
 0x6b8   :  { %14033 = vmatprep.subr.mxu1 %v17189_v35  ;;  %14071 = vmatmul.mubr.f32.vlgmr.msra.gmra.mxu0 %v1991_v27 }
 0x6b9   :  { %14034 = vmatpush3.msra.mxu1 %v15482_v12  ;;  %14084 = vmatprep.subr.mxu0 %v17189_v35 }
 0x6ba   :  { %14036 = vmatmul.mubr.f32.vlgmr.msra.gmra.mxu1 %v1995_v34  ;;  %14045 = vmatprep.subr.mxu1 %v17189_v35 }
 0x6bb   :  { %14046 = vmatpush3.msra.mxu1 %v15485_v13  ;;  %14049 = vmatprep.mubr.msk.f32.mxu1 %vm15192_vm3, %v17189_v35 }
 0x6bc   :  { %14047 = vmatprep.subr.mxu1 %v17189_v35  ;;  %14092 = vmatprep.mubr.msk.f32.mxu0 %vm15192_vm3, %v17189_v35 }
 0x6bd   :  { %14048 = vmatpush3.msra.mxu1 %v15490_v7  ;;  %14085 = vmatpush3.msra.mxu0 %v2501_v50 }
 0x6be   :  { %14050 = vmatmul.mubr.f32.vlgmr.msra.gmra.mxu1 %v1992_v31  ;;  %14059 = vmatprep.subr.mxu1 %v17189_v35 }
 0x6bf   :  { %14060 = vmatpush3.msra.mxu1 %v15495_v8  ;;  %14063 = vmatprep.mubr.msk.f32.mxu1 %vm15192_vm3, %v17189_v35 }
 0x6c0   :  { %14061 = vmatprep.subr.mxu1 %v17189_v35  ;;  %14086 = vmatprep.subr.mxu0 %v17189_v35 }
 0x6c1   :  { %14062 = vmatpush3.msra.mxu1 %v15500_v16  ;;  %14087 = vmatpush3.msra.mxu0 %v2508_v52 }
 0x6c2   :  { %14064 = vmatmul.mubr.f32.vlgmr.msra.gmra.mxu1 %v1991_v27  ;;  %14073 = vmatprep.subr.mxu1 %v17189_v35 }
 0x6c3   :  { %14081 = vmatprep.mubr.msk.f32.mxu1 %vm15192_vm3, %v17189_v35  ;;  %14074 = vmatpush3.msra.mxu1 %v15581_v38 }
 0x6c4   :  { %14075 = vmatprep.subr.mxu1 %v17189_v35  ;;  %14088 = vmatprep.subr.mxu0 %v17189_v35 }
 0x6c5   :  { %14076 = vmatpush3.msra.mxu1 %v15586_v41  ;;  %14089 = vmatpush3.msra.mxu0 %v2515_v26  ;;  %v2878_v26 = vld [vmem:[#allocation5 + $0x780] sm:$0x3] }
 0x6c6   :  { %14077 = vmatprep.subr.mxu1 %v17189_v35  ;;  %14090 = vmatprep.subr.mxu0 %v17189_v35  ;;  %v2880_v28 = vsel %vm1449_vm14, %v2878_v26, 0 }
 0x6c7   :  { %14078 = vmatpush3.msra.mxu1 %v15594_v44  ;;  %14091 = vmatpush3.msra.mxu0 %v2522_v30  ;;  %v3811_v30 = vld [vmem:[#allocation5 + $0x810] sm:$0xf] }
 0x6c8   :  { %14079 = vmatprep.subr.mxu1 %v17189_v35  ;;  %14106 = vmatprep.subr.mxu0 %v17189_v35 }
 0x6c9   :  { %14080 = vmatpush3.msra.mxu1 %v15605_v48 }
 0x6ca   :  { %14095 = vmatprep.subr.mxu1 %v17189_v35 }
 0x761   :  { %v1762_v55 = vpop.f32.mrf.mxu0 }
 0x762   :  { %v1530_v56 = vpop.f32.mrf.mxu1 }
 0x763   :  { %v14016_v57 = vpop.f32.mrf.mxu0 }
 0x764   :  { %v13995_v58 = vpop.f32.mrf.mxu1  ;;  %v3810_v57 = vld [vmem:[#allocation5 + $0x800] sm:$0xff] }
 0x765   :  { %v1912_v59 = vpop.f32.mrf.mxu0 }
 0x767   :  { %v14030_v60 = vpop.f32.mrf.mxu0 }
 0x768   :  { %v3809_v60 = vld [vmem:[#allocation5 + $0x7f0] sm:$0xff] }
 0x769   :  { %v1611_v61 = vpop.f32.mrf.mxu1 }
 0x76a   :  { %v1612_v62 = vadd.f32 %v1611_v61, %v1530_v56 }
 0x76b   :  { %v14002_v63 = vpop.f32.mrf.mxu1 }
 0x76c   :  { %v2078_v0 = vpop.f32.mrf.mxu0  ;;  %v15774_v63 = vand.u32 4294901760, %v3809_v60 }
 0x76e   :  { %v14044_v1 = vpop.f32.mrf.mxu0 }
 0x76f   :  { %v1687_v2 = vpop.f32.mrf.mxu1 }
 0x770   :  { %v1688_v18 = vadd.f32 %v1687_v2, %v1612_v62 }
 0x771   :  { %v14009_v4 = vpop.f32.mrf.mxu1 }
 0x772   :  { %v1763_v20 = vadd.f32 %v1762_v55, %v1688_v18  ;;  %v2229_v3 = vpop.f32.mrf.mxu0  ;;  %v3816_v55 = vsel %vm283_vm2, %v3811_v30, 0  ;;  %v15783_v18 = vsub.f32 %v3809_v60, %v15774_v63 }
 0x773   :  { %v15761_v56 = vand.u32 4294901760, %v3816_v55 }
 0x774   :  { %v14058_v5 = vpop.f32.mrf.mxu0 }
 0x775   :  { %v1839_v6 = vpop.f32.mrf.mxu1  ;;  %v15764_v58 = vsub.f32 %v3816_v55, %v15761_v56  ;;  %v3938_v5 = vand.u32 4294901760, %v15783_v18 }
 0x776   :  { %v1840_v9 = vadd.f32 %v1839_v6, %v1763_v20 }
 0x777   :  { %v14023_v10 = vpop.f32.mrf.mxu1  ;;  %v3924_v61 = vand.u32 4294901760, %v15764_v58 }
 0x778   :  { %v15629_v14 = vadd.f32 %v1912_v59, %v1840_v9  ;;  %v2379_v15 = vpop.f32.mrf.mxu0  ;;  %v15766_v59 = vand.u32 4294901760, %v3810_v57  ;;  %v3939_v10 = vsub.f32 %v15783_v18, %v3938_v5 }
 0x779   :  { %v3925_v1 = vsub.f32 %v15764_v58, %v3924_v61 }
 0x77a   :  { %v1997_v17 = vpop.f32.mrf.mxu1  ;;  %v14072_v19 = vpop.f32.mrf.mxu0  ;;  %v15772_v62 = vsub.f32 %v3810_v57, %v15766_v59 }
 0x77b   :  { %v2079_v27 = vadd.f32 %v2078_v0, %v1997_v17  ;;  %v3808_v0 = vld [vmem:[#allocation5 + $0x7e0] sm:$0xff]  ;;  %v3926_v20 = vand.u32 4294901760, %v3925_v1  ;;  %v3940_v17 = vand.u32 4294901760, %v3939_v10 }
 0x77c   :  { %v14037_v21 = vpop.f32.mrf.mxu1  ;;  %v3931_v2 = vand.u32 4294901760, %v15772_v62  ;;  %v15785_v4 = vand.u32 4294901760, %v3808_v0 }
 0x77e   :  { %v2154_v31 = vpop.f32.mrf.mxu1  ;;  %v15794_v6 = vsub.f32 %v3808_v0, %v15785_v4 }
 0x77f   :  { %v2155_v32 = vadd.f32 %v2154_v31, %v2079_v27 }
 0x780   :  { %v14051_v33 = vpop.f32.mrf.mxu1 }
 0x781   :  { %v2230_v34 = vadd.f32 %v2229_v3, %v2155_v32  ;;  %v3932_v3 = vsub.f32 %v15772_v62, %v3931_v2 }
 0x782   :  { %v2306_v36 = vpop.f32.mrf.mxu1 }
 0x783   :  { %v2307_v37 = vadd.f32 %v2306_v36, %v2230_v34  ;;  %v3933_v9 = vand.u32 4294901760, %v3932_v3 }
 0x784   :  { %v14065_v39 = vpop.f32.mrf.mxu1 }
 0x785   :  { %v2380_v23 = vadd.f32 %v2379_v15, %v2307_v37  ;;  %v3945_v15 = vand.u32 4294901760, %v15794_v6 }
 0x787   :  { %v2388_v25 = vsel %vm233_vm4, %v2380_v23, 0  ;;  %v3946_v19 = vsub.f32 %v15794_v6, %v3945_v15 }
 0x788   :  { %v2462_v45 = vand.u32 4294901760, %v2388_v25 }
 0x789   :  { %v3947_v21 = vand.u32 4294901760, %v3946_v19 }
 0x78a   :  { %v2463_v50 = vsub.f32 %v2388_v25, %v2462_v45  ;;  %14093 = vmatmul.mubr.f32.vlgmr.msra.gmra.mxu0 %v2462_v45 }
 0x78b   :  { %14107 = vmatpush3.msra.mxu0 %v15581_v38  ;;  %14114 = vmatprep.mubr.msk.f32.mxu0 %vm15192_vm3, %v17189_v35 }
 0x78c   :  { %14108 = vmatprep.subr.mxu0 %v17189_v35  ;;  %v2464_v51 = vand.u32 4294901760, %v2463_v50 }
 0x78d   :  { %14109 = vmatpush3.msra.mxu0 %v15586_v41 }
 0x78e   :  { %14110 = vmatprep.subr.mxu0 %v17189_v35  ;;  %v2465_v52 = vsub.f32 %v2463_v50, %v2464_v51 }
 0x78f   :  { %14111 = vmatpush3.msra.mxu0 %v15594_v44 }
 0x790   :  { %14112 = vmatprep.subr.mxu0 %v17189_v35  ;;  %v2466_v53 = vand.u32 4294901760, %v2465_v52 }
 0x791   :  { %14113 = vmatpush3.msra.mxu0 %v15605_v48 }
 0x792   :  { %14115 = vmatmul.mubr.f32.vlgmr.msra.gmra.mxu0 %v2464_v51  ;;  %14128 = vmatprep.subr.mxu0 %v17189_v35 }
 0x793   :  { %14082 = vmatmul.mubr.f32.vlgmr.msra.gmra.mxu1 %v2466_v53  ;;  %14129 = vmatpush3.msra.mxu0 %v15581_v38  ;;  %v15654_v38 = vand.u32 4294901760, %v2880_v28 }
 0x794   :  { %14096 = vmatpush3.msra.mxu1 %v15584_v40  ;;  %14130 = vmatprep.subr.mxu0 %v17189_v35 }
 0x795   :  { %14097 = vmatprep.subr.mxu1 %v17189_v35  ;;  %14131 = vmatpush3.msra.mxu0 %v15586_v41  ;;  %v2950_v41 = vsub.f32 %v2880_v28, %v15654_v38 }
 0x796   :  { %14098 = vmatpush3.msra.mxu1 %v15592_v43  ;;  %14132 = vmatprep.subr.mxu0 %v17189_v35 }
 0x797   :  { %14099 = vmatprep.subr.mxu1 %v17189_v35  ;;  %14133 = vmatpush3.msra.mxu0 %v15594_v44  ;;  %v2951_v44 = vand.u32 4294901760, %v2950_v41 }
 0x798   :  { %14100 = vmatpush3.msra.mxu1 %v15603_v47  ;;  %14134 = vmatprep.subr.mxu0 %v17189_v35 }
 0x799   :  { %14101 = vmatprep.subr.mxu1 %v17189_v35  ;;  %14103 = vmatprep.mubr.msk.f32.mxu1 %vm15192_vm3, %v17189_v35  ;;  %v2952_v40 = vsub.f32 %v2950_v41, %v2951_v44 }
 0x79a   :  { %14102 = vmatpush3.msra.mxu1 %v15614_v49  ;;  %14135 = vmatpush3.msra.mxu0 %v15605_v48 }
 0x79b   :  { %14136 = vmatprep.mubr.msk.f32.mxu0 %vm15192_vm3, %v17189_v35  ;;  %14104 = vmatmul.mubr.f32.vlgmr.msra.gmra.mxu1 %v2463_v50 }
 0x79c   :  { %14117 = vmatprep.subr.mxu1 %v17189_v35  ;;  %14137 = vmatmul.mubr.f32.vlgmr.msra.gmra.mxu0 %v2462_v45 }
 0x79d   :  { %14146 = vmatprep.subr.mxu0 %v17189_v35  ;;  %14118 = vmatpush3.msra.mxu1 %v2499_v42  ;;  %v3345_v42 = vld [vmem:[#allocation5 + $0x7d0] sm:$0x3] }
 0x79e   :  { %14147 = vmatpush3.msra.mxu0 %v15514_v22  ;;  %14119 = vmatprep.subr.mxu1 %v17189_v35  ;;  %v3347_v43 = vsel %vm1449_vm14, %v3345_v42, 0 }
 0x79f   :  { %14148 = vmatprep.subr.mxu0 %v17189_v35  ;;  %14120 = vmatpush3.msra.mxu1 %v2506_v46  ;;  %v2953_v46 = vand.u32 4294901760, %v2952_v40  ;;  %v3416_v47 = vand.u32 4294901760, %v3347_v43 }
 0x7a0   :  { %14149 = vmatpush3.msra.mxu0 %v15518_v24  ;;  %14121 = vmatprep.subr.mxu1 %v17189_v35 }
 0x7a1   :  { %14150 = vmatprep.mubr.msk.f32.mxu0 %vm15192_vm3, %v17189_v35  ;;  %14160 = vmatprep.subr.mxu0 %v17189_v35  ;;  %v3417_v48 = vsub.f32 %v3347_v43, %v3416_v47 }
 0x7a2   :  { %14122 = vmatpush3.msra.mxu1 %v2513_v29  ;;  %14151 = vmatmul.mubr.f32.vlgmr.msra.gmra.mxu0 %v15654_v38 }
 0x7a3   :  { %14161 = vmatpush3.msra.mxu0 %v15480_v11  ;;  %14123 = vmatprep.subr.mxu1 %v17189_v35  ;;  %v3418_v29 = vand.u32 4294901760, %v3417_v48 }
 0x7a4   :  { %14162 = vmatprep.subr.mxu0 %v17189_v35  ;;  %14124 = vmatpush3.msra.mxu1 %v2520_v54 }
 0x7a5   :  { %14125 = vmatprep.mubr.msk.f32.mxu1 %vm15192_vm3, %v17189_v35  ;;  %14163 = vmatpush3.msra.mxu0 %v15482_v12  ;;  %v3419_v49 = vsub.f32 %v3417_v48, %v3418_v29 }
 0x7a6   :  { %14126 = vmatmul.mubr.f32.vlgmr.msra.gmra.mxu1 %v2462_v45  ;;  %14139 = vmatprep.subr.mxu1 %v17189_v35 }
 0x7a7   :  { %14164 = vmatprep.mubr.msk.f32.mxu0 %vm15192_vm3, %v17189_v35  ;;  %14174 = vmatprep.subr.mxu0 %v17189_v35  ;;  %v3420_v54 = vand.u32 4294901760, %v3419_v49 }
 0x7a8   :  { %14140 = vmatpush3.msra.mxu1 %v15480_v11  ;;  %14165 = vmatmul.mubr.f32.vlgmr.msra.gmra.mxu0 %v2951_v44 }
 0x7a9   :  { %14175 = vmatpush3.msra.mxu0 %v15480_v11  ;;  %14141 = vmatprep.subr.mxu1 %v17189_v35 }
 0x7aa   :  { %14176 = vmatprep.subr.mxu0 %v17189_v35  ;;  %14142 = vmatpush3.msra.mxu1 %v15482_v12 }
 0x7ab   :  { %14143 = vmatprep.mubr.msk.f32.mxu1 %vm15192_vm3, %v17189_v35  ;;  %14177 = vmatpush3.msra.mxu0 %v15482_v12 }
 0x7ac   :  { %14144 = vmatmul.mubr.f32.vlgmr.msra.gmra.mxu1 %v2953_v46  ;;  %14153 = vmatprep.subr.mxu1 %v17189_v35 }
 0x7ad   :  { %14178 = vmatprep.mubr.msk.f32.mxu0 %vm15192_vm3, %v17189_v35  ;;  %14188 = vmatprep.subr.mxu0 %v17189_v35 }
 0x7ae   :  { %14154 = vmatpush3.msra.mxu1 %v15485_v13  ;;  %14179 = vmatmul.mubr.f32.vlgmr.msra.gmra.mxu0 %v15654_v38 }
 0x7af   :  { %14189 = vmatpush3.msra.mxu0 %v15514_v22  ;;  %14155 = vmatprep.subr.mxu1 %v17189_v35 }
 0x7b0   :  { %14190 = vmatprep.subr.mxu0 %v17189_v35  ;;  %14156 = vmatpush3.msra.mxu1 %v15490_v7 }
 0x7b1   :  { %14157 = vmatprep.mubr.msk.f32.mxu1 %vm15192_vm3, %v17189_v35  ;;  %14191 = vmatpush3.msra.mxu0 %v15518_v24 }
 0x7b2   :  { %14158 = vmatmul.mubr.f32.vlgmr.msra.gmra.mxu1 %v2950_v41  ;;  %14167 = vmatprep.subr.mxu1 %v17189_v35 }
 0x7b3   :  { %14192 = vmatprep.mubr.msk.f32.mxu0 %vm15192_vm3, %v17189_v35  ;;  %14202 = vmatprep.subr.mxu0 %v17189_v35 }
 0x7b4   :  { %14168 = vmatpush3.msra.mxu1 %v15495_v8  ;;  %14193 = vmatmul.mubr.f32.vlgmr.msra.gmra.mxu0 %v3416_v47 }
 0x7b5   :  { %14203 = vmatpush3.msra.mxu0 %v15480_v11  ;;  %14169 = vmatprep.subr.mxu1 %v17189_v35 }
 0x7b6   :  { %14204 = vmatprep.subr.mxu0 %v17189_v35  ;;  %14170 = vmatpush3.msra.mxu1 %v15500_v16 }
 0x7b7   :  { %14171 = vmatprep.mubr.msk.f32.mxu1 %vm15192_vm3, %v17189_v35  ;;  %14205 = vmatpush3.msra.mxu0 %v15482_v12 }
 0x7b8   :  { %14172 = vmatmul.mubr.f32.vlgmr.msra.gmra.mxu1 %v15654_v38  ;;  %14181 = vmatprep.subr.mxu1 %v17189_v35 }
 0x7b9   :  { %14206 = vmatprep.mubr.msk.f32.mxu0 %vm15192_vm3, %v17189_v35  ;;  %14216 = vmatprep.subr.mxu0 %v17189_v35 }
 0x7ba   :  { %14182 = vmatpush3.msra.mxu1 %v15480_v11  ;;  %14207 = vmatmul.mubr.f32.vlgmr.msra.gmra.mxu0 %v3418_v29 }
 0x7bb   :  { %14217 = vmatpush3.msra.mxu0 %v15480_v11  ;;  %14183 = vmatprep.subr.mxu1 %v17189_v35 }
 0x7bc   :  { %14218 = vmatprep.subr.mxu0 %v17189_v35  ;;  %14184 = vmatpush3.msra.mxu1 %v15482_v12 }
 0x7bd   :  { %14185 = vmatprep.mubr.msk.f32.mxu1 %vm15192_vm3, %v17189_v35  ;;  %14219 = vmatpush3.msra.mxu0 %v15482_v12 }
 0x7be   :  { %14186 = vmatmul.mubr.f32.vlgmr.msra.gmra.mxu1 %v3420_v54  ;;  %14195 = vmatprep.subr.mxu1 %v17189_v35 }
 0x7bf   :  { %14196 = vmatpush3.msra.mxu1 %v15485_v13  ;;  %14199 = vmatprep.mubr.msk.f32.mxu1 %vm15192_vm3, %v17189_v35 }
 0x7c0   :  { %14197 = vmatprep.subr.mxu1 %v17189_v35  ;;  %14220 = vmatprep.mubr.msk.f32.mxu0 %vm15192_vm3, %v17189_v35 }
 0x7c1   :  { %14198 = vmatpush3.msra.mxu1 %v15490_v7  ;;  %14221 = vmatmul.mubr.f32.vlgmr.msra.gmra.mxu0 %v3416_v47 }
 0x7c2   :  { %14200 = vmatmul.mubr.f32.vlgmr.msra.gmra.mxu1 %v3417_v48  ;;  %14209 = vmatprep.subr.mxu1 %v17189_v35 }
 0x7c3   :  { %14210 = vmatpush3.msra.mxu1 %v15495_v8  ;;  %14213 = vmatprep.mubr.msk.f32.mxu1 %vm15192_vm3, %v17189_v35 }
 0x7c4   :  { %14211 = vmatprep.subr.mxu1 %v17189_v35  ;;  %14234 = vmatprep.subr.mxu0 %v17189_v35 }
 0x7c5   :  { %14212 = vmatpush3.msra.mxu1 %v15500_v16  ;;  %14242 = vmatprep.mubr.msk.f32.mxu0 %vm15192_vm3, %v17189_v35 }
 0x7c6   :  { %14214 = vmatmul.mubr.f32.vlgmr.msra.gmra.mxu1 %v3416_v47  ;;  %14223 = vmatprep.subr.mxu1 %v17189_v35 }
 0x7c7   :  { %14231 = vmatprep.mubr.msk.f32.mxu1 %vm15192_vm3, %v17189_v35  ;;  %14224 = vmatpush3.msra.mxu1 %v15761_v56 }
 0x7c8   :  { %14225 = vmatprep.subr.mxu1 %v17189_v35  ;;  %14235 = vmatpush3.msra.mxu0 %v3926_v20 }
 0x7c9   :  { %14226 = vmatpush3.msra.mxu1 %v15766_v59  ;;  %14236 = vmatprep.subr.mxu0 %v17189_v35 }
 0x7ca   :  { %14227 = vmatprep.subr.mxu1 %v17189_v35  ;;  %14237 = vmatpush3.msra.mxu0 %v3933_v9 }
 0x7cb   :  { %14228 = vmatpush3.msra.mxu1 %v15774_v63  ;;  %14238 = vmatprep.subr.mxu0 %v17189_v35 }
 0x7cc   :  { %14229 = vmatprep.subr.mxu1 %v17189_v35  ;;  %14239 = vmatpush3.msra.mxu0 %v3940_v17 }
 0x7cd   :  { %14230 = vmatpush3.msra.mxu1 %v15785_v4  ;;  %14240 = vmatprep.subr.mxu0 %v17189_v35 }
 0x7ce   :  { %14245 = vmatprep.subr.mxu1 %v17189_v35  ;;  %14241 = vmatpush3.msra.mxu0 %v3947_v21 }
 0x7cf   :  { %14256 = vmatprep.subr.mxu0 %v17189_v35 }
 0x84a   :  { %v2559_v27 = vpop.f32.mrf.mxu0 }
 0x84c   :  { %v14094_v31 = vpop.f32.mrf.mxu0 }
 0x852   :  { %v2716_v32 = vpop.f32.mrf.mxu0 }
 0x853   :  { %v2468_v33 = vpop.f32.mrf.mxu1 }
 0x854   :  { %v2560_v34 = vadd.f32 %v2559_v27, %v2468_v33  ;;  %v14116_v36 = vpop.f32.mrf.mxu0 }
 0x855   :  { %v14083_v37 = vpop.f32.mrf.mxu1 }
 0x85b   :  { %v2639_v39 = vpop.f32.mrf.mxu1 }
 0x85c   :  { %v2640_v23 = vadd.f32 %v2639_v39, %v2560_v34  ;;  %v2874_v25 = vpop.f32.mrf.mxu0 }
 0x85d   :  { %v14105_v45 = vpop.f32.mrf.mxu1 }
 0x85e   :  { %v14138_v50 = vpop.f32.mrf.mxu0  ;;  %v2717_v51 = vadd.f32 %v2716_v32, %v2640_v23 }
 0x862   :  { %v3036_v52 = vpop.f32.mrf.mxu0 }
 0x864   :  { %v14152_v53 = vpop.f32.mrf.mxu0 }
 0x866   :  { %v2799_v26 = vpop.f32.mrf.mxu1 }
 0x867   :  { %v2800_v28 = vadd.f32 %v2799_v26, %v2717_v51  ;;  %v4303_v26 = vld [vmem:[#allocation5 + $0x820] sm:$0x3] }
 0x868   :  { %v14127_v38 = vpop.f32.mrf.mxu1  ;;  %v3187_v41 = vpop.f32.mrf.mxu0 }
 0x869   :  { %v15809_v44 = vadd.f32 %v2874_v25, %v2800_v28  ;;  %v4305_v28 = vsel %vm1449_vm14, %v4303_v26, 0  ;;  %v5236_v38 = vld [vmem:[#allocation5 + $0x8b0] sm:$0xf] }
 0x86a   :  { %v14166_v40 = vpop.f32.mrf.mxu0 }
 0x86c   :  { %v2955_v42 = vpop.f32.mrf.mxu1 }
 0x86d   :  { %v3037_v43 = vadd.f32 %v3036_v52, %v2955_v42  ;;  %v5235_v42 = vld [vmem:[#allocation5 + $0x8a0] sm:$0xff] }
 0x86e   :  { %v14145_v46 = vpop.f32.mrf.mxu1  ;;  %v3337_v47 = vpop.f32.mrf.mxu0 }
 0x86f   :  { %v15948_v46 = vand.u32 4294901760, %v5235_v42 }
 0x870   :  { %v14180_v48 = vpop.f32.mrf.mxu0 }
 0x872   :  { %v3112_v29 = vpop.f32.mrf.mxu1 }
 0x873   :  { %v3113_v49 = vadd.f32 %v3112_v29, %v3037_v43  ;;  %v15954_v29 = vsub.f32 %v5235_v42, %v15948_v46 }
 0x874   :  { %v14159_v54 = vpop.f32.mrf.mxu1  ;;  %v3503_v30 = vpop.f32.mrf.mxu0 }
 0x875   :  { %v3188_v55 = vadd.f32 %v3187_v41, %v3113_v49  ;;  %v5241_v41 = vsel %vm283_vm2, %v5236_v38, 0  ;;  %v5233_v54 = vld [vmem:[#allocation5 + $0x880] sm:$0xff] }
 0x876   :  { %v14194_v57 = vpop.f32.mrf.mxu0  ;;  %v15943_v40 = vand.u32 4294901760, %v5241_v41 }
 0x878   :  { %v3264_v60 = vpop.f32.mrf.mxu1  ;;  %v15946_v43 = vsub.f32 %v5241_v41, %v15943_v40 }
 0x879   :  { %v3265_v0 = vadd.f32 %v3264_v60, %v3188_v55  ;;  %v5356_v55 = vand.u32 4294901760, %v15954_v29  ;;  %v15967_v60 = vand.u32 4294901760, %v5233_v54 }
 0x87a   :  { %v14173_v1 = vpop.f32.mrf.mxu1  ;;  %v3654_v20 = vpop.f32.mrf.mxu0  ;;  %v5349_v48 = vand.u32 4294901760, %v15946_v43 }
 0x87b   :  { %v15811_v3 = vadd.f32 %v3337_v47, %v3265_v0  ;;  %v5234_v47 = vld [vmem:[#allocation5 + $0x890] sm:$0xff]  ;;  %v5357_v1 = vsub.f32 %v15954_v29, %v5356_v55 }
 0x87c   :  { %v14208_v9 = vpop.f32.mrf.mxu0  ;;  %v15956_v49 = vand.u32 4294901760, %v5234_v47 }
 0x87d   :  { %v15976_v9 = vsub.f32 %v5233_v54, %v15967_v60 }
 0x87e   :  { %v3422_v10 = vpop.f32.mrf.mxu1  ;;  %v15965_v57 = vsub.f32 %v5234_v47, %v15956_v49 }
 0x87f   :  { %v3504_v19 = vadd.f32 %v3503_v30, %v3422_v10  ;;  %v5350_v30 = vsub.f32 %v15946_v43, %v5349_v48  ;;  %v5358_v10 = vand.u32 4294901760, %v5357_v1 }
 0x880   :  { %v14187_v17 = vpop.f32.mrf.mxu1 }
 0x881   :  { %v3804_v21 = vpop.f32.mrf.mxu0  ;;  %v5351_v0 = vand.u32 4294901760, %v5350_v30 }
 0x882   :  { %v3579_v27 = vpop.f32.mrf.mxu1 }
 0x883   :  { %v3580_v31 = vadd.f32 %v3579_v27, %v3504_v19  ;;  %v14222_v32 = vpop.f32.mrf.mxu0  ;;  %v5370_v19 = vand.u32 4294901760, %v15976_v9 }
 0x884   :  { %v14201_v33 = vpop.f32.mrf.mxu1 }
 0x885   :  { %v3655_v34 = vadd.f32 %v3654_v20, %v3580_v31  ;;  %v5363_v20 = vand.u32 4294901760, %v15965_v57  ;;  %v5371_v27 = vsub.f32 %v15976_v9, %v5370_v19 }
 0x886   :  { %v3731_v36 = vpop.f32.mrf.mxu1 }
 0x887   :  { %v3732_v37 = vadd.f32 %v3731_v36, %v3655_v34  ;;  %v5364_v17 = vsub.f32 %v15965_v57, %v5363_v20  ;;  %v5372_v31 = vand.u32 4294901760, %v5371_v27 }
 0x888   :  { %v14215_v39 = vpop.f32.mrf.mxu1 }
 0x889   :  { %v3805_v23 = vadd.f32 %v3804_v21, %v3732_v37  ;;  %v5365_v21 = vand.u32 4294901760, %v5364_v17 }
 0x88b   :  { %v3813_v25 = vsel %vm233_vm4, %v3805_v23, 0 }
 0x88c   :  { %v3887_v45 = vand.u32 4294901760, %v3813_v25 }
 0x88e   :  { %v3888_v50 = vsub.f32 %v3813_v25, %v3887_v45  ;;  %14243 = vmatmul.mubr.f32.vlgmr.msra.gmra.mxu0 %v3887_v45 }
 0x88f   :  { %14257 = vmatpush3.msra.mxu0 %v15761_v56  ;;  %14264 = vmatprep.mubr.msk.f32.mxu0 %vm15192_vm3, %v17189_v35 }
 0x890   :  { %14258 = vmatprep.subr.mxu0 %v17189_v35  ;;  %v3889_v51 = vand.u32 4294901760, %v3888_v50 }
 0x891   :  { %14259 = vmatpush3.msra.mxu0 %v15766_v59 }
 0x892   :  { %14260 = vmatprep.subr.mxu0 %v17189_v35  ;;  %v3890_v52 = vsub.f32 %v3888_v50, %v3889_v51 }
 0x893   :  { %14261 = vmatpush3.msra.mxu0 %v15774_v63 }
 0x894   :  { %14262 = vmatprep.subr.mxu0 %v17189_v35  ;;  %v3891_v53 = vand.u32 4294901760, %v3890_v52 }
 0x895   :  { %14263 = vmatpush3.msra.mxu0 %v15785_v4 }
 0x896   :  { %14265 = vmatmul.mubr.f32.vlgmr.msra.gmra.mxu0 %v3889_v51  ;;  %14278 = vmatprep.subr.mxu0 %v17189_v35 }
 0x897   :  { %14232 = vmatmul.mubr.f32.vlgmr.msra.gmra.mxu1 %v3891_v53  ;;  %14279 = vmatpush3.msra.mxu0 %v15761_v56  ;;  %v15836_v56 = vand.u32 4294901760, %v4305_v28 }
 0x898   :  { %14246 = vmatpush3.msra.mxu1 %v15764_v58  ;;  %14280 = vmatprep.subr.mxu0 %v17189_v35 }
 0x899   :  { %14247 = vmatprep.subr.mxu1 %v17189_v35  ;;  %14281 = vmatpush3.msra.mxu0 %v15766_v59  ;;  %v4375_v59 = vsub.f32 %v4305_v28, %v15836_v56 }
 0x89a   :  { %14248 = vmatpush3.msra.mxu1 %v15772_v62  ;;  %14282 = vmatprep.subr.mxu0 %v17189_v35 }
 0x89b   :  { %14249 = vmatprep.subr.mxu1 %v17189_v35  ;;  %14283 = vmatpush3.msra.mxu0 %v15774_v63  ;;  %v4376_v63 = vand.u32 4294901760, %v4375_v59 }
 0x89c   :  { %14250 = vmatpush3.msra.mxu1 %v15783_v18  ;;  %14284 = vmatprep.subr.mxu0 %v17189_v35 }
 0x89d   :  { %14251 = vmatprep.subr.mxu1 %v17189_v35  ;;  %14253 = vmatprep.mubr.msk.f32.mxu1 %vm15192_vm3, %v17189_v35  ;;  %v4377_v58 = vsub.f32 %v4375_v59, %v4376_v63 }
 0x89e   :  { %14252 = vmatpush3.msra.mxu1 %v15794_v6  ;;  %14285 = vmatpush3.msra.mxu0 %v15785_v4 }
 0x89f   :  { %14286 = vmatprep.mubr.msk.f32.mxu0 %vm15192_vm3, %v17189_v35  ;;  %14254 = vmatmul.mubr.f32.vlgmr.msra.gmra.mxu1 %v3888_v50 }
 0x8a0   :  { %14267 = vmatprep.subr.mxu1 %v17189_v35  ;;  %14287 = vmatmul.mubr.f32.vlgmr.msra.gmra.mxu0 %v3887_v45 }
 0x8a1   :  { %14296 = vmatprep.subr.mxu0 %v17189_v35  ;;  %14268 = vmatpush3.msra.mxu1 %v3924_v61  ;;  %v4770_v61 = vld [vmem:[#allocation5 + $0x870] sm:$0x3] }
 0x8a2   :  { %14297 = vmatpush3.msra.mxu0 %v15514_v22  ;;  %14269 = vmatprep.subr.mxu1 %v17189_v35  ;;  %v4772_v62 = vsel %vm1449_vm14, %v4770_v61, 0 }
 0x8a3   :  { %14298 = vmatprep.subr.mxu0 %v17189_v35  ;;  %14270 = vmatpush3.msra.mxu1 %v3931_v2  ;;  %v4378_v2 = vand.u32 4294901760, %v4377_v58  ;;  %v4841_v18 = vand.u32 4294901760, %v4772_v62 }
 0x8a4   :  { %14299 = vmatpush3.msra.mxu0 %v15518_v24  ;;  %14271 = vmatprep.subr.mxu1 %v17189_v35 }
 0x8a5   :  { %14300 = vmatprep.mubr.msk.f32.mxu0 %vm15192_vm3, %v17189_v35  ;;  %14310 = vmatprep.subr.mxu0 %v17189_v35  ;;  %v4842_v4 = vsub.f32 %v4772_v62, %v4841_v18 }
 0x8a6   :  { %14272 = vmatpush3.msra.mxu1 %v3938_v5  ;;  %14301 = vmatmul.mubr.f32.vlgmr.msra.gmra.mxu0 %v15836_v56 }
 0x8a7   :  { %14311 = vmatpush3.msra.mxu0 %v15480_v11  ;;  %14273 = vmatprep.subr.mxu1 %v17189_v35  ;;  %v4843_v5 = vand.u32 4294901760, %v4842_v4 }
 0x8a8   :  { %14312 = vmatprep.subr.mxu0 %v17189_v35  ;;  %14274 = vmatpush3.msra.mxu1 %v3945_v15 }
 0x8a9   :  { %14275 = vmatprep.mubr.msk.f32.mxu1 %vm15192_vm3, %v17189_v35  ;;  %14313 = vmatpush3.msra.mxu0 %v15482_v12  ;;  %v4844_v6 = vsub.f32 %v4842_v4, %v4843_v5 }
 0x8aa   :  { %14276 = vmatmul.mubr.f32.vlgmr.msra.gmra.mxu1 %v3887_v45  ;;  %14289 = vmatprep.subr.mxu1 %v17189_v35 }
 0x8ab   :  { %14314 = vmatprep.mubr.msk.f32.mxu0 %vm15192_vm3, %v17189_v35  ;;  %14324 = vmatprep.subr.mxu0 %v17189_v35  ;;  %v4845_v15 = vand.u32 4294901760, %v4844_v6 }
 0x8ac   :  { %14290 = vmatpush3.msra.mxu1 %v15480_v11  ;;  %14315 = vmatmul.mubr.f32.vlgmr.msra.gmra.mxu0 %v4376_v63 }
 0x8ad   :  { %14325 = vmatpush3.msra.mxu0 %v15480_v11  ;;  %14291 = vmatprep.subr.mxu1 %v17189_v35 }
 0x8ae   :  { %14326 = vmatprep.subr.mxu0 %v17189_v35  ;;  %14292 = vmatpush3.msra.mxu1 %v15482_v12 }
 0x8af   :  { %14293 = vmatprep.mubr.msk.f32.mxu1 %vm15192_vm3, %v17189_v35  ;;  %14327 = vmatpush3.msra.mxu0 %v15482_v12 }
 0x8b0   :  { %14294 = vmatmul.mubr.f32.vlgmr.msra.gmra.mxu1 %v4378_v2  ;;  %14303 = vmatprep.subr.mxu1 %v17189_v35 }
 0x8b1   :  { %14328 = vmatprep.mubr.msk.f32.mxu0 %vm15192_vm3, %v17189_v35  ;;  %14338 = vmatprep.subr.mxu0 %v17189_v35 }
 0x8b2   :  { %14304 = vmatpush3.msra.mxu1 %v15485_v13  ;;  %14329 = vmatmul.mubr.f32.vlgmr.msra.gmra.mxu0 %v15836_v56 }
 0x8b3   :  { %14339 = vmatpush3.msra.mxu0 %v15514_v22  ;;  %14305 = vmatprep.subr.mxu1 %v17189_v35 }
 0x8b4   :  { %14340 = vmatprep.subr.mxu0 %v17189_v35  ;;  %14306 = vmatpush3.msra.mxu1 %v15490_v7 }
 0x8b5   :  { %14307 = vmatprep.mubr.msk.f32.mxu1 %vm15192_vm3, %v17189_v35  ;;  %14341 = vmatpush3.msra.mxu0 %v15518_v24 }
 0x8b6   :  { %14308 = vmatmul.mubr.f32.vlgmr.msra.gmra.mxu1 %v4375_v59  ;;  %14317 = vmatprep.subr.mxu1 %v17189_v35 }
 0x8b7   :  { %14342 = vmatprep.mubr.msk.f32.mxu0 %vm15192_vm3, %v17189_v35  ;;  %14352 = vmatprep.subr.mxu0 %v17189_v35 }
 0x8b8   :  { %14318 = vmatpush3.msra.mxu1 %v15495_v8  ;;  %14343 = vmatmul.mubr.f32.vlgmr.msra.gmra.mxu0 %v4841_v18 }
 0x8b9   :  { %14353 = vmatpush3.msra.mxu0 %v15480_v11  ;;  %14319 = vmatprep.subr.mxu1 %v17189_v35 }
 0x8ba   :  { %14354 = vmatprep.subr.mxu0 %v17189_v35  ;;  %14320 = vmatpush3.msra.mxu1 %v15500_v16 }
 0x8bb   :  { %14321 = vmatprep.mubr.msk.f32.mxu1 %vm15192_vm3, %v17189_v35  ;;  %14355 = vmatpush3.msra.mxu0 %v15482_v12 }
 0x8bc   :  { %14322 = vmatmul.mubr.f32.vlgmr.msra.gmra.mxu1 %v15836_v56  ;;  %14331 = vmatprep.subr.mxu1 %v17189_v35 }
 0x8bd   :  { %14356 = vmatprep.mubr.msk.f32.mxu0 %vm15192_vm3, %v17189_v35  ;;  %14366 = vmatprep.subr.mxu0 %v17189_v35 }
 0x8be   :  { %14332 = vmatpush3.msra.mxu1 %v15480_v11  ;;  %14357 = vmatmul.mubr.f32.vlgmr.msra.gmra.mxu0 %v4843_v5 }
 0x8bf   :  { %14367 = vmatpush3.msra.mxu0 %v15480_v11  ;;  %14333 = vmatprep.subr.mxu1 %v17189_v35 }
 0x8c0   :  { %14368 = vmatprep.subr.mxu0 %v17189_v35  ;;  %14334 = vmatpush3.msra.mxu1 %v15482_v12 }
 0x8c1   :  { %14335 = vmatprep.mubr.msk.f32.mxu1 %vm15192_vm3, %v17189_v35  ;;  %14369 = vmatpush3.msra.mxu0 %v15482_v12 }
 0x8c2   :  { %14336 = vmatmul.mubr.f32.vlgmr.msra.gmra.mxu1 %v4845_v15  ;;  %14345 = vmatprep.subr.mxu1 %v17189_v35 }
 0x8c3   :  { %14346 = vmatpush3.msra.mxu1 %v15485_v13  ;;  %14349 = vmatprep.mubr.msk.f32.mxu1 %vm15192_vm3, %v17189_v35 }
 0x8c4   :  { %14347 = vmatprep.subr.mxu1 %v17189_v35  ;;  %14370 = vmatprep.mubr.msk.f32.mxu0 %vm15192_vm3, %v17189_v35 }
 0x8c5   :  { %14348 = vmatpush3.msra.mxu1 %v15490_v7  ;;  %14371 = vmatmul.mubr.f32.vlgmr.msra.gmra.mxu0 %v4841_v18 }
 0x8c6   :  { %14350 = vmatmul.mubr.f32.vlgmr.msra.gmra.mxu1 %v4842_v4  ;;  %14359 = vmatprep.subr.mxu1 %v17189_v35 }
 0x8c7   :  { %14360 = vmatpush3.msra.mxu1 %v15495_v8  ;;  %14363 = vmatprep.mubr.msk.f32.mxu1 %vm15192_vm3, %v17189_v35 }
 0x8c8   :  { %14361 = vmatprep.subr.mxu1 %v17189_v35  ;;  %14384 = vmatprep.subr.mxu0 %v17189_v35 }
 0x8c9   :  { %14362 = vmatpush3.msra.mxu1 %v15500_v16  ;;  %14392 = vmatprep.mubr.msk.f32.mxu0 %vm15192_vm3, %v17189_v35 }
 0x8ca   :  { %14364 = vmatmul.mubr.f32.vlgmr.msra.gmra.mxu1 %v4841_v18  ;;  %14373 = vmatprep.subr.mxu1 %v17189_v35 }
 0x8cb   :  { %14381 = vmatprep.mubr.msk.f32.mxu1 %vm15192_vm3, %v17189_v35  ;;  %14374 = vmatpush3.msra.mxu1 %v15943_v40 }
 0x8cc   :  { %14375 = vmatprep.subr.mxu1 %v17189_v35  ;;  %14385 = vmatpush3.msra.mxu0 %v5351_v0 }
 0x8cd   :  { %14376 = vmatpush3.msra.mxu1 %v15948_v46  ;;  %14386 = vmatprep.subr.mxu0 %v17189_v35 }
 0x8ce   :  { %14377 = vmatprep.subr.mxu1 %v17189_v35  ;;  %14387 = vmatpush3.msra.mxu0 %v5358_v10 }
 0x8cf   :  { %14378 = vmatpush3.msra.mxu1 %v15956_v49  ;;  %14388 = vmatprep.subr.mxu0 %v17189_v35 }
 0x8d0   :  { %14379 = vmatprep.subr.mxu1 %v17189_v35  ;;  %14389 = vmatpush3.msra.mxu0 %v5365_v21 }
 0x8d1   :  { %14380 = vmatpush3.msra.mxu1 %v15967_v60  ;;  %14390 = vmatprep.subr.mxu0 %v17189_v35 }
 0x8d2   :  { %14395 = vmatprep.subr.mxu1 %v17189_v35  ;;  %14391 = vmatpush3.msra.mxu0 %v5372_v31 }
 0x8d3   :  { %14406 = vmatprep.subr.mxu0 %v17189_v35 }
 0x94e   :  { %v3984_v32 = vpop.f32.mrf.mxu0 }
 0x950   :  { %v14244_v33 = vpop.f32.mrf.mxu0 }
 0x956   :  { %v4141_v34 = vpop.f32.mrf.mxu0 }
 0x957   :  { %v3893_v36 = vpop.f32.mrf.mxu1 }
 0x958   :  { %v3985_v37 = vadd.f32 %v3984_v32, %v3893_v36  ;;  %v14266_v39 = vpop.f32.mrf.mxu0 }
 0x959   :  { %v14233_v23 = vpop.f32.mrf.mxu1 }
 0x95f   :  { %v4064_v25 = vpop.f32.mrf.mxu1 }
 0x960   :  { %v4065_v45 = vadd.f32 %v4064_v25, %v3985_v37  ;;  %v4299_v50 = vpop.f32.mrf.mxu0 }
 0x961   :  { %v14255_v51 = vpop.f32.mrf.mxu1 }
 0x962   :  { %v14288_v52 = vpop.f32.mrf.mxu0  ;;  %v4142_v53 = vadd.f32 %v4141_v34, %v4065_v45 }
 0x966   :  { %v4461_v26 = vpop.f32.mrf.mxu0 }
 0x968   :  { %v14302_v28 = vpop.f32.mrf.mxu0 }
 0x96a   :  { %v4224_v56 = vpop.f32.mrf.mxu1 }
 0x96b   :  { %v4225_v59 = vadd.f32 %v4224_v56, %v4142_v53 }
 0x96c   :  { %v14277_v63 = vpop.f32.mrf.mxu1  ;;  %v4612_v58 = vpop.f32.mrf.mxu0 }
 0x96d   :  { %v15991_v61 = vadd.f32 %v4299_v50, %v4225_v59  ;;  %v5728_v63 = vld [vmem:[#allocation5 + $0x8c0] sm:$0x3] }
 0x96e   :  { %v14316_v62 = vpop.f32.mrf.mxu0 }
 0x970   :  { %v4380_v2 = vpop.f32.mrf.mxu1 }
 0x971   :  { %v4462_v18 = vadd.f32 %v4461_v26, %v4380_v2 }
 0x972   :  { %v14295_v4 = vpop.f32.mrf.mxu1  ;;  %v4762_v5 = vpop.f32.mrf.mxu0 }
 0x974   :  { %v14330_v6 = vpop.f32.mrf.mxu0 }
 0x976   :  { %v4537_v15 = vpop.f32.mrf.mxu1 }
 0x977   :  { %v4538_v38 = vadd.f32 %v4537_v15, %v4462_v18 }
 0x978   :  { %v14309_v41 = vpop.f32.mrf.mxu1  ;;  %v4928_v42 = vpop.f32.mrf.mxu0 }
 0x979   :  { %v4613_v47 = vadd.f32 %v4612_v58, %v4538_v38  ;;  %v5730_v58 = vsel %vm1449_vm14, %v5728_v63, 0 }
 0x97a   :  { %v14344_v54 = vpop.f32.mrf.mxu0 }
 0x97c   :  { %v4689_v30 = vpop.f32.mrf.mxu1 }
 0x97d   :  { %v4690_v0 = vadd.f32 %v4689_v30, %v4613_v47 }
 0x97e   :  { %v14323_v1 = vpop.f32.mrf.mxu1  ;;  %v5079_v10 = vpop.f32.mrf.mxu0 }
 0x97f   :  { %v15993_v17 = vadd.f32 %v4762_v5, %v4690_v0 }
 0x980   :  { %v14358_v21 = vpop.f32.mrf.mxu0 }
 0x982   :  { %v4847_v27 = vpop.f32.mrf.mxu1 }
 0x983   :  { %v4929_v32 = vadd.f32 %v4928_v42, %v4847_v27 }
 0x984   :  { %v14337_v31 = vpop.f32.mrf.mxu1 }
 0x985   :  { %v5229_v33 = vpop.f32.mrf.mxu0 }
 0x986   :  { %v5004_v34 = vpop.f32.mrf.mxu1 }
 0x987   :  { %v5005_v36 = vadd.f32 %v5004_v34, %v4929_v32  ;;  %v14372_v37 = vpop.f32.mrf.mxu0 }
 0x988   :  { %v14351_v39 = vpop.f32.mrf.mxu1 }
 0x989   :  { %v5080_v23 = vadd.f32 %v5079_v10, %v5005_v36 }
 0x98a   :  { %v5156_v25 = vpop.f32.mrf.mxu1 }
 0x98b   :  { %v5157_v45 = vadd.f32 %v5156_v25, %v5080_v23 }
 0x98c   :  { %v14365_v50 = vpop.f32.mrf.mxu1 }
 0x98d   :  { %v5230_v51 = vadd.f32 %v5229_v33, %v5157_v45 }
 0x98f   :  { %v5238_v52 = vsel %vm233_vm4, %v5230_v51, 0 }
 0x990   :  { %v5312_v53 = vand.u32 4294901760, %v5238_v52 }
 0x992   :  { %v5313_v26 = vsub.f32 %v5238_v52, %v5312_v53  ;;  %14393 = vmatmul.mubr.f32.vlgmr.msra.gmra.mxu0 %v5312_v53 }
 0x993   :  { %14407 = vmatpush3.msra.mxu0 %v15943_v40  ;;  %14414 = vmatprep.mubr.msk.f32.mxu0 %vm15192_vm3, %v17189_v35 }
 0x994   :  { %14408 = vmatprep.subr.mxu0 %v17189_v35  ;;  %v5314_v28 = vand.u32 4294901760, %v5313_v26 }
 0x995   :  { %14409 = vmatpush3.msra.mxu0 %v15948_v46 }
 0x996   :  { %14410 = vmatprep.subr.mxu0 %v17189_v35  ;;  %v5315_v56 = vsub.f32 %v5313_v26, %v5314_v28 }
 0x997   :  { %14411 = vmatpush3.msra.mxu0 %v15956_v49 }
 0x998   :  { %14412 = vmatprep.subr.mxu0 %v17189_v35  ;;  %v5316_v59 = vand.u32 4294901760, %v5315_v56 }
 0x999   :  { %14413 = vmatpush3.msra.mxu0 %v15967_v60 }
 0x99a   :  { %14415 = vmatmul.mubr.f32.vlgmr.msra.gmra.mxu0 %v5314_v28  ;;  %14428 = vmatprep.subr.mxu0 %v17189_v35 }
 0x99b   :  { %14382 = vmatmul.mubr.f32.vlgmr.msra.gmra.mxu1 %v5316_v59  ;;  %14429 = vmatpush3.msra.mxu0 %v15943_v40  ;;  %v5799_v40 = vand.u32 4294901760, %v5730_v58 }
 0x99c   :  { %14396 = vmatpush3.msra.mxu1 %v15946_v43  ;;  %14430 = vmatprep.subr.mxu0 %v17189_v35 }
 0x99d   :  { %14397 = vmatprep.subr.mxu1 %v17189_v35  ;;  %14431 = vmatpush3.msra.mxu0 %v15948_v46  ;;  %v5800_v46 = vsub.f32 %v5730_v58, %v5799_v40 }
 0x99e   :  { %14398 = vmatpush3.msra.mxu1 %v15954_v29  ;;  %14432 = vmatprep.subr.mxu0 %v17189_v35 }
 0x99f   :  { %14399 = vmatprep.subr.mxu1 %v17189_v35  ;;  %14433 = vmatpush3.msra.mxu0 %v15956_v49  ;;  %v5801_v49 = vand.u32 4294901760, %v5800_v46 }
 0x9a0   :  { %14400 = vmatpush3.msra.mxu1 %v15965_v57  ;;  %14434 = vmatprep.subr.mxu0 %v17189_v35  ;;  %v6191_v57 = vld [vmem:[#allocation5 + $0x8d0] sm:$0xff] }
 0x9a1   :  { %14401 = vmatprep.subr.mxu1 %v17189_v35  ;;  %14403 = vmatprep.mubr.msk.f32.mxu1 %vm15192_vm3, %v17189_v35 }
 0x9a2   :  { %14402 = vmatpush3.msra.mxu1 %v15976_v9  ;;  %14435 = vmatpush3.msra.mxu0 %v15967_v60 }
 0x9a3   :  { %14436 = vmatprep.mubr.msk.f32.mxu0 %vm15192_vm3, %v17189_v35  ;;  %14404 = vmatmul.mubr.f32.vlgmr.msra.gmra.mxu1 %v5313_v26 }
 0x9a4   :  { %14417 = vmatprep.subr.mxu1 %v17189_v35  ;;  %14437 = vmatmul.mubr.f32.vlgmr.msra.gmra.mxu0 %v5312_v53 }
 0x9a5   :  { %14446 = vmatprep.subr.mxu0 %v17189_v35  ;;  %14418 = vmatpush3.msra.mxu1 %v5349_v48 }
 0x9a6   :  { %14447 = vmatpush3.msra.mxu0 %v15514_v22  ;;  %14419 = vmatprep.subr.mxu1 %v17189_v35  ;;  %v5802_v22 = vsub.f32 %v5800_v46, %v5801_v49 }
 0x9a7   :  { %14448 = vmatprep.subr.mxu0 %v17189_v35  ;;  %14420 = vmatpush3.msra.mxu1 %v5356_v55 }
 0x9a8   :  { %14449 = vmatpush3.msra.mxu0 %v15518_v24  ;;  %14421 = vmatprep.subr.mxu1 %v17189_v35  ;;  %v5803_v24 = vand.u32 4294901760, %v5802_v22 }
 0x9a9   :  { %14450 = vmatprep.mubr.msk.f32.mxu0 %vm15192_vm3, %v17189_v35  ;;  %14460 = vmatprep.subr.mxu0 %v17189_v35 }
 0x9aa   :  { %14422 = vmatpush3.msra.mxu1 %v5363_v20  ;;  %14451 = vmatmul.mubr.f32.vlgmr.msra.gmra.mxu0 %v5799_v40 }
 0x9ab   :  { %14461 = vmatpush3.msra.mxu0 %v15480_v11  ;;  %14423 = vmatprep.subr.mxu1 %v17189_v35 }
 0x9ac   :  { %14462 = vmatprep.subr.mxu0 %v17189_v35  ;;  %14424 = vmatpush3.msra.mxu1 %v5370_v19  ;;  %v16106_v19 = vand.u32 4294901760, %v6191_v57 }
 0x9ad   :  { %14425 = vmatprep.mubr.msk.f32.mxu1 %vm15192_vm3, %v17189_v35  ;;  %14463 = vmatpush3.msra.mxu0 %v15482_v12 }
 0x9ae   :  { %14426 = vmatmul.mubr.f32.vlgmr.msra.gmra.mxu1 %v5312_v53  ;;  %14439 = vmatprep.subr.mxu1 %v17189_v35  ;;  %v16115_v4 = vsub.f32 %v6191_v57, %v16106_v19 }
 0x9af   :  { %14464 = vmatprep.mubr.msk.f32.mxu0 %vm15192_vm3, %v17189_v35  ;;  %14474 = vmatprep.subr.mxu0 %v17189_v35 }
 0x9b0   :  { %14440 = vmatpush3.msra.mxu1 %v15480_v11  ;;  %14465 = vmatmul.mubr.f32.vlgmr.msra.gmra.mxu0 %v5801_v49  ;;  %v6328_v15 = vand.u32 4294901760, %v16115_v4 }
 0x9b1   :  { %14475 = vmatpush3.msra.mxu0 %v15480_v11  ;;  %14441 = vmatprep.subr.mxu1 %v17189_v35  ;;  %v6194_v11 = vld [vmem:[#allocation5 + $0x900] sm:$0xf] }
 0x9b2   :  { %14476 = vmatprep.subr.mxu0 %v17189_v35  ;;  %14442 = vmatpush3.msra.mxu1 %v15482_v12  ;;  %v6329_v41 = vsub.f32 %v16115_v4, %v6328_v15 }
 0x9b3   :  { %14443 = vmatprep.mubr.msk.f32.mxu1 %vm15192_vm3, %v17189_v35  ;;  %14477 = vmatpush3.msra.mxu0 %v15482_v12  ;;  %v6199_v12 = vsel %vm283_vm2, %v6194_v11, 0  ;;  %v1919_v11 = vld [vmem:[#allocation5 + $0x720] sm:$0xf] }
 0x9b4   :  { %14444 = vmatmul.mubr.f32.vlgmr.msra.gmra.mxu1 %v5803_v24  ;;  %14453 = vmatprep.subr.mxu1 %v17189_v35  ;;  %v6330_v42 = vand.u32 4294901760, %v6329_v41  ;;  %v1916_v41 = vld [vmem:[#allocation5 + $0x6f0] sm:$0xff] }
 0x9b5   :  { %14454 = vmatpush3.msra.mxu1 %v15485_v13  ;;  %14457 = vmatprep.mubr.msk.f32.mxu1 %vm15192_vm3, %v17189_v35  ;;  %v16082_v13 = vand.u32 4294901760, %v6199_v12 }
 0x9b6   :  { %14455 = vmatprep.subr.mxu1 %v17189_v35  ;;  %14478 = vmatprep.mubr.msk.f32.mxu0 %vm15192_vm3, %v17189_v35 }
 0x9b7   :  { %14456 = vmatpush3.msra.mxu1 %v15490_v7  ;;  %14479 = vmatmul.mubr.f32.vlgmr.msra.gmra.mxu0 %v5799_v40  ;;  %v6193_v7 = vld [vmem:[#allocation5 + $0x8f0] sm:$0xff] }
 0x9b8   :  { %14458 = vmatmul.mubr.f32.vlgmr.msra.gmra.mxu1 %v5800_v46  ;;  %14467 = vmatprep.subr.mxu1 %v17189_v35  ;;  %v16087_v43 = vand.u32 4294901760, %v6193_v7 }
 0x9b9   :  { %14468 = vmatpush3.msra.mxu1 %v15495_v8  ;;  %14471 = vmatprep.mubr.msk.f32.mxu1 %vm15192_vm3, %v17189_v35  ;;  %v16085_v8 = vsub.f32 %v6199_v12, %v16082_v13 }
 0x9ba   :  { %14469 = vmatprep.subr.mxu1 %v17189_v35  ;;  %14492 = vmatprep.subr.mxu0 %v17189_v35  ;;  %v16093_v29 = vsub.f32 %v6193_v7, %v16087_v43 }
 0x9bb   :  { %14470 = vmatpush3.msra.mxu1 %v15500_v16  ;;  %14500 = vmatprep.mubr.msk.f32.mxu0 %vm15192_vm3, %v17189_v35  ;;  %v6192_v16 = vld [vmem:[#allocation5 + $0x8e0] sm:$0xff]  ;;  %v6307_v48 = vand.u32 4294901760, %v16085_v8 }
 0x9bc   :  { %14472 = vmatmul.mubr.f32.vlgmr.msra.gmra.mxu1 %v5799_v40  ;;  %14481 = vmatprep.subr.mxu1 %v17189_v35  ;;  %v16095_v55 = vand.u32 4294901760, %v6192_v16  ;;  %v6314_v20 = vand.u32 4294901760, %v16093_v29 }
 0x9bd   :  { %14489 = vmatprep.mubr.msk.f32.mxu1 %vm15192_vm3, %v17189_v35  ;;  %14482 = vmatpush3.msra.mxu1 %v16082_v13  ;;  %v6308_v60 = vsub.f32 %v16085_v8, %v6307_v48 }
 0x9be   :  { %14483 = vmatprep.subr.mxu1 %v17189_v35  ;;  %v16104_v9 = vsub.f32 %v6192_v16, %v16095_v55  ;;  %v6315_v2 = vsub.f32 %v16093_v29, %v6314_v20  ;;  %v6690_v16 = vsel %vm283_vm2, %v1919_v11, 0 }
 0x9bf   :  { %14484 = vmatpush3.msra.mxu1 %v16087_v43  ;;  %v6309_v62 = vand.u32 4294901760, %v6308_v60  ;;  %v1918_v60 = vld [vmem:[#allocation5 + $0x710] sm:$0xff] }
 0x9c0   :  { %14485 = vmatprep.subr.mxu1 %v17189_v35  ;;  %v6321_v18 = vand.u32 4294901760, %v16104_v9  ;;  %v6316_v5 = vand.u32 4294901760, %v6315_v2  ;;  %v16138_v2 = vand.u32 4294901760, %v6690_v16 }
 0x9c1   :  { %14486 = vmatpush3.msra.mxu1 %v16095_v55  ;;  %14493 = vmatpush3.msra.mxu0 %v6309_v62 }
 0x9c2   :  { %14487 = vmatprep.subr.mxu1 %v17189_v35  ;;  %v6322_v6 = vsub.f32 %v16104_v9, %v6321_v18  ;;  %14494 = vmatprep.subr.mxu0 %v17189_v35 }
 0x9c3   :  { %14488 = vmatpush3.msra.mxu1 %v16106_v19  ;;  %14495 = vmatpush3.msra.mxu0 %v6316_v5  ;;  %v1917_v5 = vld [vmem:[#allocation5 + $0x700] sm:$0xff] }
 0x9c4   :  { %14503 = vmatprep.subr.mxu1 %v17189_v35  ;;  %v6323_v38 = vand.u32 4294901760, %v6322_v6  ;;  %14496 = vmatprep.subr.mxu0 %v17189_v35 }
 0x9c6   :  { %14497 = vmatpush3.msra.mxu0 %v6323_v38  ;;  %v16144_v38 = vand.u32 4294901760, %v1918_v60 }
 0x9c7   :  { %14498 = vmatprep.subr.mxu0 %v17189_v35 }
 0x9c8   :  { %14499 = vmatpush3.msra.mxu0 %v6330_v42 }
 0x9c9   :  { %14514 = vmatprep.subr.mxu0 %v17189_v35 }
 0xa52   :  { %v5409_v47 = vpop.f32.mrf.mxu0 }
 0xa54   :  { %v14394_v54 = vpop.f32.mrf.mxu0 }
 0xa55   :  { %v16151_v54 = vand.u32 4294901760, %v1917_v5 }
 0xa5a   :  { %v5566_v30 = vpop.f32.mrf.mxu0 }
 0xa5b   :  { %v5318_v0 = vpop.f32.mrf.mxu1 }
 0xa5c   :  { %v5410_v1 = vadd.f32 %v5409_v47, %v5318_v0  ;;  %v14416_v10 = vpop.f32.mrf.mxu0  ;;  %v16149_v47 = vsub.f32 %v6690_v16, %v16138_v2  ;;  %v16156_v0 = vsub.f32 %v1918_v60, %v16144_v38 }
 0xa5d   :  { %v14383_v21 = vpop.f32.mrf.mxu1 }
 0xa5e   :  { %v6798_v10 = vand.u32 4294901760, %v16149_v47  ;;  %v16164_v21 = vsub.f32 %v1917_v5, %v16151_v54 }
 0xa63   :  { %v5489_v27 = vpop.f32.mrf.mxu1 }
 0xa64   :  { %v5490_v31 = vadd.f32 %v5489_v27, %v5410_v1  ;;  %v5724_v32 = vpop.f32.mrf.mxu0  ;;  %v16158_v1 = vand.u32 4294901760, %v1916_v41  ;;  %v6805_v27 = vand.u32 4294901760, %v16156_v0 }
 0xa65   :  { %v14405_v33 = vpop.f32.mrf.mxu1 }
 0xa66   :  { %v14438_v34 = vpop.f32.mrf.mxu0  ;;  %v5567_v36 = vadd.f32 %v5566_v30, %v5490_v31  ;;  %v16171_v31 = vsub.f32 %v1916_v41, %v16158_v1 }
 0xa67   :  { %v6687_v34 = vsel %vm233_vm4, %v15629_v14, 0 }
 0xa68   :  { %v6819_v33 = vand.u32 4294901760, %v16171_v31 }
 0xa6a   :  { %v5886_v37 = vpop.f32.mrf.mxu0  ;;  %v6820_v14 = vsub.f32 %v16171_v31, %v6819_v33 }
 0xa6c   :  { %v14452_v39 = vpop.f32.mrf.mxu0 }
 0xa6d   :  { %v16206_v39 = vand.u32 4294901760, %v6687_v34 }
 0xa6e   :  { %v5649_v23 = vpop.f32.mrf.mxu1 }
 0xa6f   :  { %v5650_v25 = vadd.f32 %v5649_v23, %v5567_v36  ;;  %v6821_v23 = vand.u32 4294901760, %v6820_v14 }
 0xa70   :  { %v14427_v45 = vpop.f32.mrf.mxu1  ;;  %v6037_v50 = vpop.f32.mrf.mxu0 }
 0xa71   :  { %v16130_v51 = vadd.f32 %v5724_v32, %v5650_v25  ;;  %v6812_v32 = vand.u32 4294901760, %v16164_v21  ;;  %v16217_v25 = vsub.f32 %v6687_v34, %v16206_v39  ;;  %v3341_v45 = vld [vmem:[#allocation5 + $0x790] sm:$0xff] }
 0xa72   :  { %v14466_v52 = vpop.f32.mrf.mxu0 }
 0xa73   :  { %v6813_v36 = vsub.f32 %v16164_v21, %v6812_v32 }
 0xa74   :  { %v5805_v53 = vpop.f32.mrf.mxu1 }
 0xa75   :  { %v5887_v28 = vadd.f32 %v5886_v37, %v5805_v53 }
 0xa76   :  { %v14445_v26 = vpop.f32.mrf.mxu1 }
 0xa77   :  { %v6187_v56 = vpop.f32.mrf.mxu0 }
 0xa78   :  { %v5962_v59 = vpop.f32.mrf.mxu1 }
 0xa79   :  { %v5963_v63 = vadd.f32 %v5962_v59, %v5887_v28  ;;  %v14480_v58 = vpop.f32.mrf.mxu0  ;;  %v16265_v28 = vand.u32 4294901760, %v3341_v45 }
 0xa7a   :  { %v14459_v40 = vpop.f32.mrf.mxu1 }
 0xa7b   :  { %v6038_v46 = vadd.f32 %v6037_v50, %v5963_v63  ;;  %v16280_v58 = vsub.f32 %v3341_v45, %v16265_v28 }
 0xa7c   :  { %v6114_v49 = vpop.f32.mrf.mxu1 }
 0xa7d   :  { %v6115_v22 = vadd.f32 %v6114_v49, %v6038_v46 }
 0xa7e   :  { %v14473_v24 = vpop.f32.mrf.mxu1 }
 0xa7f   :  { %v6188_v12 = vadd.f32 %v6187_v56, %v6115_v22  ;;  %v7310_v22 = vand.u32 4294901760, %v16280_v58  ;;  %v7178_v24 = vsel %vm233_vm4, %v15811_v3, 0 }
 0xa80   :  { %v16316_v16 = vand.u32 4294901760, %v7178_v24 }
 0xa81   :  { %v6196_v7 = vsel %vm233_vm4, %v6188_v12, 0 }
 0xa82   :  { %v16134_v57 = vand.u32 4294901760, %v6196_v7 }
 0xa84   :  { %v6271_v62 = vsub.f32 %v6196_v7, %v16134_v57  ;;  %14501 = vmatmul.mubr.f32.vlgmr.msra.gmra.mxu0 %v16134_v57  ;;  %v7311_v7 = vsub.f32 %v16280_v58, %v7310_v22 }
 0xa85   :  { %14515 = vmatpush3.msra.mxu0 %v16082_v13  ;;  %14522 = vmatprep.mubr.msk.f32.mxu0 %vm15192_vm3, %v17189_v35 }
 0xa86   :  { %14516 = vmatprep.subr.mxu0 %v17189_v35  ;;  %v6272_v6 = vand.u32 4294901760, %v6271_v62  ;;  %v7312_v60 = vand.u32 4294901760, %v7311_v7 }
 0xa87   :  { %14517 = vmatpush3.msra.mxu0 %v16087_v43 }
 0xa88   :  { %14518 = vmatprep.subr.mxu0 %v17189_v35  ;;  %v6273_v42 = vsub.f32 %v6271_v62, %v6272_v6 }
 0xa89   :  { %14519 = vmatpush3.msra.mxu0 %v16095_v55 }
 0xa8a   :  { %14520 = vmatprep.subr.mxu0 %v17189_v35  ;;  %v6274_v30 = vand.u32 4294901760, %v6273_v42 }
 0xa8b   :  { %14521 = vmatpush3.msra.mxu0 %v16106_v19 }
 0xa8c   :  { %14523 = vmatmul.mubr.f32.vlgmr.msra.gmra.mxu0 %v6272_v6  ;;  %14536 = vmatprep.subr.mxu0 %v17189_v35 }
 0xa8d   :  { %14490 = vmatmul.mubr.f32.vlgmr.msra.gmra.mxu1 %v6274_v30  ;;  %14537 = vmatpush3.msra.mxu0 %v16082_v13  ;;  %v6799_v13 = vsub.f32 %v16149_v47, %v6798_v10  ;;  %v4766_v30 = vld [vmem:[#allocation5 + $0x830] sm:$0xff] }
 0xa8e   :  { %14504 = vmatpush3.msra.mxu1 %v16085_v8  ;;  %14538 = vmatprep.subr.mxu0 %v17189_v35  ;;  %v3344_v8 = vld [vmem:[#allocation5 + $0x7c0] sm:$0xf] }
 0xa8f   :  { %14505 = vmatprep.subr.mxu1 %v17189_v35  ;;  %14539 = vmatpush3.msra.mxu0 %v16087_v43  ;;  %v6806_v43 = vsub.f32 %v16156_v0, %v6805_v27 }
 0xa90   :  { %14506 = vmatpush3.msra.mxu1 %v16093_v29  ;;  %14540 = vmatprep.subr.mxu0 %v17189_v35  ;;  %v7181_v29 = vsel %vm283_vm2, %v3344_v8, 0 }
 0xa91   :  { %14507 = vmatprep.subr.mxu1 %v17189_v35  ;;  %14541 = vmatpush3.msra.mxu0 %v16095_v55  ;;  %v6800_v55 = vand.u32 4294901760, %v6799_v13  ;;  %v6807_v37 = vand.u32 4294901760, %v6806_v43 }
 0xa92   :  { %14508 = vmatpush3.msra.mxu1 %v16104_v9  ;;  %14542 = vmatprep.subr.mxu0 %v17189_v35  ;;  %v16239_v9 = vand.u32 4294901760, %v7181_v29 }
 0xa93   :  { %14509 = vmatprep.subr.mxu1 %v17189_v35  ;;  %14511 = vmatprep.mubr.msk.f32.mxu1 %vm15192_vm3, %v17189_v35 }
 0xa94   :  { %14510 = vmatpush3.msra.mxu1 %v16115_v4  ;;  %14543 = vmatpush3.msra.mxu0 %v16106_v19  ;;  %v6814_v19 = vand.u32 4294901760, %v6813_v36  ;;  %v3342_v4 = vld [vmem:[#allocation5 + $0x7a0] sm:$0xff]  ;;  %v16253_v50 = vsub.f32 %v7181_v29, %v16239_v9 }
 0xa95   :  { %14544 = vmatprep.mubr.msk.f32.mxu0 %vm15192_vm3, %v17189_v35  ;;  %14512 = vmatmul.mubr.f32.vlgmr.msra.gmra.mxu1 %v6271_v62  ;;  %v16255_v52 = vand.u32 4294901760, %v3342_v4  ;;  %v16327_v62 = vsub.f32 %v7178_v24, %v16316_v16 }
 0xa96   :  { %14525 = vmatprep.subr.mxu1 %v17189_v35  ;;  %14545 = vmatmul.mubr.f32.vlgmr.msra.gmra.mxu0 %v16134_v57  ;;  %v7289_v56 = vand.u32 4294901760, %v16253_v50 }
 0xa97   :  { %14558 = vmatprep.subr.mxu0 %v17189_v35  ;;  %14526 = vmatpush3.msra.mxu1 %v6307_v48  ;;  %v6763_v48 = vand.u32 4294901760, %v16217_v25  ;;  %v16272_v59 = vsub.f32 %v3342_v4, %v16255_v52  ;;  %v7254_v5 = vand.u32 4294901760, %v16327_v62 }
 0xa98   :  { %14559 = vmatpush3.msra.mxu0 %v6800_v55  ;;  %14527 = vmatprep.subr.mxu1 %v17189_v35  ;;  %v7290_v40 = vsub.f32 %v16253_v50, %v7289_v56 }
 0xa99   :  { %14560 = vmatprep.subr.mxu0 %v17189_v35  ;;  %14528 = vmatpush3.msra.mxu1 %v6314_v20  ;;  %v3343_v20 = vld [vmem:[#allocation5 + $0x7b0] sm:$0xff]  ;;  %v7303_v46 = vand.u32 4294901760, %v16272_v59  ;;  %v7255_v42 = vsub.f32 %v16327_v62, %v7254_v5 }
 0xa9a   :  { %14561 = vmatpush3.msra.mxu0 %v6807_v37  ;;  %14529 = vmatprep.subr.mxu1 %v17189_v35  ;;  %v7291_v11 = vand.u32 4294901760, %v7290_v40  ;;  %v7669_v37 = vsel %vm233_vm4, %v15993_v17, 0 }
 0xa9b   :  { %14562 = vmatprep.subr.mxu0 %v17189_v35  ;;  %14530 = vmatpush3.msra.mxu1 %v6321_v18  ;;  %v6764_v18 = vsub.f32 %v16217_v25, %v6763_v48  ;;  %v7304_v12 = vsub.f32 %v16272_v59, %v7303_v46 }
 0xa9c   :  { %14563 = vmatpush3.msra.mxu0 %v6814_v19  ;;  %14531 = vmatprep.subr.mxu1 %v17189_v35 }
 0xa9d   :  { %14564 = vmatprep.subr.mxu0 %v17189_v35  ;;  %14532 = vmatpush3.msra.mxu1 %v6328_v15  ;;  %v16246_v15 = vand.u32 4294901760, %v3343_v20  ;;  %v6765_v53 = vand.u32 4294901760, %v6764_v18  ;;  %v8177_v18 = vld [vmem:[#allocation5 + $0x988] sm:$0x3] }
 0xa9e   :  { %14533 = vmatprep.mubr.msk.f32.mxu1 %vm15192_vm3, %v17189_v35  ;;  %14565 = vmatpush3.msra.mxu0 %v6821_v23  ;;  %v16426_v23 = vand.u32 4294901760, %v7669_v37  ;;  %v8186_v4 = vsel %vm930_vm11, %v8177_v18, 0 }
 0xa9f   :  { %14566 = vmatprep.mubr.msk.f32.mxu0 %vm15192_vm3, %v17189_v35  ;;  %14534 = vmatmul.mubr.f32.vlgmr.msra.gmra.mxu1 %v16134_v57  ;;  %v16263_v26 = vsub.f32 %v3343_v20, %v16246_v15  ;;  %v7305_v57 = vand.u32 4294901760, %v7304_v12  ;;  %v16509_v45 = vand.u32 4294901760, %v8186_v4 }
 0xaa0   :  { %14547 = vmatprep.subr.mxu1 %v17189_v35  ;;  %14567 = vmatmul.mubr.f32.vlgmr.msra.gmra.mxu0 %v16206_v39 }
 0xaa1   :  { %14580 = vmatprep.subr.mxu0 %v17189_v35  ;;  %14548 = vmatpush3.msra.mxu1 %v16138_v2  ;;  %v7296_v63 = vand.u32 4294901760, %v16263_v26 }
 0xaa2   :  { %14581 = vmatpush3.msra.mxu0 %v16138_v2  ;;  %14549 = vmatprep.subr.mxu1 %v17189_v35 }
 0xaa3   :  { %14582 = vmatprep.subr.mxu0 %v17189_v35  ;;  %14550 = vmatpush3.msra.mxu1 %v16144_v38  ;;  %v7297_v49 = vsub.f32 %v16263_v26, %v7296_v63 }
 0xaa4   :  { %14583 = vmatpush3.msra.mxu0 %v16144_v38  ;;  %14551 = vmatprep.subr.mxu1 %v17189_v35 }
 0xaa5   :  { %14584 = vmatprep.subr.mxu0 %v17189_v35  ;;  %14552 = vmatpush3.msra.mxu1 %v16151_v54  ;;  %v7298_v3 = vand.u32 4294901760, %v7297_v49 }
 0xaa6   :  { %14585 = vmatpush3.msra.mxu0 %v16151_v54  ;;  %14553 = vmatprep.subr.mxu1 %v17189_v35 }
 0xaa7   :  { %14586 = vmatprep.subr.mxu0 %v17189_v35  ;;  %14554 = vmatpush3.msra.mxu1 %v16158_v1 }
 0xaa8   :  { %14555 = vmatprep.mubr.msk.f32.mxu1 %vm15192_vm3, %v17189_v35  ;;  %14587 = vmatpush3.msra.mxu0 %v16158_v1 }
 0xaa9   :  { %14588 = vmatprep.mubr.msk.f32.mxu0 %vm15192_vm3, %v17189_v35  ;;  %14556 = vmatmul.mubr.f32.vlgmr.msra.gmra.mxu1 %v6765_v53  ;;  %v8175_v53 = vld [vmem:[#allocation5 + $0x978] sm:$0xff] }
 0xaaa   :  { %14569 = vmatprep.subr.mxu1 %v17189_v35  ;;  %14589 = vmatmul.mubr.f32.vlgmr.msra.gmra.mxu0 %v6763_v48  ;;  %v7744_v48 = vsub.f32 %v7669_v37, %v16426_v23 }
 0xaab   :  { %14602 = vmatprep.subr.mxu0 %v17189_v35  ;;  %14570 = vmatpush3.msra.mxu1 %v16149_v47  ;;  %v4767_v47 = vld [vmem:[#allocation5 + $0x840] sm:$0xff] }
 0xaac   :  { %14603 = vmatpush3.msra.mxu0 %v16138_v2  ;;  %14571 = vmatprep.subr.mxu1 %v17189_v35  ;;  %v4769_v2 = vld [vmem:[#allocation5 + $0x860] sm:$0xf]  ;;  %v7745_v29 = vand.u32 4294901760, %v7744_v48 }
 0xaad   :  { %14604 = vmatprep.subr.mxu0 %v17189_v35  ;;  %14572 = vmatpush3.msra.mxu1 %v16156_v0  ;;  %v7672_v6 = vsel %vm283_vm2, %v4769_v2, 0 }
 0xaae   :  { %14605 = vmatpush3.msra.mxu0 %v16144_v38  ;;  %14573 = vmatprep.subr.mxu1 %v17189_v35  ;;  %v4768_v38 = vld [vmem:[#allocation5 + $0x850] sm:$0xff]  ;;  %v16349_v41 = vand.u32 4294901760, %v7672_v6  ;;  %v7746_v20 = vsub.f32 %v7744_v48, %v7745_v29 }
 0xaaf   :  { %14606 = vmatprep.subr.mxu0 %v17189_v35  ;;  %14574 = vmatpush3.msra.mxu1 %v16164_v21 }
 0xab0   :  { %14607 = vmatpush3.msra.mxu0 %v16151_v54  ;;  %14575 = vmatprep.subr.mxu1 %v17189_v35  ;;  %v16356_v54 = vand.u32 4294901760, %v4768_v38  ;;  %v16363_v0 = vsub.f32 %v7672_v6, %v16349_v41 }
 0xab1   :  { %14608 = vmatprep.subr.mxu0 %v17189_v35  ;;  %14576 = vmatpush3.msra.mxu1 %v16171_v31 }
 0xab2   :  { %14577 = vmatprep.mubr.msk.f32.mxu1 %vm15192_vm3, %v17189_v35  ;;  %14609 = vmatpush3.msra.mxu0 %v16158_v1  ;;  %v16365_v1 = vand.u32 4294901760, %v4767_v47  ;;  %v16373_v21 = vsub.f32 %v4768_v38, %v16356_v54  ;;  %v7780_v31 = vand.u32 4294901760, %v16363_v0 }
 0xab3   :  { %14610 = vmatprep.mubr.msk.f32.mxu0 %vm15192_vm3, %v17189_v35  ;;  %14578 = vmatmul.mubr.f32.vlgmr.msra.gmra.mxu1 %v16217_v25 }
 0xab4   :  { %14591 = vmatprep.subr.mxu1 %v17189_v35  ;;  %14611 = vmatmul.mubr.f32.vlgmr.msra.gmra.mxu0 %v16206_v39  ;;  %v16382_v13 = vsub.f32 %v4767_v47, %v16365_v1 }
 0xab5   :  { %14624 = vmatprep.subr.mxu0 %v17189_v35  ;;  %14592 = vmatpush3.msra.mxu1 %v6798_v10  ;;  %v7256_v10 = vand.u32 4294901760, %v7255_v42 }
 0xab6   :  { %14625 = vmatpush3.msra.mxu0 %v7291_v11  ;;  %14593 = vmatprep.subr.mxu1 %v17189_v35  ;;  %v7794_v34 = vand.u32 4294901760, %v16382_v13 }
 0xab7   :  { %14626 = vmatprep.subr.mxu0 %v17189_v35  ;;  %14594 = vmatpush3.msra.mxu1 %v6805_v27  ;;  %v16375_v27 = vand.u32 4294901760, %v4766_v30 }
 0xab8   :  { %14627 = vmatpush3.msra.mxu0 %v7298_v3  ;;  %14595 = vmatprep.subr.mxu1 %v17189_v35  ;;  %v8171_v3 = vld [vmem:[#allocation5 + $0x958] sm:$0xff] }
 0xab9   :  { %14628 = vmatprep.subr.mxu0 %v17189_v35  ;;  %14596 = vmatpush3.msra.mxu1 %v6812_v32  ;;  %v7787_v32 = vand.u32 4294901760, %v16373_v21  ;;  %v16390_v43 = vsub.f32 %v4766_v30, %v16375_v27 }
 0xaba   :  { %14629 = vmatpush3.msra.mxu0 %v7305_v57  ;;  %14597 = vmatprep.subr.mxu1 %v17189_v35 }
 0xabb   :  { %14630 = vmatprep.subr.mxu0 %v17189_v35  ;;  %14598 = vmatpush3.msra.mxu1 %v6819_v33  ;;  %v7781_v33 = vsub.f32 %v16363_v0, %v7780_v31  ;;  %v7788_v55 = vsub.f32 %v16373_v21, %v7787_v32  ;;  %v7801_v36 = vand.u32 4294901760, %v16390_v43 }
 0xabc   :  { %14599 = vmatprep.mubr.msk.f32.mxu1 %vm15192_vm3, %v17189_v35  ;;  %14631 = vmatpush3.msra.mxu0 %v7312_v60  ;;  %v16547_v60 = vand.u32 4294901760, %v8171_v3 }
 0xabd   :  { %14632 = vmatprep.mubr.msk.f32.mxu0 %vm15192_vm3, %v17189_v35  ;;  %14600 = vmatmul.mubr.f32.vlgmr.msra.gmra.mxu1 %v16206_v39  ;;  %v7782_v14 = vand.u32 4294901760, %v7781_v33  ;;  %v7795_v39 = vsub.f32 %v16382_v13, %v7794_v34  ;;  %v7789_v17 = vand.u32 4294901760, %v7788_v55  ;;  %v7802_v19 = vsub.f32 %v16390_v43, %v7801_v36 }
 0xabe   :  { %14613 = vmatprep.subr.mxu1 %v17189_v35  ;;  %14633 = vmatmul.mubr.f32.vlgmr.msra.gmra.mxu0 %v16316_v16  ;;  %v16565_v30 = vsub.f32 %v8171_v3, %v16547_v60 }
 0xabf   :  { %14646 = vmatprep.subr.mxu0 %v17189_v35  ;;  %14614 = vmatpush3.msra.mxu1 %v16239_v9  ;;  %v7796_v25 = vand.u32 4294901760, %v7795_v39  ;;  %v7803_v8 = vand.u32 4294901760, %v7802_v19  ;;  %v8165_v39 = vld [vmem:[#allocation5 + $0x928] sm:$0xff] }
 0xac0   :  { %14647 = vmatpush3.msra.mxu0 %v16239_v9  ;;  %14615 = vmatprep.subr.mxu1 %v17189_v35 }
 0xac1   :  { %14648 = vmatprep.subr.mxu0 %v17189_v35  ;;  %14616 = vmatpush3.msra.mxu1 %v16246_v15 }
 0xac2   :  { %14649 = vmatpush3.msra.mxu0 %v16246_v15  ;;  %14617 = vmatprep.subr.mxu1 %v17189_v35 }
 0xac3   :  { %14650 = vmatprep.subr.mxu0 %v17189_v35  ;;  %14618 = vmatpush3.msra.mxu1 %v16255_v52 }
 0xac4   :  { %14651 = vmatpush3.msra.mxu0 %v16255_v52  ;;  %14619 = vmatprep.subr.mxu1 %v17189_v35 }
 0xac5   :  { %14652 = vmatprep.subr.mxu0 %v17189_v35  ;;  %14620 = vmatpush3.msra.mxu1 %v16265_v28 }
 0xac6   :  { %14621 = vmatprep.mubr.msk.f32.mxu1 %vm15192_vm3, %v17189_v35  ;;  %14653 = vmatpush3.msra.mxu0 %v16265_v28 }
 0xac7   :  { %14654 = vmatprep.mubr.msk.f32.mxu0 %vm15192_vm3, %v17189_v35  ;;  %14622 = vmatmul.mubr.f32.vlgmr.msra.gmra.mxu1 %v7256_v10 }
 0xac8   :  { %14635 = vmatprep.subr.mxu1 %v17189_v35  ;;  %14655 = vmatmul.mubr.f32.vlgmr.msra.gmra.mxu0 %v7254_v5 }
 0xac9   :  { %14668 = vmatprep.subr.mxu0 %v17189_v35  ;;  %14636 = vmatpush3.msra.mxu1 %v16253_v50 }
 0xaca   :  { %14669 = vmatpush3.msra.mxu0 %v16239_v9  ;;  %14637 = vmatprep.subr.mxu1 %v17189_v35  ;;  %v7747_v9 = vand.u32 4294901760, %v7746_v20 }
 0xacb   :  { %14670 = vmatprep.subr.mxu0 %v17189_v35  ;;  %14638 = vmatpush3.msra.mxu1 %v16263_v26  ;;  %v16515_v26 = vsub.f32 %v8186_v4, %v16509_v45 }
 0xacc   :  { %14671 = vmatpush3.msra.mxu0 %v16246_v15  ;;  %14639 = vmatprep.subr.mxu1 %v17189_v35  ;;  %v8176_v15 = vld [vmem:[#allocation5 + $0x980] sm:$0x3] }
 0xacd   :  { %14672 = vmatprep.subr.mxu0 %v17189_v35  ;;  %14640 = vmatpush3.msra.mxu1 %v16272_v59  ;;  %v8183_v50 = vsel %vm930_vm11, %v8176_v15, 0  ;;  %v8298_v40 = vand.u32 4294901760, %v16515_v26 }
 0xace   :  { %14673 = vmatpush3.msra.mxu0 %v16255_v52  ;;  %14641 = vmatprep.subr.mxu1 %v17189_v35  ;;  %v16512_v52 = vand.u32 4294901760, %v8183_v50 }
 0xacf   :  { %14674 = vmatprep.subr.mxu0 %v17189_v35  ;;  %14642 = vmatpush3.msra.mxu1 %v16280_v58  ;;  %v8173_v58 = vld [vmem:[#allocation5 + $0x968] sm:$0xff]  ;;  %v8299_v7 = vsub.f32 %v16515_v26, %v8298_v40 }
 0xad0   :  { %14643 = vmatprep.mubr.msk.f32.mxu1 %vm15192_vm3, %v17189_v35  ;;  %14675 = vmatpush3.msra.mxu0 %v16265_v28  ;;  %v16517_v28 = vand.u32 4294901760, %v8175_v53  ;;  %v16521_v59 = vsub.f32 %v8183_v50, %v16512_v52  ;;  %v16530_v49 = vand.u32 4294901760, %v8173_v58  ;;  %v16610_v50 = vand.u32 4294901760, %v8165_v39 }
 0xad1   :  { %14676 = vmatprep.mubr.msk.f32.mxu0 %vm15192_vm3, %v17189_v35  ;;  %14644 = vmatmul.mubr.f32.vlgmr.msra.gmra.mxu1 %v16327_v62  ;;  %v8170_v62 = vld [vmem:[#allocation5 + $0x950] sm:$0xff]  ;;  %v8300_v42 = vand.u32 4294901760, %v8299_v7 }
 0xad2   :  { %14657 = vmatprep.subr.mxu1 %v17189_v35  ;;  %14677 = vmatmul.mubr.f32.vlgmr.msra.gmra.mxu0 %v16316_v16  ;;  %v8304_v24 = vand.u32 4294901760, %v16521_v59  ;;  %v16545_v57 = vsub.f32 %v8173_v58, %v16530_v49  ;;  %v16557_v38 = vand.u32 4294901760, %v8170_v62 }
 0xad3   :  { %14690 = vmatprep.subr.mxu0 %v17189_v35  ;;  %14658 = vmatpush3.msra.mxu1 %v7289_v56  ;;  %v8174_v56 = vld [vmem:[#allocation5 + $0x970] sm:$0xff] }
 0xad4   :  { %14691 = vmatpush3.msra.mxu0 %v7782_v14  ;;  %14659 = vmatprep.subr.mxu1 %v17189_v35  ;;  %v8305_v2 = vsub.f32 %v16521_v59, %v8304_v24 }
 0xad5   :  { %14692 = vmatprep.subr.mxu0 %v17189_v35  ;;  %14660 = vmatpush3.msra.mxu1 %v7296_v63  ;;  %v16523_v63 = vand.u32 4294901760, %v8174_v56 }
 0xad6   :  { %14693 = vmatpush3.msra.mxu0 %v7789_v17  ;;  %14661 = vmatprep.subr.mxu1 %v17189_v35 }
 0xad7   :  { %14694 = vmatprep.subr.mxu0 %v17189_v35  ;;  %14662 = vmatpush3.msra.mxu1 %v7303_v46  ;;  %v16528_v46 = vsub.f32 %v8175_v53, %v16517_v28  ;;  %v16535_v11 = vsub.f32 %v8174_v56, %v16523_v63 }
 0xad8   :  { %14695 = vmatpush3.msra.mxu0 %v7796_v25  ;;  %14663 = vmatprep.subr.mxu1 %v17189_v35 }
 0xad9   :  { %14696 = vmatprep.subr.mxu0 %v17189_v35  ;;  %14664 = vmatpush3.msra.mxu1 %v7310_v22  ;;  %v8172_v22 = vld [vmem:[#allocation5 + $0x960] sm:$0xff]  ;;  %v8316_v5 = vand.u32 4294901760, %v16535_v11 }
 0xada   :  { %14665 = vmatprep.mubr.msk.f32.mxu1 %vm15192_vm3, %v17189_v35  ;;  %14697 = vmatpush3.msra.mxu0 %v7803_v8  ;;  %v16537_v12 = vand.u32 4294901760, %v8172_v22  ;;  %v8164_v8 = vld [vmem:[#allocation5 + $0x920] sm:$0xff] }
 0xadb   :  { %14698 = vmatprep.mubr.msk.f32.mxu0 %vm15192_vm3, %v17189_v35  ;;  %14666 = vmatmul.mubr.f32.vlgmr.msra.gmra.mxu1 %v16316_v16  ;;  %v8310_v16 = vand.u32 4294901760, %v16528_v46  ;;  %v8317_v10 = vsub.f32 %v16535_v11, %v8316_v5 }
 0xadc   :  { %14679 = vmatprep.subr.mxu1 %v17189_v35  ;;  %14699 = vmatmul.mubr.f32.vlgmr.msra.gmra.mxu0 %v16426_v23  ;;  %v16555_v6 = vsub.f32 %v8172_v22, %v16537_v12  ;;  %v16617_v22 = vand.u32 4294901760, %v8164_v8 }
 0xadd   :  { %14712 = vmatprep.subr.mxu0 %v17189_v35  ;;  %14680 = vmatpush3.msra.mxu1 %v16349_v41  ;;  %v8311_v47 = vsub.f32 %v16528_v46, %v8310_v16  ;;  %v8318_v55 = vand.u32 4294901760, %v8317_v10 }
 0xade   :  { %14713 = vmatpush3.msra.mxu0 %v16349_v41  ;;  %14681 = vmatprep.subr.mxu1 %v17189_v35 }
 0xadf   :  { %14714 = vmatprep.subr.mxu0 %v17189_v35  ;;  %14682 = vmatpush3.msra.mxu1 %v16356_v54 }
 0xae0   :  { %14715 = vmatpush3.msra.mxu0 %v16356_v54  ;;  %14683 = vmatprep.subr.mxu1 %v17189_v35 }
 0xae1   :  { %14716 = vmatprep.subr.mxu0 %v17189_v35  ;;  %14684 = vmatpush3.msra.mxu1 %v16365_v1 }
 0xae2   :  { %14717 = vmatpush3.msra.mxu0 %v16365_v1  ;;  %14685 = vmatprep.subr.mxu1 %v17189_v35 }
 0xae3   :  { %14718 = vmatprep.subr.mxu0 %v17189_v35  ;;  %14686 = vmatpush3.msra.mxu1 %v16375_v27 }
 0xae4   :  { %14687 = vmatprep.mubr.msk.f32.mxu1 %vm15192_vm3, %v17189_v35  ;;  %14719 = vmatpush3.msra.mxu0 %v16375_v27 }
 0xae5   :  { %14720 = vmatprep.mubr.msk.f32.mxu0 %vm15192_vm3, %v17189_v35  ;;  %14688 = vmatmul.mubr.f32.vlgmr.msra.gmra.mxu1 %v7747_v9 }
 0xae6   :  { %14701 = vmatprep.subr.mxu1 %v17189_v35  ;;  %14721 = vmatmul.mubr.f32.vlgmr.msra.gmra.mxu0 %v7745_v29 }
 0xae7   :  { %14734 = vmatprep.subr.mxu0 %v17189_v35  ;;  %14702 = vmatpush3.msra.mxu1 %v16363_v0  ;;  %v8168_v0 = vld [vmem:[#allocation5 + $0x940] sm:$0xff] }
 0xae8   :  { %14735 = vmatpush3.msra.mxu0 %v16349_v41  ;;  %14703 = vmatprep.subr.mxu1 %v17189_v35  ;;  %v8169_v41 = vld [vmem:[#allocation5 + $0x948] sm:$0xff]  ;;  %v16586_v14 = vand.u32 4294901760, %v8168_v0 }
 0xae9   :  { %14736 = vmatprep.subr.mxu0 %v17189_v35  ;;  %14704 = vmatpush3.msra.mxu1 %v16373_v21  ;;  %v8328_v21 = vand.u32 4294901760, %v16555_v6  ;;  %v16580_v33 = vand.u32 4294901760, %v8169_v41 }
 0xaea   :  { %14737 = vmatpush3.msra.mxu0 %v16356_v54  ;;  %14705 = vmatprep.subr.mxu1 %v17189_v35  ;;  %v8322_v54 = vand.u32 4294901760, %v16545_v57  ;;  %v16601_v20 = vsub.f32 %v8168_v0, %v16586_v14 }
 0xaeb   :  { %14738 = vmatprep.subr.mxu0 %v17189_v35  ;;  %14706 = vmatpush3.msra.mxu1 %v16382_v13  ;;  %v8312_v13 = vand.u32 4294901760, %v8311_v47 }
 0xaec   :  { %14739 = vmatpush3.msra.mxu0 %v16365_v1  ;;  %14707 = vmatprep.subr.mxu1 %v17189_v35  ;;  %v8306_v1 = vand.u32 4294901760, %v8305_v2  ;;  %v17187_v56 = vand.u32 4294901760, %v16601_v20 }
 0xaed   :  { %14740 = vmatprep.subr.mxu0 %v17189_v35  ;;  %14708 = vmatpush3.msra.mxu1 %v16390_v43  ;;  %v8334_v43 = vand.u32 4294901760, %v16565_v30 }
 0xaee   :  { %14709 = vmatprep.mubr.msk.f32.mxu1 %vm15192_vm3, %v17189_v35  ;;  %14741 = vmatpush3.msra.mxu0 %v16375_v27  ;;  %v16573_v27 = vsub.f32 %v8170_v62, %v16557_v38  ;;  %v16625_v62 = vsub.f32 %v8165_v39, %v16610_v50  ;;  %v8353_v2 = vsub.f32 %v16601_v20, %v17187_v56 }
 0xaef   :  { %14742 = vmatprep.mubr.msk.f32.mxu0 %vm15192_vm3, %v17189_v35  ;;  %14710 = vmatmul.mubr.f32.vlgmr.msra.gmra.mxu1 %v7744_v48  ;;  %v8335_v19 = vsub.f32 %v16565_v30, %v8334_v43 }
 0xaf0   :  { %14723 = vmatprep.subr.mxu1 %v17189_v35  ;;  %14743 = vmatmul.mubr.f32.vlgmr.msra.gmra.mxu0 %v16426_v23  ;;  %v8340_v37 = vand.u32 4294901760, %v16573_v27  ;;  %v8354_v10 = vand.u32 4294901760, %v8353_v2 }
 0xaf1   :  { %14724 = vmatpush3.msra.mxu1 %v7780_v31  ;;  %14731 = vmatprep.mubr.msk.f32.mxu1 %vm15192_vm3, %v17189_v35  ;;  %v8167_v31 = vld [vmem:[#allocation5 + $0x938] sm:$0xff]  ;;  %v8336_v18 = vand.u32 4294901760, %v8335_v19 }
 0xaf2   :  { %14725 = vmatprep.subr.mxu1 %v17189_v35  ;;  %8412 = vmatprep.mubr.f32.mxu0 %v17189_v35  ;;  %v16594_v25 = vand.u32 4294901760, %v8167_v31  ;;  %v8341_v29 = vsub.f32 %v16573_v27, %v8340_v37 }
 0xaf3   :  { %14726 = vmatpush3.msra.mxu1 %v7787_v32  ;;  %8301 = vmatprep.subr.mxu0 %v8300_v42  ;;  %v8323_v32 = vsub.f32 %v16545_v57, %v8322_v54  ;;  %v16633_v42 = vsub.f32 %v8164_v8, %v16617_v22 }
 0xaf4   :  { %14727 = vmatprep.subr.mxu1 %v17189_v35  ;;  %8307 = vmatpush1.msra.mxu0 %v8306_v1  ;;  %v16608_v15 = vsub.f32 %v8167_v31, %v16594_v25  ;;  %v8342_v53 = vand.u32 4294901760, %v8341_v29  ;;  %v17184_v1 = vand.u32 4294901760, %v16625_v62 }
 0xaf5   :  { %14728 = vmatpush3.msra.mxu1 %v7794_v34  ;;  %v8166_v34 = vld [vmem:[#allocation5 + $0x930] sm:$0xff]  ;;  %8313 = vmatprep.subr.mxu0 %v8312_v13  ;;  %v8324_v17 = vand.u32 4294901760, %v8323_v32  ;;  %v17183_v13 = vand.u32 4294901760, %v16633_v42 }
 0xaf6   :  { %14729 = vmatprep.subr.mxu1 %v17189_v35  ;;  %8319 = vmatpush1.msra.mxu0 %v8318_v55  ;;  %v16603_v9 = vand.u32 4294901760, %v8166_v34  ;;  %v17186_v7 = vand.u32 4294901760, %v16608_v15 }
 0xaf7   :  { %14730 = vmatpush3.msra.mxu1 %v7801_v36  ;;  %v8329_v36 = vsub.f32 %v16555_v6, %v8328_v21  ;;  %8325 = vmatprep.subr.mxu0 %v8324_v17 }
 0xaf8   :  { %14732 = vmatmul.mubr.f32.vlgmr.msra.gmra.mxu1 %v16426_v23  ;;  %8207 = vmatprep.subr.mxu1 %v16509_v45  ;;  %v16592_v23 = vsub.f32 %v8169_v41, %v16580_v33  ;;  %v16615_v58 = vsub.f32 %v8166_v34, %v16603_v9  ;;  %v8359_v0 = vsub.f32 %v16608_v15, %v17186_v7 }
 0xaf9   :  { %8266 = vmatprep.mubr.f32.mxu1 %v17189_v35  ;;  %8209 = vmatpush1.msra.mxu1 %v16512_v52  ;;  %v8330_v48 = vand.u32 4294901760, %v8329_v36  ;;  %v8371_v34 = vsub.f32 %v16625_v62, %v17184_v1  ;;  %v8377_v36 = vsub.f32 %v16633_v42, %v17183_v13 }
 0xafa   :  { %8211 = vmatprep.subr.mxu1 %v16517_v28  ;;  %v17188_v4 = vand.u32 4294901760, %v16592_v23  ;;  %v17185_v41 = vand.u32 4294901760, %v16615_v58  ;;  %v8360_v32 = vand.u32 4294901760, %v8359_v0 }
 0xafb   :  { %8213 = vmatpush1.msra.mxu1 %v16523_v63  ;;  %8331 = vmatpush1.msra.mxu0 %v8330_v48  ;;  %v8372_v39 = vand.u32 4294901760, %v8371_v34  ;;  %v8378_v19 = vand.u32 4294901760, %v8377_v36 }
 0xafc   :  { %8215 = vmatprep.subr.mxu1 %v16530_v49  ;;  %8337 = vmatprep.subr.mxu0 %v8336_v18  ;;  %v8347_v3 = vsub.f32 %v16592_v23, %v17188_v4  ;;  %v8365_v31 = vsub.f32 %v16615_v58, %v17185_v41 }
 0xafd   :  { %8217 = vmatpush1.msra.mxu1 %v16537_v12  ;;  %8343 = vmatpush1.msra.mxu0 %v8342_v53 }
 0xafe   :  { %8219 = vmatprep.subr.mxu1 %v16547_v60  ;;  %v8348_v47 = vand.u32 4294901760, %v8347_v3  ;;  %v8366_v55 = vand.u32 4294901760, %v8365_v31 }
 0xaff   :  { %8221 = vmatpush1.msra.mxu1 %v16557_v38 }
 0xb00   :  { %8223 = vmatprep.subr.mxu1 %v16580_v33  ;;  %8349 = vmatprep.subr.mxu0 %v8348_v47 }
 0xb01   :  { %8225 = vmatpush1.msra.mxu1 %v16586_v14  ;;  %8355 = vmatpush1.msra.mxu0 %v8354_v10 }
 0xb02   :  { %8227 = vmatprep.subr.mxu1 %v16594_v25  ;;  %8361 = vmatprep.subr.mxu0 %v8360_v32 }
 0xb03   :  { %8229 = vmatpush1.msra.mxu1 %v16603_v9  ;;  %8367 = vmatpush1.msra.mxu0 %v8366_v55 }
 0xb04   :  { %8231 = vmatprep.subr.mxu1 %v16610_v50  ;;  %8373 = vmatprep.subr.mxu0 %v8372_v39 }
 0xb05   :  { %8233 = vmatpush1.msra.mxu1 %v16617_v22  ;;  %8379 = vmatpush1.msra.mxu0 %v8378_v19 }
 0xb06   :  { %8440 = vmatprep.subr.mxu1 %v16515_v26  ;;  %8540 = vmatprep.subr.mxu0 %v16509_v45  ;;  %v17193_v26 = vand.u32 4294901760, %v16608_v15 }
 0xb44   :  { %v6367_v17 = vpop.f32.mrf.mxu0 }
 0xb46   :  { %v14502_v8 = vpop.f32.mrf.mxu0 }
 0xb4c   :  { %v6524_v48 = vpop.f32.mrf.mxu0 }
 0xb4d   :  { %v6276_v29 = vpop.f32.mrf.mxu1 }
 0xb4e   :  { %v6368_v18 = vadd.f32 %v6367_v17, %v6276_v29  ;;  %v14524_v53 = vpop.f32.mrf.mxu0 }
 0xb4f   :  { %v14491_v3 = vpop.f32.mrf.mxu1 }
 0xb55   :  { %v6447_v2 = vpop.f32.mrf.mxu1 }
 0xb56   :  { %v6448_v47 = vadd.f32 %v6447_v2, %v6368_v18  ;;  %v6682_v0 = vpop.f32.mrf.mxu0 }
 0xb57   :  { %v14513_v10 = vpop.f32.mrf.mxu1 }
 0xb58   :  { %v14546_v31 = vpop.f32.mrf.mxu0  ;;  %v6525_v32 = vadd.f32 %v6524_v48, %v6448_v47 }
 0xb5f   :  { %v6607_v34 = vpop.f32.mrf.mxu1 }
 0xb60   :  { %v6608_v13 = vadd.f32 %v6607_v34, %v6525_v32  ;;  %v6858_v55 = vpop.f32.mrf.mxu0 }
 0xb61   :  { %v14535_v36 = vpop.f32.mrf.mxu1 }
 0xb62   :  { %v6683_v39 = vadd.f32 %v6682_v0, %v6608_v13  ;;  %v14568_v8 = vpop.f32.mrf.mxu0 }
 0xb69   :  { %v6767_v19 = vpop.f32.mrf.mxu1 }
 0xb6a   :  { %v6768_v1 = vadd.f32 %v6767_v19, %v15809_v44  ;;  %v7015_v41 = vpop.f32.mrf.mxu0 }
 0xb6b   :  { %v14557_v7 = vpop.f32.mrf.mxu1 }
 0xb6c   :  { %v14590_v17 = vpop.f32.mrf.mxu0  ;;  %v6859_v29 = vadd.f32 %v6858_v55, %v6768_v1 }
 0xb73   :  { %v6938_v53 = vpop.f32.mrf.mxu1 }
 0xb74   :  { %v6939_v3 = vadd.f32 %v6938_v53, %v6859_v29  ;;  %v7173_v18 = vpop.f32.mrf.mxu0 }
 0xb75   :  { %v14579_v2 = vpop.f32.mrf.mxu1 }
 0xb76   :  { %v14612_v10 = vpop.f32.mrf.mxu0  ;;  %v7016_v31 = vadd.f32 %v7015_v41, %v6939_v3 }
 0xb7d   :  { %v7098_v48 = vpop.f32.mrf.mxu1 }
 0xb7e   :  { %v7099_v47 = vadd.f32 %v7098_v48, %v7016_v31  ;;  %v7349_v32 = vpop.f32.mrf.mxu0 }
 0xb7f   :  { %v14601_v34 = vpop.f32.mrf.mxu1 }
 0xb80   :  { %v7174_v36 = vadd.f32 %v7173_v18, %v7099_v47  ;;  %v14634_v13 = vpop.f32.mrf.mxu0 }
 0xb87   :  { %v7258_v0 = vpop.f32.mrf.mxu1 }
 0xb88   :  { %v7506_v8 = vpop.f32.mrf.mxu0  ;;  %v7259_v7 = vadd.f32 %v7258_v0, %v15991_v61 }
 0xb89   :  { %v14623_v56 = vpop.f32.mrf.mxu1 }
 0xb8a   :  { %v14656_v44 = vpop.f32.mrf.mxu0  ;;  %v7350_v17 = vadd.f32 %v7349_v32, %v7259_v7 }
 0xb91   :  { %v7429_v19 = vpop.f32.mrf.mxu1 }
 0xb92   :  { %v7664_v1 = vpop.f32.mrf.mxu0  ;;  %v7430_v53 = vadd.f32 %v7429_v19, %v7350_v17 }
 0xb93   :  { %v14645_v55 = vpop.f32.mrf.mxu1 }
 0xb94   :  { %v14678_v29 = vpop.f32.mrf.mxu0  ;;  %v7507_v2 = vadd.f32 %v7506_v8, %v7430_v53 }
 0xb9b   :  { %v7589_v41 = vpop.f32.mrf.mxu1 }
 0xb9c   :  { %v7590_v3 = vadd.f32 %v7589_v41, %v7507_v2  ;;  %v7840_v10 = vpop.f32.mrf.mxu0  ;;  %v8162_v41 = vld [vmem:[#allocation5 + $0x910] ss:$0 sm:$0xff] }
 0xb9d   :  { %v14667_v31 = vpop.f32.mrf.mxu1 }
 0xb9e   :  { %v7665_v48 = vadd.f32 %v7664_v1, %v7590_v3  ;;  %v14700_v18 = vpop.f32.mrf.mxu0 }
 0xba0   :  { %v8159_v47 = vadd.f32 %v7665_v48, %v7174_v36 }
 0xba5   :  { %v7749_v34 = vpop.f32.mrf.mxu1 }
 0xba6   :  { %v7997_v13 = vpop.f32.mrf.mxu0  ;;  %v7750_v61 = vadd.f32 %v7749_v34, %v16130_v51 }
 0xba7   :  { %v14689_v56 = vpop.f32.mrf.mxu1 }
 0xba8   :  { %v14722_v44 = vpop.f32.mrf.mxu0  ;;  %v7841_v55 = vadd.f32 %v7840_v10, %v7750_v61  ;;  %v9317_v56 = vld [vmem:[#allocation5 + $0xa00] sm:$0x3f] }
 0xbaf   :  { %v7920_v0 = vpop.f32.mrf.mxu1 }
 0xbb0   :  { %v8155_v4 = vpop.f32.mrf.mxu0  ;;  %v7921_v19 = vadd.f32 %v7920_v0, %v7841_v55  ;;  %v9324_v0 = vsel %vm8816_vm1, %v9317_v56, 0  ;;  %v8810_v56 = vld [vmem:[#allocation5 + $0x9a0] sm:$0x3f] }
 0xbb1   :  { %v14711_v32 = vpop.f32.mrf.mxu1 }
 0xbb2   :  { %v14744_v7 = vpop.f32.mrf.mxu0  ;;  %v7998_v8 = vadd.f32 %v7997_v13, %v7921_v19  ;;  %v9316_v13 = vld [vmem:[#allocation5 + $0x9f0] sm:$0xff] }
 0xbb3   :  { %v9321_v61 = vsel %vm8816_vm1, %v9316_v13, 0  ;;  %v16768_v7 = vand.u32 4294901760, %v9324_v0  ;;  %v8809_v13 = vld [vmem:[#allocation5 + $0x990] sm:$0xff] }
 0xbb4   :  { %v16766_v32 = vand.u32 4294901760, %v9321_v61 }
 0xbb8   :  { %v8080_v17 = vpop.f32.mrf.mxu1 }
 0xbb9   :  { %v8081_v29 = vadd.f32 %v8080_v17, %v7998_v8 }
 0xbba   :  { %v14733_v53 = vpop.f32.mrf.mxu1 }
 0xbbb   :  { %v8156_v2 = vadd.f32 %v8155_v4, %v8081_v29 }
 0xbbd   :  { %v8160_v1 = vadd.f32 %v8156_v2, %v6683_v39 }
 0xbbf   :  { %v8161_v36 = vadd.f32 %v8160_v1, %v8159_v47 }
 0xbc1   :  { %v8163_v3 = vadd.f32 %v8162_v41, %v8161_v36  ;;  %v16775_v41 = vsub.f32 %v9321_v61, %v16766_v32  ;;  %v16778_v36 = vsub.f32 %v9324_v0, %v16768_v7 }
 0xbc3   :  { %v8180_v31 = vsel %vm8178_vm0, %v8163_v3, 0 }
 0xbc4   :  { %v16655_v48 = vand.u32 4294901760, %v8180_v31 }
 0xbc6   :  { %v8268_v51 = vsub.f32 %v8180_v31, %v16655_v48  ;;  %8414 = vmatmul.mubr.f32.vlgmr.msra.gmra.mxu0 %v16655_v48  ;;  %v9819_v31 = vld [vmem:[#allocation5 + $0xa30] sm:$0xff] }
 0xbc7   :  { %8542 = vmatpush1.msra.mxu0 %v16512_v52  ;;  %8599 = vmatprep.mubr.f32.mxu0 %v17189_v35 }
 0xbc8   :  { %8544 = vmatprep.subr.mxu0 %v16517_v28  ;;  %v8269_v10 = vand.u32 4294901760, %v8268_v51 }
 0xbc9   :  { %8546 = vmatpush1.msra.mxu0 %v16523_v63 }
 0xbca   :  { %8548 = vmatprep.subr.mxu0 %v16530_v49  ;;  %v8270_v4 = vsub.f32 %v8268_v51, %v8269_v10 }
 0xbcb   :  { %8550 = vmatpush1.msra.mxu0 %v16537_v12 }
 0xbcc   :  { %8552 = vmatprep.subr.mxu0 %v16547_v60  ;;  %v8271_v39 = vand.u32 4294901760, %v8270_v4  ;;  %v9396_v4 = vand.u32 4294901760, %v16775_v41 }
 0xbcd   :  { %8554 = vmatpush1.msra.mxu0 %v16557_v38 }
 0xbce   :  { %8556 = vmatprep.subr.mxu0 %v16580_v33  ;;  %8272 = vmatmul.mubr.f32.vlgmr.msra.gmra.mxu1 %v8271_v39  ;;  %v9406_v39 = vand.u32 4294901760, %v16778_v36 }
 0xbcf   :  { %8443 = vmatpush1.msra.mxu1 %v16521_v59  ;;  %8558 = vmatpush1.msra.mxu0 %v16586_v14  ;;  %v17195_v59 = vand.u32 4294901760, %v16625_v62 }
 0xbd0   :  { %8446 = vmatprep.subr.mxu1 %v16528_v46  ;;  %8560 = vmatprep.subr.mxu0 %v16594_v25  ;;  %v8811_v46 = vld [vmem:[#allocation5 + $0x9b0] sm:$0xff] }
 0xbd1   :  { %8449 = vmatpush1.msra.mxu1 %v16535_v11  ;;  %8562 = vmatpush1.msra.mxu0 %v16603_v9 }
 0xbd2   :  { %8452 = vmatprep.subr.mxu1 %v16545_v57  ;;  %8564 = vmatprep.subr.mxu0 %v16610_v50 }
 0xbd3   :  { %8455 = vmatpush1.msra.mxu1 %v16555_v6  ;;  %8566 = vmatpush1.msra.mxu0 %v16617_v22 }
 0xbd4   :  { %8458 = vmatprep.subr.mxu1 %v16565_v30  ;;  %8603 = vmatmul.mubr.f32.vlgmr.msra.gmra.mxu0 %v8269_v10 }
 0xbd5   :  { %8742 = vmatprep.subr.mxu0 %v16509_v45  ;;  %8461 = vmatpush1.msra.mxu1 %v16573_v27  ;;  %v17191_v45 = vand.u32 4294901760, %v16592_v23 }
 0xbd6   :  { %8744 = vmatpush1.msra.mxu0 %v16512_v52  ;;  %8464 = vmatprep.subr.mxu1 %v16592_v23  ;;  %v17192_v52 = vand.u32 4294901760, %v16601_v20 }
 0xbd7   :  { %8746 = vmatprep.subr.mxu0 %v16517_v28  ;;  %8467 = vmatpush1.msra.mxu1 %v16601_v20  ;;  %v17194_v28 = vand.u32 4294901760, %v16615_v58 }
 0xbd8   :  { %8748 = vmatpush1.msra.mxu0 %v16523_v63  ;;  %8470 = vmatprep.subr.mxu1 %v16608_v15  ;;  %v17196_v63 = vand.u32 4294901760, %v16633_v42 }
 0xbd9   :  { %8750 = vmatprep.subr.mxu0 %v16530_v49  ;;  %8473 = vmatpush1.msra.mxu1 %v16615_v58  ;;  %v8818_v49 = vsel %vm8816_vm1, %v8811_v46, 0 }
 0xbda   :  { %8752 = vmatpush1.msra.mxu0 %v16537_v12  ;;  %8476 = vmatprep.subr.mxu1 %v16625_v62 }
 0xbdb   :  { %8754 = vmatprep.subr.mxu0 %v16547_v60  ;;  %8479 = vmatpush1.msra.mxu1 %v16633_v42  ;;  %v8812_v42 = vld [vmem:[#allocation5 + $0x9c0] sm:$0x3f] }
 0xbdc   :  { %8512 = vmatprep.mubr.f32.mxu1 %v17189_v35  ;;  %8756 = vmatpush1.msra.mxu0 %v16557_v38  ;;  %v8821_v18 = vsel %vm8816_vm1, %v8812_v42, 0 }
 0xbdd   :  { %8515 = vmatmul.mubr.f32.vlgmr.msra.gmra.mxu1 %v8268_v51  ;;  %8630 = vmatprep.subr.mxu1 %v8298_v40  ;;  %v16755_v47 = vand.u32 4294901760, %v8821_v18 }
 0xbde   :  { %8758 = vmatprep.subr.mxu0 %v16580_v33  ;;  %8634 = vmatpush1.msra.mxu1 %v8304_v24  ;;  %v16734_v24 = vand.u32 4294901760, %v8818_v49 }
 0xbdf   :  { %8760 = vmatpush1.msra.mxu0 %v16586_v14  ;;  %8638 = vmatprep.subr.mxu1 %v8310_v16  ;;  %v16758_v34 = vsub.f32 %v8821_v18, %v16755_v47 }
 0xbe0   :  { %8762 = vmatprep.subr.mxu0 %v16594_v25  ;;  %8642 = vmatpush1.msra.mxu1 %v8316_v5  ;;  %v16737_v12 = vsub.f32 %v8818_v49, %v16734_v24 }
 0xbe1   :  { %8764 = vmatpush1.msra.mxu0 %v16603_v9  ;;  %8646 = vmatprep.subr.mxu1 %v8322_v54  ;;  %v8903_v44 = vand.u32 4294901760, %v16758_v34 }
 0xbe2   :  { %8766 = vmatprep.subr.mxu0 %v16610_v50  ;;  %8650 = vmatpush1.msra.mxu1 %v8328_v21  ;;  %v8893_v60 = vand.u32 4294901760, %v16737_v12 }
 0xbe3   :  { %8768 = vmatpush1.msra.mxu0 %v16617_v22  ;;  %8801 = vmatprep.mubr.f32.mxu0 %v17189_v35  ;;  %v8904_v55 = vsub.f32 %v16758_v34, %v8903_v44 }
 0xbe4   :  { %8654 = vmatprep.subr.mxu1 %v8334_v43  ;;  %8803 = vmatmul.mubr.f32.vlgmr.msra.gmra.mxu0 %v16655_v48  ;;  %v8894_v5 = vsub.f32 %v16737_v12, %v8893_v60 }
 0xbe5   :  { %8658 = vmatpush1.msra.mxu1 %v8340_v37  ;;  %8715 = vmatprep.mubr.f32.mxu1 %v17189_v35  ;;  %v8905_v1 = vand.u32 4294901760, %v8904_v55 }
 0xbe6   :  { %8662 = vmatprep.subr.mxu1 %v17191_v45  ;;  %14752 = vmatprep.mubr.f32.mxu0 %v16734_v24  ;;  %v8895_v30 = vand.u32 4294901760, %v8894_v5  ;;  %v9825_v45 = vsel %vm8816_vm1, %v9819_v31, 0 }
 0xbe7   :  { %8666 = vmatpush1.msra.mxu1 %v17192_v52  ;;  %v16790_v46 = vand.u32 4294901760, %v9825_v45 }
 0xbe8   :  { %8670 = vmatprep.subr.mxu1 %v17193_v26 }
 0xbe9   :  { %8674 = vmatpush1.msra.mxu1 %v17194_v28 }
 0xbea   :  { %8678 = vmatprep.subr.mxu1 %v17195_v59 }
 0xbeb   :  { %8682 = vmatpush1.msra.mxu1 %v17196_v63  ;;  %v9397_v63 = vsub.f32 %v16775_v41, %v9396_v4 }
 0xbec   :  { %8717 = vmatmul.mubr.f32.vlgmr.msra.gmra.mxu1 %v16655_v48  ;;  %v9820_v48 = vld [vmem:[#allocation5 + $0xa40] sm:$0x3f] }
 0xbed   :  { %14747 = vmatprep.mubr.f32.mxu1 %v8895_v30  ;;  %v9828_v28 = vsel %vm8816_vm1, %v9820_v48, 0  ;;  %v9398_v5 = vand.u32 4294901760, %v9397_v63  ;;  %v9314_v48 = vld [vmem:[#allocation5 + $0x9d0] sm:$0xff] }
 0xc86   :  { %v8415_v16 = vpop.f32.mrf.mxu0 }
 0xc88   :  { %v8417_v38 = vpop.f32.mrf.mxu0 }
 0xc8e   :  { %v8273_v40 = vpop.f32.mrf.mxu1 }
 0xc8f   :  { %v8416_v6 = vadd.f32 %v8415_v16, %v8273_v40  ;;  %v16797_v16 = vand.u32 4294901760, %v9828_v28 }
 0xc90   :  { %v8275_v11 = vpop.f32.mrf.mxu1 }
 0xc91   :  { %v8418_v21 = vadd.f32 %v8417_v38, %v8275_v11  ;;  %v9407_v11 = vsub.f32 %v16778_v36, %v9406_v39  ;;  %v16804_v38 = vsub.f32 %v9825_v45, %v16790_v46  ;;  %v16808_v30 = vsub.f32 %v9828_v28, %v16797_v16 }
 0xc94   :  { %v8604_v43 = vpop.f32.mrf.mxu0 }
 0xc96   :  { %v8606_v14 = vpop.f32.mrf.mxu0 }
 0xc9d   :  { %v8516_v57 = vpop.f32.mrf.mxu1 }
 0xc9e   :  { %v8517_v27 = vadd.f32 %v8516_v57, %v8416_v6 }
 0xc9f   :  { %v8518_v54 = vpop.f32.mrf.mxu1 }
 0xca0   :  { %v8519_v33 = vadd.f32 %v8518_v54, %v8418_v21  ;;  %v8605_v37 = vadd.f32 %v8604_v43, %v8517_v27  ;;  %v9408_v54 = vand.u32 4294901760, %v9407_v11  ;;  %v10321_v21 = vld [vmem:[#allocation5 + $0xa50] sm:$0xff]  ;;  %v10322_v27 = vld [vmem:[#allocation5 + $0xa60] sm:$0x3f] }
 0xca2   :  { %v8607_v20 = vadd.f32 %v8606_v14, %v8519_v33  ;;  %v9910_v14 = vand.u32 4294901760, %v16808_v30 }
 0xca4   :  { %v8804_v9 = vpop.f32.mrf.mxu0 }
 0xca6   :  { %v8806_v22 = vpop.f32.mrf.mxu0 }
 0xcac   :  { %v8718_v23 = vpop.f32.mrf.mxu1 }
 0xcad   :  { %v8719_v25 = vadd.f32 %v8718_v23, %v8605_v37  ;;  %v9900_v37 = vand.u32 4294901760, %v16804_v38  ;;  %v10326_v23 = vsel %vm8816_vm1, %v10321_v21, 0 }
 0xcae   :  { %v8720_v15 = vpop.f32.mrf.mxu1 }
 0xcaf   :  { %v16744_v50 = vadd.f32 %v8804_v9, %v8719_v25  ;;  %v8721_v58 = vadd.f32 %v8720_v15, %v8607_v20  ;;  %v16826_v9 = vand.u32 4294901760, %v10326_v23 }
 0xcb1   :  { %9318 = vrot.lane.b32.xlu0 %v16744_v50, %s15195_s24  ;;  %8814 = vrot.lane.b32.xlu1 %v16744_v50, %s15196_s25  ;;  %v8807_v62 = vadd.f32 %v8806_v22, %v8721_v58  ;;  %v16843_v18 = vsub.f32 %v10326_v23, %v16826_v9 }
 0xcb3   :  { %v10401_v0 = vand.u32 4294901760, %v16843_v18 }
 0xcb5   :  { %10323 = vrot.lane.b32.xlu0 %v8807_v62, %s15197_s26  ;;  %9822 = vrot.lane.b32.xlu1 %v8807_v62, %s15198_s27 }
 0xcb9   :  { %11818 = vrot.lane.b32.xlu0 %v16744_v50, %s15188_s20  ;;  %11319 = vrot.lane.b32.xlu1 %v16744_v50, %s15199_s28 }
 0xcbd   :  { %11820 = vrot.lane.b32.xlu1 %v8807_v62, %s15188_s20 }
 0xd23   :  { %v9319_v19 = vpop.permute.xlu0 %9318  ;;  %v8815_v8 = vpop.permute.xlu1 %8814 }
 0xd24   :  { %v9326_v17 = vsel %vm930_vm11, %v9319_v19, 0  ;;  %v8823_v29 = vsel %vm930_vm11, %v8815_v8, 0  ;;  %v10823_v19 = vsel %vm8816_vm1, %v8809_v13, 0  ;;  %v10826_v8 = vsel %vm8816_vm1, %v8810_v56, 0 }
 0xd25   :  { %v16772_v53 = vand.u32 4294901760, %v9326_v17  ;;  %v8856_v2 = vand.u32 4294901760, %v8823_v29 }
 0xd27   :  { %v8943_v3 = vsub.f32 %v8823_v29, %v8856_v2  ;;  %14745 = vmatprep.subr.mxu1 %v8856_v2  ;;  %v9446_v51 = vsub.f32 %v9326_v17, %v16772_v53  ;;  %v9823_v52 = vpop.permute.xlu1 %9822  ;;  %v10324_v25 = vpop.permute.xlu0 %10323  ;;  %v10402_v17 = vsub.f32 %v16843_v18, %v10401_v0 }
 0xd28   :  { %14746 = vmatpush3.msra.mxu1 %v8856_v2  ;;  %v9830_v49 = vsel %vm930_vm11, %v9823_v52, 0  ;;  %v10331_v15 = vsel %vm930_vm11, %v10324_v25, 0  ;;  %v11322_v52 = vsel %vm8816_vm1, %v9314_v48, 0 }
 0xd29   :  { %14748 = vmatmul.mubr.f32.vlgmr.msra.gmra.mxu1 %v8905_v1  ;;  %14755 = vmatprep.subr.mxu1 %v8943_v3  ;;  %v8944_v10 = vand.u32 4294901760, %v8943_v3  ;;  %v9447_v40 = vand.u32 4294901760, %v9446_v51  ;;  %v16800_v57 = vand.u32 4294901760, %v9830_v49  ;;  %v16838_v22 = vand.u32 4294901760, %v10331_v15 }
 0xd2a   :  { %14756 = vmatpush3.msra.mxu1 %v8943_v3  ;;  %14757 = vmatprep.mubr.f32.mxu1 %v16737_v12  ;;  %v10329_v12 = vsel %vm8816_vm1, %v10322_v27, 0  ;;  %v16876_v1 = vand.u32 4294901760, %v10826_v8  ;;  %v9818_v27 = vld [vmem:[#allocation5 + $0xa20] sm:$0x3f] }
 0xd2b   :  { %14765 = vmatprep.subr.mxu1 %v8944_v10  ;;  %v8945_v26 = vsub.f32 %v8943_v3, %v8944_v10  ;;  %v9448_v6 = vsub.f32 %v9446_v51, %v9447_v40  ;;  %v9950_v43 = vsub.f32 %v9830_v49, %v16800_v57  ;;  %v16833_v58 = vand.u32 4294901760, %v10329_v12 }
 0xd2c   :  { %v16891_v31 = vsub.f32 %v10826_v8, %v16876_v1 }
 0xd2d   :  { %14758 = vmatmul.mubr.f32.vlgmr.msra.gmra.mxu1 %v16758_v34  ;;  %v8946_v59 = vand.u32 4294901760, %v8945_v26  ;;  %v9449_v33 = vand.u32 4294901760, %v9448_v6  ;;  %v9951_v20 = vand.u32 4294901760, %v9950_v43  ;;  %v16848_v34 = vsub.f32 %v10329_v12, %v16833_v58  ;;  %v11320_v26 = vpop.permute.xlu1 %11319 }
 0xd2e   :  { %14766 = vmatpush3.msra.mxu1 %v8944_v10  ;;  %14767 = vmatprep.mubr.f32.mxu1 %v16734_v24  ;;  %v10908_v45 = vand.u32 4294901760, %v16891_v31  ;;  %v11327_v49 = vsel %vm930_vm11, %v11320_v26, 0 }
 0xd2f   :  { %14775 = vmatprep.subr.mxu1 %v16772_v53  ;;  %14750 = vmatprep.subr.mxu0 %v8946_v59  ;;  %v9952_v42 = vsub.f32 %v9950_v43, %v9951_v20  ;;  %v10411_v55 = vand.u32 4294901760, %v16848_v34 }
 0xd30   :  { %14751 = vmatpush3.msra.mxu0 %v8946_v59 }
 0xd31   :  { %14753 = vmatmul.mubr.f32.vlgmr.msra.gmra.mxu0 %v16755_v47  ;;  %14760 = vmatprep.subr.mxu0 %v8856_v2  ;;  %v9953_v61 = vand.u32 4294901760, %v9952_v42  ;;  %v11821_v21 = vpop.permute.xlu1 %11820 }
 0xd32   :  { %14768 = vmatmul.mubr.f32.vlgmr.msra.gmra.mxu1 %v16755_v47  ;;  %14761 = vmatpush3.msra.mxu0 %v8856_v2 }
 0xd33   :  { %14776 = vmatpush3.msra.mxu1 %v16772_v53  ;;  %14770 = vmatprep.subr.mxu0 %v8856_v2 }
 0xd34   :  { %14785 = vmatprep.subr.mxu1 %v9446_v51  ;;  %14762 = vmatprep.mubr.f32.mxu0 %v8893_v60  ;;  %v9901_v60 = vsub.f32 %v16804_v38, %v9900_v37 }
 0xd35   :  { %14777 = vmatprep.mubr.f32.mxu1 %v9398_v5  ;;  %14763 = vmatmul.mubr.f32.vlgmr.msra.gmra.mxu0 %v8903_v44  ;;  %v10451_v44 = vsub.f32 %v10331_v15, %v16838_v22 }
 0xd36   :  { %14771 = vmatpush3.msra.mxu0 %v8856_v2  ;;  %14778 = vmatmul.mubr.f32.vlgmr.msra.gmra.mxu1 %v9408_v54  ;;  %v9902_v62 = vand.u32 4294901760, %v9901_v60  ;;  %v10828_v2 = vsel %vm930_vm11, %v16744_v50, 0  ;;  %v10403_v50 = vand.u32 4294901760, %v10402_v17  ;;  %v11828_v60 = vsel %vm8816_vm1, %v9818_v27, 0 }
 0xd37   :  { %14786 = vmatpush3.msra.mxu1 %v9446_v51  ;;  %14780 = vmatprep.subr.mxu0 %v9449_v33  ;;  %v10452_v29 = vand.u32 4294901760, %v10451_v44  ;;  %v9315_v51 = vld [vmem:[#allocation5 + $0x9e0] sm:$0x3f] }
 0xd38   :  { %14795 = vmatprep.subr.mxu1 %v9447_v40  ;;  %14772 = vmatprep.mubr.f32.mxu0 %v16734_v24  ;;  %v9911_v24 = vsub.f32 %v16808_v30, %v9910_v14  ;;  %v11325_v28 = vsel %vm8816_vm1, %v9315_v51, 0 }
 0xd39   :  { %14787 = vmatprep.mubr.f32.mxu1 %v16775_v41  ;;  %14773 = vmatmul.mubr.f32.vlgmr.msra.gmra.mxu0 %v16755_v47  ;;  %v10453_v41 = vsub.f32 %v10451_v44, %v10452_v29  ;;  %v16918_v11 = vand.u32 4294901760, %v11325_v28 }
 0xd3a   :  { %14781 = vmatpush3.msra.mxu0 %v9449_v33  ;;  %14788 = vmatmul.mubr.f32.vlgmr.msra.gmra.mxu1 %v16778_v36  ;;  %v9912_v47 = vand.u32 4294901760, %v9911_v24 }
 0xd3b   :  { %14796 = vmatpush3.msra.mxu1 %v9447_v40  ;;  %14790 = vmatprep.subr.mxu0 %v16772_v53  ;;  %v10454_v10 = vand.u32 4294901760, %v10453_v41  ;;  %v16911_v40 = vand.u32 4294901760, %v11322_v52  ;;  %v16933_v54 = vsub.f32 %v11325_v28, %v16918_v11 }
 0xd3c   :  { %14805 = vmatprep.subr.mxu1 %v16800_v57  ;;  %14782 = vmatprep.mubr.f32.mxu0 %v16766_v32 }
 0xd3d   :  { %14797 = vmatprep.mubr.f32.mxu1 %v16766_v32  ;;  %14783 = vmatmul.mubr.f32.vlgmr.msra.gmra.mxu0 %v16768_v7  ;;  %v16928_v6 = vsub.f32 %v11322_v52, %v16911_v40  ;;  %v11407_v23 = vand.u32 4294901760, %v16933_v54 }
 0xd3e   :  { %14791 = vmatpush3.msra.mxu0 %v16772_v53  ;;  %14798 = vmatmul.mubr.f32.vlgmr.msra.gmra.mxu1 %v16768_v7 }
 0xd3f   :  { %14806 = vmatpush3.msra.mxu1 %v16800_v57  ;;  %14800 = vmatprep.subr.mxu0 %v16772_v53 }
 0xd40   :  { %14815 = vmatprep.subr.mxu1 %v9950_v43  ;;  %14792 = vmatprep.mubr.f32.mxu0 %v9396_v4 }
 0xd41   :  { %14807 = vmatprep.mubr.f32.mxu1 %v9902_v62  ;;  %14793 = vmatmul.mubr.f32.vlgmr.msra.gmra.mxu0 %v9406_v39  ;;  %v16960_v62 = vand.u32 4294901760, %v11828_v60 }
 0xd42   :  { %14801 = vmatpush3.msra.mxu0 %v16772_v53  ;;  %14808 = vmatmul.mubr.f32.vlgmr.msra.gmra.mxu1 %v9912_v47  ;;  %v16868_v53 = vand.u32 4294901760, %v10823_v19 }
 0xd43   :  { %14816 = vmatpush3.msra.mxu1 %v9950_v43  ;;  %14810 = vmatprep.subr.mxu0 %v9953_v61  ;;  %v11909_v13 = vsub.f32 %v11828_v60, %v16960_v62 }
 0xd44   :  { %14825 = vmatprep.subr.mxu1 %v9951_v20  ;;  %14802 = vmatprep.mubr.f32.mxu0 %v16766_v32  ;;  %v10412_v32 = vsub.f32 %v16848_v34, %v10411_v55  ;;  %v16886_v36 = vsub.f32 %v10823_v19, %v16868_v53 }
 0xd45   :  { %14817 = vmatprep.mubr.f32.mxu1 %v16804_v38  ;;  %14803 = vmatmul.mubr.f32.vlgmr.msra.gmra.mxu0 %v16768_v7  ;;  %v16881_v7 = vand.u32 4294901760, %v10828_v2 }
 0xd46   :  { %14811 = vmatpush3.msra.mxu0 %v9953_v61  ;;  %14818 = vmatmul.mubr.f32.vlgmr.msra.gmra.mxu1 %v16808_v30  ;;  %v10413_v3 = vand.u32 4294901760, %v10412_v32  ;;  %v10898_v39 = vand.u32 4294901760, %v16886_v36  ;;  %v9817_v30 = vld [vmem:[#allocation5 + $0xa10] sm:$0xff]  ;;  %v12334_v32 = vld [vmem:[#allocation5 + $0xac0] sm:$0xf] }
 0xd47   :  { %14826 = vmatpush3.msra.mxu1 %v9951_v20  ;;  %14820 = vmatprep.subr.mxu0 %v16800_v57  ;;  %v10948_v4 = vsub.f32 %v10828_v2, %v16881_v7  ;;  %v11825_v25 = vsel %vm8816_vm1, %v9817_v30, 0 }
 0xd48   :  { %14835 = vmatprep.subr.mxu1 %v16838_v22  ;;  %14812 = vmatprep.mubr.f32.mxu0 %v16790_v46  ;;  %v10899_v59 = vsub.f32 %v16886_v36, %v10898_v39  ;;  %v16953_v24 = vand.u32 4294901760, %v11825_v25 }
 0xd49   :  { %14827 = vmatprep.mubr.f32.mxu1 %v16790_v46  ;;  %14813 = vmatmul.mubr.f32.vlgmr.msra.gmra.mxu0 %v16797_v16  ;;  %v10949_v63 = vand.u32 4294901760, %v10948_v4 }
 0xd4a   :  { %14821 = vmatpush3.msra.mxu0 %v16800_v57  ;;  %14828 = vmatmul.mubr.f32.vlgmr.msra.gmra.mxu1 %v16797_v16  ;;  %v11899_v47 = vsub.f32 %v11825_v25, %v16953_v24 }
 0xd4b   :  { %14836 = vmatpush3.msra.mxu1 %v16838_v22  ;;  %14830 = vmatprep.subr.mxu0 %v16800_v57  ;;  %v10950_v5 = vsub.f32 %v10948_v4, %v10949_v63 }
 0xd4c   :  { %14845 = vmatprep.subr.mxu1 %v10451_v44  ;;  %14822 = vmatprep.mubr.f32.mxu0 %v9900_v37  ;;  %v11397_v37 = vand.u32 4294901760, %v16928_v6  ;;  %v11900_v61 = vand.u32 4294901760, %v11899_v47 }
 0xd4d   :  { %14837 = vmatprep.mubr.f32.mxu1 %v10403_v50  ;;  %14823 = vmatmul.mubr.f32.vlgmr.msra.gmra.mxu0 %v9910_v14  ;;  %v10951_v33 = vand.u32 4294901760, %v10950_v5  ;;  %v11819_v14 = vpop.permute.xlu0 %11818  ;;  %v12331_v50 = vld [vmem:[#allocation5 + $0xa90] sm:$0xff] }
 0xd4e   :  { %14831 = vmatpush3.msra.mxu0 %v16800_v57  ;;  %14838 = vmatmul.mubr.f32.vlgmr.msra.gmra.mxu1 %v10413_v3  ;;  %v10900_v57 = vand.u32 4294901760, %v10899_v59  ;;  %v11823_v12 = vsel %vm11822_vm6, %v11819_v14, %v11821_v21  ;;  %v11398_v20 = vsub.f32 %v16928_v6, %v11397_v37 }
 0xd4f   :  { %14846 = vmatpush3.msra.mxu1 %v10451_v44  ;;  %14840 = vmatprep.subr.mxu0 %v10454_v10 }
 0xd50   :  { %14855 = vmatprep.subr.mxu1 %v10452_v29  ;;  %14832 = vmatprep.mubr.f32.mxu0 %v16790_v46  ;;  %v10909_v46 = vsub.f32 %v16891_v31, %v10908_v45  ;;  %v11399_v42 = vand.u32 4294901760, %v11398_v20 }
 0xd51   :  { %14847 = vmatprep.mubr.f32.mxu1 %v16843_v18  ;;  %14833 = vmatmul.mubr.f32.vlgmr.msra.gmra.mxu0 %v16797_v16  ;;  %v16923_v16 = vand.u32 4294901760, %v11327_v49 }
 0xd52   :  { %14841 = vmatpush3.msra.mxu0 %v10454_v10  ;;  %14848 = vmatmul.mubr.f32.vlgmr.msra.gmra.mxu1 %v16848_v34  ;;  %v10910_v38 = vand.u32 4294901760, %v10909_v46 }
 0xd53   :  { %14856 = vmatpush3.msra.mxu1 %v10452_v29  ;;  %14850 = vmatprep.subr.mxu0 %v16838_v22  ;;  %v11447_v43 = vsub.f32 %v11327_v49, %v16923_v16 }
 0xd54   :  { %14865 = vmatprep.subr.mxu1 %v16881_v7  ;;  %14842 = vmatprep.mubr.f32.mxu0 %v16826_v9 }
 0xd55   :  { %14857 = vmatprep.mubr.f32.mxu1 %v16826_v9  ;;  %14843 = vmatmul.mubr.f32.vlgmr.msra.gmra.mxu0 %v16833_v58  ;;  %v11448_v15 = vand.u32 4294901760, %v11447_v43 }
 0xd56   :  { %14851 = vmatpush3.msra.mxu0 %v16838_v22  ;;  %14858 = vmatmul.mubr.f32.vlgmr.msra.gmra.mxu1 %v16833_v58 }
 0xd57   :  { %14866 = vmatpush3.msra.mxu1 %v16881_v7  ;;  %14860 = vmatprep.subr.mxu0 %v16838_v22  ;;  %v11449_v18 = vsub.f32 %v11447_v43, %v11448_v15 }
 0xd58   :  { %14875 = vmatprep.subr.mxu1 %v10948_v4  ;;  %14852 = vmatprep.mubr.f32.mxu0 %v10401_v0  ;;  %v11910_v0 = vand.u32 4294901760, %v11909_v13 }
 0xd59   :  { %14867 = vmatprep.mubr.f32.mxu1 %v10900_v57  ;;  %14853 = vmatmul.mubr.f32.vlgmr.msra.gmra.mxu0 %v10411_v55  ;;  %v11450_v44 = vand.u32 4294901760, %v11449_v18  ;;  %v11901_v55 = vsub.f32 %v11899_v47, %v11900_v61 }
 0xd5a   :  { %14861 = vmatpush3.msra.mxu0 %v16838_v22  ;;  %14868 = vmatmul.mubr.f32.vlgmr.msra.gmra.mxu1 %v10910_v38  ;;  %v11830_v22 = vsel %vm930_vm11, %v11823_v12, 0  ;;  %v11911_v8 = vsub.f32 %v11909_v13, %v11910_v0 }
 0xd5b   :  { %14876 = vmatpush3.msra.mxu1 %v10948_v4  ;;  %14870 = vmatprep.subr.mxu0 %v10951_v33  ;;  %v11902_v17 = vand.u32 4294901760, %v11901_v55 }
 0xd5c   :  { %14885 = vmatprep.subr.mxu1 %v10949_v63  ;;  %14862 = vmatprep.mubr.f32.mxu0 %v16826_v9  ;;  %v11408_v9 = vsub.f32 %v16933_v54, %v11407_v23 }
 0xd5d   :  { %14877 = vmatprep.mubr.f32.mxu1 %v16886_v36  ;;  %14863 = vmatmul.mubr.f32.vlgmr.msra.gmra.mxu0 %v16833_v58  ;;  %v16965_v58 = vand.u32 4294901760, %v11830_v22 }
 0xd5e   :  { %14871 = vmatpush3.msra.mxu0 %v10951_v33  ;;  %14878 = vmatmul.mubr.f32.vlgmr.msra.gmra.mxu1 %v16891_v31  ;;  %v11409_v34 = vand.u32 4294901760, %v11408_v9 }
 0xd5f   :  { %14886 = vmatpush3.msra.mxu1 %v10949_v63  ;;  %14880 = vmatprep.subr.mxu0 %v16881_v7  ;;  %v11950_v56 = vsub.f32 %v11830_v22, %v16965_v58 }
 0xd60   :  { %14895 = vmatprep.subr.mxu1 %v16923_v16  ;;  %14872 = vmatprep.mubr.f32.mxu0 %v16868_v53 }
 0xd61   :  { %14887 = vmatprep.mubr.f32.mxu1 %v16868_v53  ;;  %14873 = vmatmul.mubr.f32.vlgmr.msra.gmra.mxu0 %v16876_v1  ;;  %v11951_v19 = vand.u32 4294901760, %v11950_v56 }
 0xd62   :  { %14881 = vmatpush3.msra.mxu0 %v16881_v7  ;;  %14888 = vmatmul.mubr.f32.vlgmr.msra.gmra.mxu1 %v16876_v1 }
 0xd63   :  { %14896 = vmatpush3.msra.mxu1 %v16923_v16  ;;  %14890 = vmatprep.subr.mxu0 %v16881_v7  ;;  %v11952_v29 = vsub.f32 %v11950_v56, %v11951_v19 }
 0xd64   :  { %14905 = vmatprep.subr.mxu1 %v11447_v43  ;;  %14882 = vmatprep.mubr.f32.mxu0 %v10898_v39 }
 0xd65   :  { %14897 = vmatprep.mubr.f32.mxu1 %v11399_v42  ;;  %14883 = vmatmul.mubr.f32.vlgmr.msra.gmra.mxu0 %v10908_v45  ;;  %v11953_v2 = vand.u32 4294901760, %v11952_v29 }
 0xd66   :  { %14891 = vmatpush3.msra.mxu0 %v16881_v7  ;;  %14898 = vmatmul.mubr.f32.vlgmr.msra.gmra.mxu1 %v11409_v34  ;;  %v12332_v7 = vld [vmem:[#allocation5 + $0xaa0] sm:$0xff] }
 0xd67   :  { %14906 = vmatpush3.msra.mxu1 %v11447_v43  ;;  %14900 = vmatprep.subr.mxu0 %v11450_v44 }
 0xd68   :  { %14915 = vmatprep.subr.mxu1 %v11448_v15  ;;  %14892 = vmatprep.mubr.f32.mxu0 %v16868_v53  ;;  %v11912_v53 = vand.u32 4294901760, %v11911_v8 }
 0xd69   :  { %14907 = vmatprep.mubr.f32.mxu1 %v16928_v6  ;;  %14893 = vmatmul.mubr.f32.vlgmr.msra.gmra.mxu0 %v16876_v1  ;;  %v12333_v1 = vld [vmem:[#allocation5 + $0xab0] sm:$0xff] }
 0xd6a   :  { %14901 = vmatpush3.msra.mxu0 %v11450_v44  ;;  %14908 = vmatmul.mubr.f32.vlgmr.msra.gmra.mxu1 %v16933_v54 }
 0xd6b   :  { %14916 = vmatpush3.msra.mxu1 %v11448_v15  ;;  %14910 = vmatprep.subr.mxu0 %v16923_v16 }
 0xd6c   :  { %14925 = vmatprep.subr.mxu1 %v16965_v58  ;;  %14902 = vmatprep.mubr.f32.mxu0 %v16911_v40 }
 0xd6d   :  { %14917 = vmatprep.mubr.f32.mxu1 %v16911_v40  ;;  %14903 = vmatmul.mubr.f32.vlgmr.msra.gmra.mxu0 %v16918_v11 }
 0xd6e   :  { %14911 = vmatpush3.msra.mxu0 %v16923_v16  ;;  %14918 = vmatmul.mubr.f32.vlgmr.msra.gmra.mxu1 %v16918_v11 }
 0xd6f   :  { %14926 = vmatpush3.msra.mxu1 %v16965_v58  ;;  %14920 = vmatprep.subr.mxu0 %v16923_v16 }
 0xd70   :  { %14935 = vmatprep.subr.mxu1 %v11950_v56  ;;  %14912 = vmatprep.mubr.f32.mxu0 %v11397_v37 }
 0xd71   :  { %14927 = vmatprep.mubr.f32.mxu1 %v11902_v17  ;;  %14913 = vmatmul.mubr.f32.vlgmr.msra.gmra.mxu0 %v11407_v23 }
 0xd72   :  { %14921 = vmatpush3.msra.mxu0 %v16923_v16  ;;  %14928 = vmatmul.mubr.f32.vlgmr.msra.gmra.mxu1 %v11912_v53 }
 0xd73   :  { %14936 = vmatpush3.msra.mxu1 %v11950_v56  ;;  %14930 = vmatprep.subr.mxu0 %v11953_v2 }
 0xd74   :  { %14945 = vmatprep.subr.mxu1 %v11951_v19  ;;  %14922 = vmatprep.mubr.f32.mxu0 %v16911_v40 }
 0xd75   :  { %14937 = vmatprep.mubr.f32.mxu1 %v11899_v47  ;;  %14923 = vmatmul.mubr.f32.vlgmr.msra.gmra.mxu0 %v16918_v11 }
 0xd76   :  { %14931 = vmatpush3.msra.mxu0 %v11953_v2  ;;  %14938 = vmatmul.mubr.f32.vlgmr.msra.gmra.mxu1 %v11909_v13 }
 0xd77   :  { %14946 = vmatpush3.msra.mxu1 %v11951_v19  ;;  %14940 = vmatprep.subr.mxu0 %v16965_v58 }
 0xd78   :  { %14932 = vmatprep.mubr.f32.mxu0 %v16953_v24  ;;  %14947 = vmatprep.mubr.f32.mxu1 %v16953_v24 }
 0xd79   :  { %14933 = vmatmul.mubr.f32.vlgmr.msra.gmra.mxu0 %v16960_v62  ;;  %14955 = vmatprep.subr.msk.mxu1 %vm283_vm2, %v12334_v32 }
 0xd7a   :  { %14941 = vmatpush3.msra.mxu0 %v16965_v58  ;;  %14942 = vmatprep.mubr.f32.mxu0 %v11900_v61 }
 0xd7b   :  { %14950 = vmatprep.subr.mxu0 %v16965_v58  ;;  %14948 = vmatmul.mubr.f32.vlgmr.msra.gmra.mxu1 %v16960_v62 }
 0xd7c   :  { %14956 = vmatpush3.msk.msra.mxu1 %vm283_vm2, %v12334_v32 }
 0xd7d   :  { %14943 = vmatmul.mubr.f32.vlgmr.msra.gmra.mxu0 %v11910_v0  ;;  %14957 = vmatprep.subr.mxu1 %v12333_v1 }
 0xd7e   :  { %14951 = vmatpush3.msra.mxu0 %v16965_v58  ;;  %14952 = vmatprep.mubr.f32.mxu0 %v16953_v24 }
 0xd7f   :  { %14958 = vmatpush3.msra.mxu1 %v12333_v1 }
 0xd80   :  { %14959 = vmatprep.subr.mxu1 %v12332_v7 }
 0xd81   :  { %14953 = vmatmul.mubr.f32.vlgmr.msra.gmra.mxu0 %v16960_v62  ;;  %14960 = vmatpush3.msra.mxu1 %v12332_v7 }
 0xd82   :  { %14961 = vmatprep.subr.mxu1 %v12331_v50 }
 0xd83   :  { %14962 = vmatpush3.msra.mxu1 %v12331_v50 }
 0xde9   :  { %v14749_v41 = vpop.f32.mrf.mxu1 }
 0xdeb   :  { %v8897_v36 = vpop.f32.mrf.mxu1 }
 0xded   :  { %v14759_v3 = vpop.f32.mrf.mxu1 }
 0xdef   :  { %v9063_v31 = vpop.f32.mrf.mxu1 }
 0xdf1   :  { %v14754_v48 = vpop.f32.mrf.mxu0 }
 0xdf2   :  { %v17013_v51 = vpop.f32.mrf.mxu1  ;;  %v8990_v55 = vadd.f32 %v14754_v48, %v14749_v41 }
 0xdf3   :  { %v8983_v10 = vpop.f32.mrf.mxu0 }
 0xdf4   :  { %v17015_v4 = vpop.f32.mrf.mxu1  ;;  %v8984_v8 = vadd.f32 %v8983_v10, %v8897_v36  ;;  %v9071_v1 = vadd.f32 %v14759_v3, %v8990_v55 }
 0xdf5   :  { %v14764_v39 = vpop.f32.mrf.mxu0 }
 0xdf6   :  { %v14779_v45 = vpop.f32.mrf.mxu1  ;;  %v9064_v50 = vadd.f32 %v9063_v31, %v8984_v8  ;;  %v9153_v35 = vadd.f32 %v14764_v39, %v9071_v1 }
 0xdf7   :  { %v9144_v52 = vpop.f32.mrf.mxu0 }
 0xdf8   :  { %v9400_v26 = vpop.f32.mrf.mxu1  ;;  %v9145_v10 = vadd.f32 %v9144_v52, %v9064_v50  ;;  %v9233_v31 = vadd.f32 %v17013_v51, %v9153_v35 }
 0xdf9   :  { %v17017_v28 = vpop.f32.mrf.mxu0 }
 0xdfa   :  { %v14789_v59 = vpop.f32.mrf.mxu1 }
 0xdfb   :  { %v17019_v63 = vpop.f32.mrf.mxu0 }
 0xdfc   :  { %v9566_v40 = vpop.f32.mrf.mxu1 }
 0xdfd   :  { %v14784_v49 = vpop.f32.mrf.mxu0 }
 0xdfe   :  { %v14799_v46 = vpop.f32.mrf.mxu1  ;;  %v9493_v56 = vadd.f32 %v14784_v49, %v14779_v45 }
 0xdff   :  { %v9486_v11 = vpop.f32.mrf.mxu0 }
 0xe00   :  { %v9729_v16 = vpop.f32.mrf.mxu1  ;;  %v9487_v61 = vadd.f32 %v9486_v11, %v9400_v26  ;;  %v9574_v29 = vadd.f32 %v14789_v59, %v9493_v56 }
 0xe01   :  { %v14794_v57 = vpop.f32.mrf.mxu0 }
 0xe02   :  { %v14809_v5 = vpop.f32.mrf.mxu1  ;;  %v9567_v2 = vadd.f32 %v9566_v40, %v9487_v61  ;;  %v9656_v49 = vadd.f32 %v14794_v57, %v9574_v29  ;;  %v9227_v57 = vadd.f32 %v17015_v4, %v9145_v10 }
 0xe03   :  { %v9647_v6 = vpop.f32.mrf.mxu0 }
 0xe04   :  { %v9904_v38 = vpop.f32.mrf.mxu1  ;;  %v9648_v11 = vadd.f32 %v9647_v6, %v9567_v2  ;;  %v9736_v56 = vadd.f32 %v14799_v46, %v9656_v49  ;;  %v9311_v46 = vadd.f32 %v17017_v28, %v9233_v31 }
 0xe05   :  { %v14804_v54 = vpop.f32.mrf.mxu0 }
 0xe06   :  { %v14819_v30 = vpop.f32.mrf.mxu1  ;;  %v9730_v61 = vadd.f32 %v9729_v16, %v9648_v11  ;;  %v9305_v16 = vadd.f32 %v17019_v63, %v9227_v57 }
 0xe07   :  { %v9807_v21 = vpop.f32.mrf.mxu0 }
 0xe08   :  { %v10070_v27 = vpop.f32.mrf.mxu1  ;;  %v9808_v29 = vadd.f32 %v9807_v21, %v9730_v61 }
 0xe09   :  { %v14814_v43 = vpop.f32.mrf.mxu0 }
 0xe0a   :  { %v17021_v33 = vpop.f32.mrf.mxu1  ;;  %v9997_v41 = vadd.f32 %v14814_v43, %v14809_v5  ;;  %v9814_v43 = vadd.f32 %v14804_v54, %v9736_v56 }
 0xe0b   :  { %v9990_v37 = vpop.f32.mrf.mxu0 }
 0xe0c   :  { %v17023_v14 = vpop.f32.mrf.mxu1  ;;  %v10078_v3 = vadd.f32 %v14819_v30, %v9997_v41 }
 0xe0d   :  { %v14824_v23 = vpop.f32.mrf.mxu0 }
 0xe0e   :  { %v17025_v25 = vpop.f32.mrf.mxu1  ;;  %v10160_v52 = vadd.f32 %v14824_v23, %v10078_v3 }
 0xe0f   :  { %v10151_v12 = vpop.f32.mrf.mxu0 }
 0xe10   :  { %v17027_v60 = vpop.f32.mrf.mxu1  ;;  %v10240_v4 = vadd.f32 %v17021_v33, %v10160_v52 }
 0xe11   :  { %v17029_v20 = vpop.f32.mrf.mxu0 }
 0xe12   :  { %v17031_v15 = vpop.f32.mrf.mxu1  ;;  %v10318_v10 = vadd.f32 %v17029_v20, %v10240_v4 }
 0xe13   :  { %v17033_v24 = vpop.f32.mrf.mxu0 }
 0xe14   :  { %v17035_v22 = vpop.f32.mrf.mxu1 }
 0xe15   :  { %v14844_v9 = vpop.f32.mrf.mxu0 }
 0xe16   :  { %v17037_v62 = vpop.f32.mrf.mxu1  ;;  %v10498_v54 = vadd.f32 %v14844_v9, %v17025_v25 }
 0xe17   :  { %v17039_v58 = vpop.f32.mrf.mxu0 }
 0xe18   :  { %v17041_v42 = vpop.f32.mrf.mxu1  ;;  %v10492_v63 = vadd.f32 %v17039_v58, %v17027_v60  ;;  %v10579_v33 = vadd.f32 %v17031_v15, %v10498_v54 }
 0xe19   :  { %v17043_v18 = vpop.f32.mrf.mxu0 }
 0xe1a   :  { %v14869_v47 = vpop.f32.mrf.mxu1  ;;  %v10661_v3 = vadd.f32 %v17043_v18, %v10579_v33  ;;  %v17199_v33 = vmov 0.0  }
 0xe1b   :  { %v17045_v34 = vpop.f32.mrf.mxu0  ;;  %v10913_v51 = vadd.f32 %v14869_v47, %v9311_v46 }
 0xe1c   :  { %v10902_v13 = vpop.f32.mrf.mxu1 }
 0xe1d   :  { %v17047_v44 = vpop.f32.mrf.mxu0 }
 0xe1e   :  { %v17049_v0 = vpop.f32.mrf.mxu1 }
 0xe1f   :  { %v17051_v19 = vpop.f32.mrf.mxu0 }
 0xe20   :  { %17197 = vst [vmem:[#allocation11_spill] sm:$0xff] %v17051_v19  ;;  %v17053_v17 = vpop.f32.mrf.mxu1  ;;  %v9991_v19 = vadd.f32 %v9990_v37, %v9904_v38 }
 0xe21   :  { %v14874_v53 = vpop.f32.mrf.mxu0 }
 0xe22   :  { %v17055_v32 = vpop.f32.mrf.mxu1  ;;  %v10071_v6 = vadd.f32 %v10070_v27, %v9991_v19  ;;  %v10903_v27 = vadd.f32 %v10902_v13, %v9305_v16  ;;  %v10995_v19 = vadd.f32 %v14874_v53, %v10913_v51 }
 0xe23   :  { %v10988_v7 = vpop.f32.mrf.mxu0 }
 0xe24   :  { %v17057_v45 = vpop.f32.mrf.mxu1  ;;  %v10152_v30 = vadd.f32 %v10151_v12, %v10071_v6  ;;  %v10989_v12 = vadd.f32 %v10988_v7, %v10903_v27  ;;  %v11076_v9 = vadd.f32 %v17049_v0, %v10995_v19 }
 0xe25   :  { %v17059_v26 = vpop.f32.mrf.mxu0 }
 0xe26   :  { %v14899_v48 = vpop.f32.mrf.mxu1  ;;  %v10234_v28 = vadd.f32 %v17023_v14, %v10152_v30  ;;  %v10572_v14 = vadd.f32 %v17035_v22, %v10492_v63  ;;  %v11069_v56 = vadd.f32 %v17053_v17, %v10989_v12  ;;  %v11158_v31 = vadd.f32 %v17059_v26, %v11076_v9 }
 0xe27   :  { %v11149_v36 = vpop.f32.mrf.mxu0  ;;  %v11412_v37 = vadd.f32 %v14899_v48, %v9814_v43  ;;  %v17198_v4 = vld [vmem:[#allocation11_spill] sm:$0xff] }
 0xe28   :  { %v11401_v59 = vpop.f32.mrf.mxu1  ;;  %v10312_v53 = vadd.f32 %v17033_v24, %v10234_v28  ;;  %v10653_v0 = vadd.f32 %v17045_v34, %v10572_v14  ;;  %v11150_v6 = vadd.f32 %v11149_v36, %v11069_v56  ;;  %v11238_v18 = vadd.f32 %v17055_v32, %v11158_v31  ;;  %v12328_v28 = vld [vmem:[#allocation5 + $0xa80] sm:$0x3f]  ;;  %v12425_v14 = vld [vmem:[#allocation5 + $0xb30] sm:$0xff] }
 0xe29   :  { %v17061_v40 = vpop.f32.mrf.mxu0  ;;  %v11402_v1 = vadd.f32 %v11401_v59, %v9808_v29  ;;  %v12426_v56 = vld [vmem:[#allocation5 + $0xb40] sm:$0xf] }
 0xe2a   :  { %v14909_v55 = vpop.f32.mrf.mxu1  ;;  %v11232_v26 = vadd.f32 %v17057_v45, %v11150_v6 }
 0xe2b   :  { %v17064_v8 = vpop.f32.mrf.mxu0 }
 0xe2c   :  { %v11567_v5 = vpop.f32.mrf.mxu1  ;;  %v11310_v54 = vadd.f32 %v17064_v8, %v11232_v26 }
 0xe2d   :  { %v14904_v39 = vpop.f32.mrf.mxu0 }
 0xe2e   :  { %v14919_v38 = vpop.f32.mrf.mxu1  ;;  %v11494_v50 = vadd.f32 %v14904_v39, %v11412_v37  ;;  %v10741_v39 = vadd.f32 %v17037_v62, %v10661_v3  ;;  %v12646_v3 = vld [vmem:[#allocation5 + $0xb70] sm:$0xff] }
 0xe2f   :  { %v11487_v2 = vpop.f32.mrf.mxu0 }
 0xe30   :  { %v11730_v35 = vpop.f32.mrf.mxu1  ;;  %v11488_v21 = vadd.f32 %v11487_v2, %v11402_v1  ;;  %v11575_v48 = vadd.f32 %v14909_v55, %v11494_v50  ;;  %v10735_v2 = vadd.f32 %v17041_v42, %v10653_v0 }
 0xe31   :  { %v14914_v49 = vpop.f32.mrf.mxu0 }
 0xe32   :  { %v14929_v23 = vpop.f32.mrf.mxu1  ;;  %v11568_v59 = vadd.f32 %v11567_v5, %v11488_v21  ;;  %v11657_v58 = vadd.f32 %v14914_v49, %v11575_v48  ;;  %v10813_v32 = vadd.f32 %v17198_v4, %v10735_v2  ;;  %v12750_v4 = vld [vmem:[#allocation5 + $0xbe0] sm:$0xff] }
 0xe33   :  { %v11648_v11 = vpop.f32.mrf.mxu0  ;;  %v11915_v60 = vadd.f32 %v14929_v23, %v10318_v10  ;;  %v12421_v10 = vld [vmem:[#allocation5 + $0xaf0] sm:$0xff] }
 0xe34   :  { %v11904_v41 = vpop.f32.mrf.mxu1  ;;  %v11649_v20 = vadd.f32 %v11648_v11, %v11568_v59  ;;  %v11737_v22 = vadd.f32 %v14919_v38, %v11657_v58  ;;  %v10819_v38 = vadd.f32 %v17047_v44, %v10741_v39  ;;  %v12327_v11 = vld [vmem:[#allocation5 + $0xa70] sm:$0xff]  ;;  %v12422_v59 = vld [vmem:[#allocation5 + $0xb00] sm:$0xf] }
 0xe35   :  { %v14924_v47 = vpop.f32.mrf.mxu0  ;;  %v11905_v55 = vadd.f32 %v11904_v41, %v10312_v53  ;;  %v12423_v41 = vld [vmem:[#allocation5 + $0xb10] sm:$0xff]  ;;  %v12651_v53 = vld [vmem:[#allocation5 + $0xbc0] sm:$0xff] }
 0xe36   :  { %v14939_v25 = vpop.f32.mrf.mxu1  ;;  %v11731_v29 = vadd.f32 %v11730_v35, %v11649_v20  ;;  %v11815_v36 = vadd.f32 %v14924_v47, %v11737_v22  ;;  %v11316_v35 = vadd.f32 %v17061_v40, %v11238_v18  ;;  %v12419_v40 = vld [vmem:[#allocation5 + $0xad0] sm:$0xff]  ;;  %14970 = vmatprep.mubr.msk.f32.mxu0 %vm1449_vm14, %v12423_v41  ;;  %v12420_v47 = vld [vmem:[#allocation5 + $0xae0] sm:$0xff] }
 0xe37   :  { %v11808_v13 = vpop.f32.mrf.mxu0  ;;  %v12649_v58 = vld [vmem:[#allocation5 + $0xba0] sm:$0xff]  ;;  %v12761_v41 = vld [vmem:[#allocation5 + $0xc90] sm:$0xff] }
 0xe38   :  { %v12070_v61 = vpop.f32.mrf.mxu1  ;;  %v11809_v51 = vadd.f32 %v11808_v13, %v11731_v29  ;;  %v12322_v45 = vadd.f32 %v11815_v36, %v11316_v35  ;;  %v12424_v13 = vld [vmem:[#allocation5 + $0xb20] sm:$0xff] }
 0xe39   :  { %v14934_v7 = vpop.f32.mrf.mxu0  ;;  %v12645_v20 = vld [vmem:[#allocation5 + $0xb60] sm:$0xff] }
 0xe3a   :  { %v11997_v15 = vadd.f32 %v14934_v7, %v11915_v60  ;;  %v12321_v21 = vadd.f32 %v11809_v51, %v11310_v54  ;;  %v12650_v60 = vld [vmem:[#allocation5 + $0xbb0] sm:$0xff]  ;;  %v12752_v54 = vld [vmem:[#allocation5 + $0xc00] sm:$0xff] }
 0xe3b   :  { %v11990_v57 = vpop.f32.mrf.mxu0  ;;  %v14949_v17 = vpop.f32.mrf.mxu1  ;;  %v12648_v7 = vld [vmem:[#allocation5 + $0xb90] sm:$0xff] }
 0xe3c   :  { %v11991_v24 = vadd.f32 %v11990_v57, %v11905_v55  ;;  %v12078_v5 = vadd.f32 %v14939_v25, %v11997_v15  ;;  %v12632_v57 = vld [vmem:[#allocation5 + $0xb50] ss:$0 sm:$0xff] }
 0xe3d   :  { %v14944_v43 = vpop.f32.mrf.mxu0  ;;  %v12233_v30 = vpop.f32.mrf.mxu1 }
 0xe3e   :  { %v12071_v52 = vadd.f32 %v12070_v61, %v11991_v24  ;;  %v12160_v46 = vadd.f32 %v14944_v43, %v12078_v5  ;;  %v12647_v61 = vld [vmem:[#allocation5 + $0xb80] sm:$0xff] }
 0xe3f   :  { %v12151_v37 = vpop.f32.mrf.mxu0 }
 0xe40   :  { %v12152_v16 = vadd.f32 %v12151_v37, %v12071_v52  ;;  %v12240_v34 = vadd.f32 %v14949_v17, %v12160_v46 }
 0xe41   :  { %v14954_v1 = vpop.f32.mrf.mxu0 }
 0xe42   :  { %v12234_v50 = vadd.f32 %v12233_v30, %v12152_v16  ;;  %v12318_v62 = vadd.f32 %v14954_v1, %v12240_v34 }
 0xe43   :  { %v12311_v49 = vpop.f32.mrf.mxu0 }
 0xe44   :  { %v12324_v42 = vadd.f32 %v12318_v62, %v10819_v38  ;;  %v12312_v27 = vadd.f32 %v12311_v49, %v12234_v50  ;;  %v12749_v49 = vld [vmem:[#allocation5 + $0xbd0] sm:$0xff] }
 0xe46   :  { %v12323_v23 = vadd.f32 %v12312_v27, %v10813_v32  ;;  %v12326_v19 = vadd.f32 %v12324_v42, %v12322_v45  ;;  %v12751_v32 = vld [vmem:[#allocation5 + $0xbf0] sm:$0xff]  ;;  %v12754_v27 = vld [vmem:[#allocation5 + $0xc20] sm:$0xff] }
 0xe47   :  { %v12753_v42 = vld [vmem:[#allocation5 + $0xc10] sm:$0xff] }
 0xe48   :  { %v12325_v63 = vadd.f32 %v12323_v23, %v12321_v21  ;;  %v12330_v12 = vadd.f32 %v12328_v28, %v12326_v19  ;;  %v12755_v45 = vld [vmem:[#allocation5 + $0xc30] sm:$0xff] }
 0xe4a   :  { %v12329_v44 = vadd.f32 %v12327_v11, %v12325_v63  ;;  %v12756_v11 = vld [vmem:[#allocation5 + $0xc40] sm:$0xff]  ;;  %v12757_v63 = vld [vmem:[#allocation5 + $0xc50] sm:$0xff] }
 0xe4c   :  { %14963 = vmatprep.mubr.msk.f32.mxu1 %vm233_vm4, %v12329_v44  ;;  %v12758_v44 = vld [vmem:[#allocation5 + $0xc60] sm:$0xff] }
 0xe4d   :  { %14964 = vmatmul.mubr.msk.f32.vlgmr.msra.gmra.mxu1 %vm233_vm4, %v12330_v12  ;;  %v12759_v12 = vld [vmem:[#allocation5 + $0xc70] sm:$0xff] }
 0xe4e   :  { %14980 = vmatprep.mubr.msk.f32.mxu1 %vm1449_vm14, %v12419_v40  ;;  %v12760_v40 = vld [vmem:[#allocation5 + $0xc80] sm:$0xff] }
 0xf0d   :  { %v14965_v8 = vpop.f32.mrf.mxu1 }
 0xf0e   :  { %12431 = vrot.lane.b32.xlu0 %v14965_v8, %s15199_s28  ;;  %14976 = vmatprep.subr.msk.mxu1 %vm1453_vm15, %v14965_v8 }
 0xf0f   :  { %v12410_v48 = vpop.f32.mrf.mxu1  ;;  %14977 = vmatpush3.msk.msra.mxu1 %vm1453_vm15, %v14965_v8  ;;  %v12762_v8 = vld [vmem:[#allocation5 + $0xca0] sm:$0xff] }
 0xf10   :  { %12429 = vrot.lane.b32.xlu1 %v12410_v48, %s15199_s28  ;;  %14978 = vmatprep.subr.mxu1 %v12410_v48 }
 0xf11   :  { %14979 = vmatpush3.msra.mxu1 %v12410_v48 }
 0xf12   :  { %14981 = vmatmul.mubr.msk.f32.vlgmr.msra.gmra.mxu1 %vm1449_vm14, %v12420_v47  ;;  %15006 = vmatprep.subr.mxu1 %v17199_v33 }
 0xf13   :  { %14983 = vmatprep.mubr.msk.f32.mxu1 %vm1449_vm14, %v12421_v10 }
 0xf16   :  { %14984 = vmatmul.mubr.msk.f32.gmra.mxu1 %vm1449_vm14, %v12422_v59 }
 0xf17   :  { %15014 = vmatprep.mubr.msk.f32.mxu1 %vm15192_vm3, %v17199_v33 }
 0xf80   :  { %v12432_v25 = vpop.permute.xlu0 %12431 }
 0xf81   :  { %14966 = vmatprep.subr.msk.mxu0 %vm1453_vm15, %v12432_v25 }
 0xf82   :  { %14967 = vmatpush3.msk.msra.mxu0 %vm1453_vm15, %v12432_v25  ;;  %v12430_v9 = vpop.permute.xlu1 %12429 }
 0xf83   :  { %14968 = vmatprep.subr.mxu0 %v12430_v9 }
 0xf84   :  { %14969 = vmatpush3.msra.mxu0 %v12430_v9 }
 0xf85   :  { %14971 = vmatmul.mubr.msk.f32.vlgmr.msra.gmra.mxu0 %vm1449_vm14, %v12424_v13  ;;  %14986 = vmatprep.subr.mxu0 %v12651_v53 }
 0xf86   :  { %14973 = vmatprep.mubr.msk.f32.mxu0 %vm1449_vm14, %v12425_v14  ;;  %14987 = vmatpush3.msra.mxu0 %v12651_v53 }
 0xf87   :  { %14988 = vmatprep.subr.mxu0 %v12650_v60 }
 0xf88   :  { %14989 = vmatpush3.msra.mxu0 %v12650_v60 }
 0xf89   :  { %14974 = vmatmul.mubr.msk.f32.gmra.mxu0 %vm1449_vm14, %v12426_v56  ;;  %14990 = vmatprep.subr.mxu0 %v12649_v58 }
 0xf8a   :  { %14991 = vmatpush3.msra.mxu0 %v12649_v58 }
 0xf8b   :  { %14992 = vmatprep.subr.mxu0 %v12648_v7 }
 0xf8c   :  { %14993 = vmatpush3.msra.mxu0 %v12648_v7 }
 0xf8d   :  { %14994 = vmatprep.subr.mxu0 %v12647_v61 }
 0xf8e   :  { %14995 = vmatpush3.msra.mxu0 %v12647_v61 }
 0xf8f   :  { %14996 = vmatprep.subr.mxu0 %v12646_v3 }
 0xf90   :  { %14997 = vmatpush3.msra.mxu0 %v12646_v3 }
 0xf91   :  { %14998 = vmatprep.subr.mxu0 %v12645_v20 }
 0xf92   :  { %14999 = vmatpush3.msra.mxu0 %v12645_v20  ;;  %v13024_v20 = vld [vmem:[#allocation5 + $0xcb0] ss:$0 sm:$0xff] }
 0xf93   :  { %15035 = vmatprep.subr.mxu0 %v17199_v33 }
 0xfd2   :  { %v14982_v55 = vpop.f32.mrf.mxu1 }
 0xfd4   :  { %v12613_v15 = vpop.f32.mrf.mxu1 }
 0xfd6   :  { %v14985_v24 = vpop.f32.mrf.mxu1 }
 0xfd8   :  { %v12623_v46 = vpop.f32.mrf.mxu1 }
0x1045   :  { %v14972_v31 = vpop.f32.mrf.mxu0 }
0x1046   :  { %v12619_v0 = vadd.f32 %v14982_v55, %v14972_v31 }
0x1047   :  { %v12514_v6 = vpop.f32.mrf.mxu0 }
0x1048   :  { %v12634_v5 = vadd.f32 %v12632_v57, %v12619_v0  ;;  %v12614_v22 = vadd.f32 %v12613_v15, %v12514_v6 }
0x1049   :  { %v14975_v43 = vpop.f32.mrf.mxu0 }
0x104a   :  { %v12633_v17 = vadd.f32 %v12632_v57, %v12614_v22  ;;  %v12629_v39 = vadd.f32 %v14985_v24, %v14975_v43  ;;  %v12638_v29 = vmul.f32 0.01, %v12634_v5 }
0x104b   :  { %v12524_v52 = vpop.f32.mrf.mxu0 }
0x104c   :  { %v12637_v18 = vmul.f32 0.01, %v12633_v17  ;;  %v12636_v37 = vadd.f32 %v12632_v57, %v12629_v39  ;;  %v12624_v2 = vadd.f32 %v12623_v46, %v12524_v52  ;;  %v12642_v34 = vmax.f32 %v12634_v5, %v12638_v29 }
0x104e   :  { %v12641_v26 = vmax.f32 %v12633_v17, %v12637_v18  ;;  %v12635_v16 = vadd.f32 %v12632_v57, %v12624_v2  ;;  %v12640_v36 = vmul.f32 0.01, %v12636_v37 }
0x1050   :  { %v12639_v30 = vmul.f32 0.01, %v12635_v16  ;;  %15000 = vmatprep.mubr.msk.f32.mxu0 %vm241_vm5, %v12641_v26  ;;  %v12644_v38 = vmax.f32 %v12636_v37, %v12640_v36 }
0x1051   :  { %15001 = vmatmul.mubr.msk.f32.vlgmr.msra.gmra.mxu0 %vm241_vm5, %v12642_v34 }
0x1052   :  { %v12643_v1 = vmax.f32 %v12635_v16, %v12639_v30 }
0x1054   :  { %15003 = vmatprep.mubr.msk.f32.mxu0 %vm241_vm5, %v12643_v1 }
0x1055   :  { %15004 = vmatmul.mubr.msk.f32.gmra.mxu0 %vm241_vm5, %v12644_v38 }
0x1056   :  { %15043 = vmatprep.mubr.msk.f32.mxu0 %vm15192_vm3, %v17199_v33 }
0x1111   :  { %v15002_v51 = vpop.f32.mrf.mxu0 }
0x1113   :  { %v12730_v50 = vpop.f32.mrf.mxu0 }
0x1115   :  { %v15005_v62 = vpop.f32.mrf.mxu0 }
0x1116   :  { %12773 = vrot.lane.b32.xlu0 %v15005_v62, %s15196_s25  ;;  %15036 = vmatpush3.msk.msra.mxu0 %vm283_vm2, %v15005_v62 }
0x1117   :  { %v12740_v35 = vpop.f32.mrf.mxu0  ;;  %15037 = vmatprep.subr.mxu0 %v17199_v33 }
0x1118   :  { %12771 = vrot.lane.b32.xlu1 %v12740_v35, %s15196_s25  ;;  %15038 = vmatpush3.msra.mxu0 %v12740_v35 }
0x1119   :  { %15039 = vmatprep.subr.mxu0 %v17199_v33 }
0x111a   :  { %12769 = vrot.lane.b32.xlu0 %v15002_v51, %s15196_s25  ;;  %15040 = vmatpush3.msra.mxu0 %v15002_v51 }
0x111b   :  { %15041 = vmatprep.subr.mxu0 %v17199_v33 }
0x111c   :  { %12767 = vrot.lane.b32.xlu1 %v12730_v50, %s15196_s25  ;;  %15042 = vmatpush3.msra.mxu0 %v12730_v50 }
0x111d   :  { %15044 = vmatmul.mubr.msk.f32.vlgmr.msra.gmra.mxu0 %vm233_vm4, %v12749_v49 }
0x111e   :  { %15046 = vmatprep.mubr.msk.f32.mxu0 %vm15192_vm3, %v17199_v33 }
0x1121   :  { %15047 = vmatmul.mubr.msk.f32.gmra.mxu0 %vm233_vm4, %v12750_v4 }
0x1122   :  { %15049 = vmatprep.mubr.msk.f32.mxu0 %vm15192_vm3, %v17199_v33 }
0x1125   :  { %15050 = vmatmul.mubr.msk.f32.gmra.mxu0 %vm233_vm4, %v12751_v32 }
0x1126   :  { %15052 = vmatprep.mubr.msk.f32.mxu0 %vm15192_vm3, %v17199_v33 }
0x1129   :  { %15053 = vmatmul.mubr.msk.f32.gmra.mxu0 %vm233_vm4, %v12752_v54 }
0x112a   :  { %15055 = vmatprep.mubr.msk.f32.mxu0 %vm15192_vm3, %v17199_v33 }
0x112d   :  { %15056 = vmatmul.mubr.msk.f32.gmra.mxu0 %vm233_vm4, %v12753_v42 }
0x112e   :  { %15058 = vmatprep.mubr.msk.f32.mxu0 %vm15192_vm3, %v17199_v33 }
0x1131   :  { %15059 = vmatmul.mubr.msk.f32.gmra.mxu0 %vm233_vm4, %v12754_v27 }
0x1132   :  { %15061 = vmatprep.mubr.msk.f32.mxu0 %vm15192_vm3, %v17199_v33 }
0x1135   :  { %15062 = vmatmul.mubr.msk.f32.gmra.mxu0 %vm233_vm4, %v12755_v45 }
0x1188   :  { %v12774_v21 = vpop.permute.xlu0 %12773 }
0x1189   :  { %15007 = vmatpush3.msk.msra.mxu1 %vm283_vm2, %v12774_v21 }
0x118a   :  { %15008 = vmatprep.subr.mxu1 %v17199_v33  ;;  %v12772_v23 = vpop.permute.xlu1 %12771 }
0x118b   :  { %15009 = vmatpush3.msra.mxu1 %v12772_v23 }
0x118c   :  { %v12770_v19 = vpop.permute.xlu0 %12769  ;;  %15010 = vmatprep.subr.mxu1 %v17199_v33 }
0x118d   :  { %15011 = vmatpush3.msra.mxu1 %v12770_v19 }
0x118e   :  { %15012 = vmatprep.subr.mxu1 %v17199_v33  ;;  %v12768_v28 = vpop.permute.xlu1 %12767 }
0x118f   :  { %15013 = vmatpush3.msra.mxu1 %v12768_v28 }
0x1190   :  { %15015 = vmatmul.mubr.msk.f32.vlgmr.msra.gmra.mxu1 %vm233_vm4, %v12756_v11 }
0x1191   :  { %15017 = vmatprep.mubr.msk.f32.mxu1 %vm15192_vm3, %v17199_v33 }
0x1194   :  { %15018 = vmatmul.mubr.msk.f32.gmra.mxu1 %vm233_vm4, %v12757_v63 }
0x1195   :  { %15020 = vmatprep.mubr.msk.f32.mxu1 %vm15192_vm3, %v17199_v33 }
0x1198   :  { %15021 = vmatmul.mubr.msk.f32.gmra.mxu1 %vm233_vm4, %v12758_v44 }
0x1199   :  { %15023 = vmatprep.mubr.msk.f32.mxu1 %vm15192_vm3, %v17199_v33 }
0x119c   :  { %15024 = vmatmul.mubr.msk.f32.gmra.mxu1 %vm233_vm4, %v12759_v12 }
0x119d   :  { %15026 = vmatprep.mubr.msk.f32.mxu1 %vm15192_vm3, %v17199_v33 }
0x11a0   :  { %15027 = vmatmul.mubr.msk.f32.gmra.mxu1 %vm233_vm4, %v12760_v40 }
0x11a1   :  { %15029 = vmatprep.mubr.msk.f32.mxu1 %vm15192_vm3, %v17199_v33 }
0x11a4   :  { %15030 = vmatmul.mubr.msk.f32.gmra.mxu1 %vm233_vm4, %v12761_v41 }
0x11a5   :  { %15032 = vmatprep.mubr.msk.f32.mxu1 %vm15192_vm3, %v17199_v33 }
0x11a8   :  { %15033 = vmatmul.mubr.msk.f32.gmra.mxu1 %vm233_vm4, %v12762_v8 }
0x11dd   :  { %v12990_v48 = vpop.f32.mrf.mxu0 }
0x11df   :  { %v15045_v47 = vpop.f32.mrf.mxu0 }
0x11e1   :  { %v12995_v10 = vpop.f32.mrf.mxu0 }
0x11e3   :  { %v15048_v59 = vpop.f32.mrf.mxu0 }
0x11e5   :  { %v13000_v25 = vpop.f32.mrf.mxu0 }
0x11e7   :  { %v15051_v9 = vpop.f32.mrf.mxu0 }
0x11e9   :  { %v13005_v13 = vpop.f32.mrf.mxu0 }
0x11eb   :  { %v15054_v53 = vpop.f32.mrf.mxu0 }
0x11ed   :  { %v13010_v14 = vpop.f32.mrf.mxu0 }
0x11ef   :  { %v15057_v56 = vpop.f32.mrf.mxu0 }
0x11f1   :  { %v13015_v60 = vpop.f32.mrf.mxu0 }
0x11f3   :  { %v15060_v58 = vpop.f32.mrf.mxu0 }
0x11f5   :  { %v13020_v7 = vpop.f32.mrf.mxu0 }
0x11f7   :  { %v15063_v61 = vpop.f32.mrf.mxu0 }
0x1250   :  { %v12867_v3 = vpop.f32.mrf.mxu1 }
0x1251   :  { %v12991_v33 = vadd.f32 %v12990_v48, %v12867_v3 }
0x1252   :  { %v15016_v55 = vpop.f32.mrf.mxu1 }
0x1253   :  { %v13025_v15 = vadd.f32 %v13024_v20, %v12991_v33 }
0x1254   :  { %v12872_v31 = vpop.f32.mrf.mxu1 }
0x1255   :  { %v13032_v57 = vsub.f32 0.0, %v13025_v15  ;;  %v12996_v0 = vadd.f32 %v12995_v10, %v12872_v31 }
0x1256   :  { %v15019_v6 = vpop.f32.mrf.mxu1 }
0x1257   :  { %v13039_v24 = vmul.f32 1.442695, %v13032_v57  ;;  %v13026_v5 = vadd.f32 %v13024_v20, %v12996_v0 }
0x1258   :  { %v12877_v22 = vpop.f32.mrf.mxu1 }
0x1259   :  { %15089 = vpow2.f32 %v13039_v24  ;;  %v13033_v43 = vsub.f32 0.0, %v13026_v5  ;;  %v13001_v17 = vadd.f32 %v13000_v25, %v12877_v22 }
0x125a   :  { %v15022_v39 = vpop.f32.mrf.mxu1 }
0x125b   :  { %v13041_v29 = vmul.f32 1.442695, %v13033_v43  ;;  %v13027_v52 = vadd.f32 %v13024_v20, %v13001_v17 }
0x125c   :  { %v12882_v46 = vpop.f32.mrf.mxu1 }
0x125d   :  { %15091 = vpow2.f32 %v13041_v29  ;;  %v13034_v18 = vsub.f32 0.0, %v13027_v52  ;;  %v13006_v37 = vadd.f32 %v13005_v13, %v12882_v46 }
0x125e   :  { %v15025_v2 = vpop.f32.mrf.mxu1 }
0x125f   :  { %v13043_v26 = vmul.f32 1.442695, %v13034_v18  ;;  %v13028_v16 = vadd.f32 %v13024_v20, %v13006_v37 }
0x1260   :  { %v12887_v34 = vpop.f32.mrf.mxu1 }
0x1261   :  { %15093 = vpow2.f32 %v13043_v26  ;;  %v13035_v36 = vsub.f32 0.0, %v13028_v16  ;;  %v13011_v30 = vadd.f32 %v13010_v14, %v12887_v34 }
0x1262   :  { %v15028_v1 = vpop.f32.mrf.mxu1 }
0x1263   :  { %v13045_v38 = vmul.f32 1.442695, %v13035_v36  ;;  %v13029_v51 = vadd.f32 %v13024_v20, %v13011_v30 }
0x1264   :  { %v12892_v50 = vpop.f32.mrf.mxu1 }
0x1265   :  { %15095 = vpow2.f32 %v13045_v38  ;;  %v13036_v62 = vsub.f32 0.0, %v13029_v51  ;;  %v13016_v35 = vadd.f32 %v13015_v60, %v12892_v50 }
0x1266   :  { %v15090_v49 = vpop.eup %15089  ;;  %v15031_v4 = vpop.f32.mrf.mxu1 }
0x1267   :  { %v13053_v32 = vadd.f32 1.0, %v15090_v49  ;;  %v13047_v54 = vmul.f32 1.442695, %v13036_v62  ;;  %v13030_v42 = vadd.f32 %v13024_v20, %v13016_v35 }
0x1268   :  { %v12897_v27 = vpop.f32.mrf.mxu1 }
0x1269   :  { %15097 = vrcp.f32 %v13053_v32  ;;  %v13037_v45 = vsub.f32 0.0, %v13030_v42  ;;  %v13021_v21 = vadd.f32 %v13020_v7, %v12897_v27 }
0x126a   :  { %v15092_v23 = vpop.eup %15091  ;;  %15099 = vpow2.f32 %v13047_v54  ;;  %v15034_v19 = vpop.f32.mrf.mxu1 }
0x126b   :  { %v13054_v11 = vadd.f32 1.0, %v15092_v23  ;;  %v13049_v28 = vmul.f32 1.442695, %v13037_v45  ;;  %v13031_v63 = vadd.f32 %v13024_v20, %v13021_v21 }
0x126d   :  { %15101 = vrcp.f32 %v13054_v11  ;;  %v13038_v44 = vsub.f32 0.0, %v13031_v63 }
0x126e   :  { %v15094_v12 = vpop.eup %15093  ;;  %15103 = vpow2.f32 %v13049_v28 }
0x126f   :  { %v13055_v40 = vadd.f32 1.0, %v15094_v12  ;;  %v13051_v41 = vmul.f32 1.442695, %v13038_v44 }
0x1271   :  { %15105 = vrcp.f32 %v13055_v40 }
0x1272   :  { %v15096_v8 = vpop.eup %15095  ;;  %15107 = vpow2.f32 %v13051_v41 }
0x1273   :  { %v13056_v48 = vadd.f32 1.0, %v15096_v8 }
0x1275   :  { %15109 = vrcp.f32 %v13056_v48 }
0x1276   :  { %v15098_v47 = vpop.eup %15097 }
0x1277   :  { %v15100_v10 = vpop.eup %15099  ;;  %13067 = vst.msk [vmem:[#allocation7] sm:$0xff] %vm233_vm4, %v15098_v47 }
0x1278   :  { %v13057_v59 = vadd.f32 1.0, %v15100_v10 }
0x127a   :  { %v15102_v25 = vpop.eup %15101  ;;  %15111 = vrcp.f32 %v13057_v59 }
0x127b   :  { %v15104_v9 = vpop.eup %15103  ;;  %13068 = vst.msk [vmem:[#allocation7 + $0x8] sm:$0xff] %vm233_vm4, %v15102_v25 }
0x127c   :  { %v13058_v13 = vadd.f32 1.0, %v15104_v9 }
0x127e   :  { %v15106_v53 = vpop.eup %15105  ;;  %15113 = vrcp.f32 %v13058_v13 }
0x127f   :  { %v15108_v14 = vpop.eup %15107  ;;  %13069 = vst.msk [vmem:[#allocation7 + $0x10] sm:$0xff] %vm233_vm4, %v15106_v53 }
0x1280   :  { %v13059_v56 = vadd.f32 1.0, %v15108_v14 }
0x1282   :  { %v15110_v60 = vpop.eup %15109  ;;  %15115 = vrcp.f32 %v13059_v56 }
0x1283   :  { %13070 = vst.msk [vmem:[#allocation7 + $0x18] sm:$0xff] %vm233_vm4, %v15110_v60 }
0x1287   :  { %v15112_v58 = vpop.eup %15111 }
0x1288   :  { %13071 = vst.msk [vmem:[#allocation7 + $0x20] sm:$0xff] %vm233_vm4, %v15112_v58 }
0x128b   :  { %v15114_v7 = vpop.eup %15113 }
0x128c   :  { %13072 = vst.msk [vmem:[#allocation7 + $0x28] sm:$0xff] %vm233_vm4, %v15114_v7 }
0x128f   :  { %v15116_v61 = vpop.eup %15115 }
0x1290   :  { %13073 = vst.msk [vmem:[#allocation7 + $0x30] sm:$0xff] %vm233_vm4, %v15116_v61 }
0x1291   :  { %15168 = shalt.err (!%p15165_p0)
}
0x1292   :  { %13085 = dma.vmem_to_hbm [thread:$0]  %s13080_s30, 896, %s17182_s2, [#allocation4], %s15184_s12, %s15184_s12, %s15185_s13  }
0x1293   :  { %15181 = dma.done.wait [#allocation4], 896  }
0x1294   :  { %15182 = vsyncadd [#allocation4], 4294966400 }
0x1295   :  { %13089 = vsyncpa [#allocation3], 1 }
0x1296   :  { %13090 = vsyncpa [#allocation6], 1 }
0x1297   :  { %13091 = vsyncpa [#allocation4], 1 }

</bundles_post_ra>
